<compile_context>
chip_gen: v7x
topology: tpu7x:2x2x1
jax: 0.10.0
libtpu: 0.0.40
codegen_flags: <defaults>
</compile_context>

<pallas_src>
import jax
import jax.numpy as jnp
from jax.experimental import pallas as pl
from jax.experimental.pallas import tpu as pltpu


# ----------------------------- fused kernel --------------------------------

def _make_pnet_kernel(H, W):
    """Builds the fused PNet kernel for a fixed (H, W) input resolution."""
    C1 = 10
    H1, W1 = H - 2, W - 2                       # conv1 output
    Hp = -(-(H1 - 3) // 2) + 1                  # ceil-mode pool output
    Wp = -(-(W1 - 3) // 2) + 1
    H2, W2 = Hp - 2, Wp - 2                     # conv2 output
    H3, W3 = H2 - 2, W2 - 2                     # conv3 output
    HP_IN, WP_IN = 2 * Hp + 1, 2 * Wp + 1       # -inf padded conv1 slab extents

    def prelu(z, a):
        return jnp.where(z >= 0.0, z, a * z)

    def conv_rows(in_rows, w_taps, b, a, h_out, w_out):
        """3x3 valid conv + bias + PReLU, one output row at a time.

        in_rows: python list of (w_in, Cin) values, w_taps: list of 9
        (Cin, Cout) values.  Returns python list of (w_out, Cout) rows.
        """
        out_rows = []
        for ho in range(h_out):
            acc = None
            for dy in range(3):
                row = in_rows[ho + dy]                        # (w_in, Cin)
                for dx in range(3):
                    part = jnp.dot(row[dx:dx + w_out, :], w_taps[dy * 3 + dx],
                                   preferred_element_type=jnp.float32)
                    acc = part if acc is None else acc + part
            out_rows.append(prelu(acc + b, a))
        return out_rows

    def kernel(x_ref, w1_ref, b1_ref, a1_ref, w2_ref, b2_ref, a2_ref,
               w3_ref, b3_ref, a3_ref, wh_ref, bh_ref, out_ref,
               act1_ref, hpool_ref):
        x = x_ref[...]                                        # (H, W, 3)
        b1, a1 = b1_ref[...], a1_ref[...]
        b2, a2 = b2_ref[...], a2_ref[...]
        b3, a3 = b3_ref[...], a3_ref[...]
        w1t = [w1_ref[t] for t in range(9)]
        w2t = [w2_ref[t] for t in range(9)]
        w3t = [w3_ref[t] for t in range(9)]

        # ---- conv1 + PReLU -> -inf padded VMEM slab (pad feeds the pool) --
        # ceil_mode guarantees every pooling window holds >= 1 valid element,
        # so the -inf border never survives the max.
        act1_ref[...] = jnp.full((HP_IN, WP_IN, C1), -jnp.inf, jnp.float32)
        xrows = [x[r] for r in range(H)]                      # (W, 3) each
        rows1 = conv_rows(xrows, w1t, b1, a1, H1, W1)
        for ho in range(H1):
            act1_ref[ho, 0:W1, :] = rows1[ho]

        # ---- pool1: MaxPool2d(kernel=3, stride=2, ceil_mode=True) ---------
        hm = jnp.maximum(
            jnp.maximum(act1_ref[pl.ds(0, Hp, stride=2), :, :],
                        act1_ref[pl.ds(1, Hp, stride=2), :, :]),
            act1_ref[pl.ds(2, Hp, stride=2), :, :])           # (Hp, WP_IN, C1)
        hpool_ref[...] = hm
        pooled = jnp.maximum(
            jnp.maximum(hpool_ref[:, pl.ds(0, Wp, stride=2), :],
                        hpool_ref[:, pl.ds(1, Wp, stride=2), :]),
            hpool_ref[:, pl.ds(2, Wp, stride=2), :])          # (Hp, Wp, C1)

        # ---- conv2 + PReLU -------------------------------------------------
        prows = [pooled[r] for r in range(Hp)]                # (Wp, 10) each
        rows2 = conv_rows(prows, w2t, b2, a2, H2, W2)         # (W2, 16) each

        # ---- conv3 + PReLU -------------------------------------------------
        rows3 = conv_rows(rows2, w3t, b3, a3, H3, W3)         # (W3, 32) each

        # ---- fused 1x1 heads: lane-padded (32, 128) weight slab ------------
        wh, bh = wh_ref[...], bh_ref[...]
        col = jax.lax.broadcasted_iota(jnp.int32, (W3, 128), 1)
        for ho in range(H3):
            zh = jnp.dot(rows3[ho], wh,
                         preferred_element_type=jnp.float32) + bh   # (W3, 128)
            sig = 1.0 / (1.0 + jnp.exp(-zh))                  # sigmoid
            out_ref[ho * W3:(ho + 1) * W3, :] = jnp.where(col == 0, sig, zh)

    dims = dict(H1=H1, W1=W1, Hp=Hp, Wp=Wp, H2=H2, W2=W2, H3=H3, W3=W3,
                HP_IN=HP_IN, WP_IN=WP_IN)
    return kernel, dims


# -------------------------------- forward ----------------------------------

@jax.jit
def pnet_forward(params, x_nchw):
    x = jnp.transpose(x_nchw, (0, 2, 3, 1)).astype(jnp.float32)   # NCHW -> NHWC
    N, H, W, _ = x.shape
    assert H >= 12 and W >= 12, "PNet needs at least 12x12 inputs"
    kernel, d = _make_pnet_kernel(H, W)
    H3, W3 = d["H3"], d["W3"]

    out = pl.pallas_call(
        kernel,
        out_shape=jax.ShapeDtypeStruct((N, H3 * W3, 128), jnp.float32),
        grid=(N,),
        in_specs=[
            pl.BlockSpec((None, H, W, 3), lambda n: (n, 0, 0, 0)),
            pl.BlockSpec((9, 3, 10), lambda n: (0, 0, 0)),
            pl.BlockSpec((1, 10), lambda n: (0, 0)),
            pl.BlockSpec((1, 10), lambda n: (0, 0)),
            pl.BlockSpec((9, 10, 16), lambda n: (0, 0, 0)),
            pl.BlockSpec((1, 16), lambda n: (0, 0)),
            pl.BlockSpec((1, 16), lambda n: (0, 0)),
            pl.BlockSpec((9, 16, 32), lambda n: (0, 0, 0)),
            pl.BlockSpec((1, 32), lambda n: (0, 0)),
            pl.BlockSpec((1, 32), lambda n: (0, 0)),
            pl.BlockSpec((32, 128), lambda n: (0, 0)),
            pl.BlockSpec((1, 128), lambda n: (0, 0)),
        ],
        out_specs=pl.BlockSpec((None, H3 * W3, 128), lambda n: (n, 0, 0)),
        scratch_shapes=[
            pltpu.VMEM((d["HP_IN"], d["WP_IN"], 10), jnp.float32),
            pltpu.VMEM((d["Hp"], d["WP_IN"], 10), jnp.float32),
        ],
        compiler_params=pltpu.CompilerParams(
            dimension_semantics=("parallel",),
            vmem_limit_bytes=32 * 1024 * 1024),
    )(x, params["w1"], params["b1"], params["a1"],
      params["w2"], params["b2"], params["a2"],
      params["w3"], params["b3"], params["a3"],
      params["wh"], params["bh"])

    out = out.reshape(N, H3, W3, 128)
    cls = jnp.transpose(out[..., 0:1], (0, 3, 1, 2))          # (N, 1, H3, W3)
    box = jnp.transpose(out[..., 1:5], (0, 3, 1, 2))          # (N, 4, H3, W3)
    return cls, box


# ------------------------------- parameters --------------------------------

def init_params(key):
    """Deterministic synthetic weights (tap-major conv layout)."""
    ks = jax.random.split(key, 10)

    def conv_w(k, cin, cout):
        w = jax.random.normal(k, (3, 3, cin, cout), jnp.float32) / jnp.sqrt(9.0 * cin)
        return w.reshape(9, cin, cout)                        # (tap, Cin, Cout)

    def bias(k, cout):
        return (0.01 * jax.random.normal(k, (cout,), jnp.float32)).reshape(1, cout)

    def alpha(cout):                                          # nn.PReLU() default 0.25
        return jnp.full((1, cout), 0.25, jnp.float32)

    # lane-padded, fused head weights: col 0 = conv4_1 (cls), cols 1..4 = conv4_2
    w41 = jax.random.normal(ks[6], (32, 1), jnp.float32) / jnp.sqrt(32.0)
    b41 = 0.01 * jax.random.normal(ks[7], (1,), jnp.float32)
    w42 = jax.random.normal(ks[8], (32, 4), jnp.float32) / jnp.sqrt(32.0)
    b42 = 0.01 * jax.random.normal(ks[9], (4,), jnp.float32)
    wh = jnp.zeros((32, 128), jnp.float32).at[:, 0:1].set(w41).at[:, 1:5].set(w42)
    bh = jnp.zeros((1, 128), jnp.float32).at[0, 0:1].set(b41).at[0, 1:5].set(b42)

    return {
        "w1": conv_w(ks[0], 3, 10), "b1": bias(ks[1], 10), "a1": alpha(10),
        "w2": conv_w(ks[2], 10, 16), "b2": bias(ks[3], 16), "a2": alpha(16),
        "w3": conv_w(ks[4], 16, 32), "b3": bias(ks[5], 32), "a3": alpha(32),
        "wh": wh, "bh": bh,
    }


# ------------------------- pure-JAX reference check -------------------------

def pnet_reference(params, x_nchw):
    """Pure-XLA reference used only to validate the Pallas kernel."""
    x = jnp.transpose(x_nchw, (0, 2, 3, 1)).astype(jnp.float32)

    def conv(x, w_taps, b, a):
        cin, cout = w_taps.shape[1], w_taps.shape[2]
        w = w_taps.reshape(3, 3, cin, cout)
        z = jax.lax.conv_general_dilated(
            x, w, window_strides=(1, 1), padding="VALID",
            dimension_numbers=("NHWC", "HWIO", "NHWC"),
            precision=jax.lax.Precision.HIGHEST) + b.reshape(1, 1, 1, cout)
        return jnp.where(z >= 0.0, z, a.reshape(1, 1, 1, cout) * z)

    a1 = conv(x, params["w1"], params["b1"], params["a1"])
    H1, W1 = a1.shape[1], a1.shape[2]
    Hp = -(-(H1 - 3) // 2) + 1
    Wp = -(-(W1 - 3) // 2) + 1
    pad_h = (Hp - 1) * 2 + 3 - H1
    pad_w = (Wp - 1) * 2 + 3 - W1
    p1 = jax.lax.reduce_window(
        a1, -jnp.inf, jax.lax.max, (1, 3, 3, 1), (1, 2, 2, 1),
        ((0, 0), (0, pad_h), (0, pad_w), (0, 0)))
    a2 = conv(p1, params["w2"], params["b2"], params["a2"])
    a3 = conv(a2, params["w3"], params["b3"], params["a3"])
    zh = jnp.einsum("nhwc,ck->nhwk", a3, params["wh"][:, 0:5],
                    precision=jax.lax.Precision.HIGHEST) + params["bh"][0, 0:5]
    cls = jax.nn.sigmoid(zh[..., 0:1])
    box = zh[..., 1:5]
    return jnp.transpose(cls, (0, 3, 1, 2)), jnp.transpose(box, (0, 3, 1, 2))


if __name__ == "__main__":
    x = jax.random.normal(jax.random.PRNGKey(0), (2, 3, 16, 16), jnp.float32)
    params = init_params(jax.random.PRNGKey(1))

    cls, box = pnet_forward(params, x)
    jax.block_until_ready((cls, box))

    assert cls.shape == (2, 1, 3, 3), cls.shape
    assert box.shape == (2, 4, 3, 3), box.shape
    assert bool(jnp.all((cls >= 0.0) & (cls <= 1.0)))
    assert bool(jnp.all(jnp.isfinite(box)))

    # cross-check against a pure-XLA reference
    cls_ref, box_ref = pnet_reference(params, x)
    assert bool(jnp.allclose(cls, cls_ref, atol=2e-3, rtol=2e-3)), "cls mismatch"
    assert bool(jnp.allclose(box, box_ref, atol=2e-3, rtol=2e-3)), "box mismatch"

    print("KERNEL_OK")
</pallas_src>

<mosaic_0001>
module attributes {stable_mosaic.version = 11 : i64} {
  func.func @kernel(%arg0: i32, %arg1: memref<1x16x16x3xf32, #tpu.memory_space<vmem>>, %arg2: memref<9x3x10xf32, #tpu.memory_space<vmem>>, %arg3: memref<1x10xf32, #tpu.memory_space<vmem>>, %arg4: memref<1x10xf32, #tpu.memory_space<vmem>>, %arg5: memref<9x10x16xf32, #tpu.memory_space<vmem>>, %arg6: memref<1x16xf32, #tpu.memory_space<vmem>>, %arg7: memref<1x16xf32, #tpu.memory_space<vmem>>, %arg8: memref<9x16x32xf32, #tpu.memory_space<vmem>>, %arg9: memref<1x32xf32, #tpu.memory_space<vmem>>, %arg10: memref<1x32xf32, #tpu.memory_space<vmem>>, %arg11: memref<32x128xf32, #tpu.memory_space<vmem>>, %arg12: memref<1x128xf32, #tpu.memory_space<vmem>>, %arg13: memref<1x9x128xf32, #tpu.memory_space<vmem>>, %arg14: memref<15x15x10xf32, #tpu.memory_space<vmem>>, %arg15: memref<7x15x10xf32, #tpu.memory_space<vmem>>) attributes {dimension_semantics = [#tpu.dimension_semantics<parallel>], iteration_bounds = array<i64: 2>, scalar_prefetch = 0 : i64, scratch_operands = 2 : i64, tpu.core_type = #tpu.core_type<tc>, window_params = [{transform_indices = @transform_0, window_bounds = array<i64: 1, 16, 16, 3>}, {pipeline_mode = #tpu.pipeline_mode<synchronous>, transform_indices = @transform_1, window_bounds = array<i64: 9, 3, 10>}, {pipeline_mode = #tpu.pipeline_mode<synchronous>, transform_indices = @transform_2, window_bounds = array<i64: 1, 10>}, {pipeline_mode = #tpu.pipeline_mode<synchronous>, transform_indices = @transform_3, window_bounds = array<i64: 1, 10>}, {pipeline_mode = #tpu.pipeline_mode<synchronous>, transform_indices = @transform_4, window_bounds = array<i64: 9, 10, 16>}, {pipeline_mode = #tpu.pipeline_mode<synchronous>, transform_indices = @transform_5, window_bounds = array<i64: 1, 16>}, {pipeline_mode = #tpu.pipeline_mode<synchronous>, transform_indices = @transform_6, window_bounds = array<i64: 1, 16>}, {pipeline_mode = #tpu.pipeline_mode<synchronous>, transform_indices = @transform_7, window_bounds = array<i64: 9, 16, 32>}, {pipeline_mode = #tpu.pipeline_mode<synchronous>, transform_indices = @transform_8, window_bounds = array<i64: 1, 32>}, {pipeline_mode = #tpu.pipeline_mode<synchronous>, transform_indices = @transform_9, window_bounds = array<i64: 1, 32>}, {pipeline_mode = #tpu.pipeline_mode<synchronous>, transform_indices = @transform_10, window_bounds = array<i64: 32, 128>}, {pipeline_mode = #tpu.pipeline_mode<synchronous>, transform_indices = @transform_11, window_bounds = array<i64: 1, 128>}, {transform_indices = @transform_12, window_bounds = array<i64: 1, 9, 128>}]} {
    %c0 = arith.constant 0 : index
    %c0_0 = arith.constant 0 : index
    %c0_1 = arith.constant 0 : index
    %c0_2 = arith.constant 0 : index
    %0 = vector.load %arg1[%c0, %c0_0, %c0_1, %c0_2] : memref<1x16x16x3xf32, #tpu.memory_space<vmem>>, vector<1x16x16x3xf32>
    %1 = vector.shape_cast %0 : vector<1x16x16x3xf32> to vector<16x16x3xf32>
    %c0_3 = arith.constant 0 : index
    %c0_4 = arith.constant 0 : index
    %2 = vector.load %arg3[%c0_3, %c0_4] : memref<1x10xf32, #tpu.memory_space<vmem>>, vector<1x10xf32>
    %c0_5 = arith.constant 0 : index
    %c0_6 = arith.constant 0 : index
    %3 = vector.load %arg4[%c0_5, %c0_6] : memref<1x10xf32, #tpu.memory_space<vmem>>, vector<1x10xf32>
    %c0_7 = arith.constant 0 : index
    %c0_8 = arith.constant 0 : index
    %4 = vector.load %arg6[%c0_7, %c0_8] : memref<1x16xf32, #tpu.memory_space<vmem>>, vector<1x16xf32>
    %c0_9 = arith.constant 0 : index
    %c0_10 = arith.constant 0 : index
    %5 = vector.load %arg7[%c0_9, %c0_10] : memref<1x16xf32, #tpu.memory_space<vmem>>, vector<1x16xf32>
    %c0_11 = arith.constant 0 : index
    %c0_12 = arith.constant 0 : index
    %6 = vector.load %arg9[%c0_11, %c0_12] : memref<1x32xf32, #tpu.memory_space<vmem>>, vector<1x32xf32>
    %c0_13 = arith.constant 0 : index
    %c0_14 = arith.constant 0 : index
    %7 = vector.load %arg10[%c0_13, %c0_14] : memref<1x32xf32, #tpu.memory_space<vmem>>, vector<1x32xf32>
    %c0_15 = arith.constant 0 : index
    %c0_16 = arith.constant 0 : index
    %c0_17 = arith.constant 0 : index
    %8 = vector.load %arg2[%c0_15, %c0_16, %c0_17] : memref<9x3x10xf32, #tpu.memory_space<vmem>>, vector<1x3x10xf32>
    %9 = vector.shape_cast %8 : vector<1x3x10xf32> to vector<3x10xf32>
    %c1 = arith.constant 1 : index
    %c0_18 = arith.constant 0 : index
    %c0_19 = arith.constant 0 : index
    %10 = vector.load %arg2[%c1, %c0_18, %c0_19] : memref<9x3x10xf32, #tpu.memory_space<vmem>>, vector<1x3x10xf32>
    %11 = vector.shape_cast %10 : vector<1x3x10xf32> to vector<3x10xf32>
    %c2 = arith.constant 2 : index
    %c0_20 = arith.constant 0 : index
    %c0_21 = arith.constant 0 : index
    %12 = vector.load %arg2[%c2, %c0_20, %c0_21] : memref<9x3x10xf32, #tpu.memory_space<vmem>>, vector<1x3x10xf32>
    %13 = vector.shape_cast %12 : vector<1x3x10xf32> to vector<3x10xf32>
    %c3 = arith.constant 3 : index
    %c0_22 = arith.constant 0 : index
    %c0_23 = arith.constant 0 : index
    %14 = vector.load %arg2[%c3, %c0_22, %c0_23] : memref<9x3x10xf32, #tpu.memory_space<vmem>>, vector<1x3x10xf32>
    %15 = vector.shape_cast %14 : vector<1x3x10xf32> to vector<3x10xf32>
    %c4 = arith.constant 4 : index
    %c0_24 = arith.constant 0 : index
    %c0_25 = arith.constant 0 : index
    %16 = vector.load %arg2[%c4, %c0_24, %c0_25] : memref<9x3x10xf32, #tpu.memory_space<vmem>>, vector<1x3x10xf32>
    %17 = vector.shape_cast %16 : vector<1x3x10xf32> to vector<3x10xf32>
    %c5 = arith.constant 5 : index
    %c0_26 = arith.constant 0 : index
    %c0_27 = arith.constant 0 : index
    %18 = vector.load %arg2[%c5, %c0_26, %c0_27] : memref<9x3x10xf32, #tpu.memory_space<vmem>>, vector<1x3x10xf32>
    %19 = vector.shape_cast %18 : vector<1x3x10xf32> to vector<3x10xf32>
    %c6 = arith.constant 6 : index
    %c0_28 = arith.constant 0 : index
    %c0_29 = arith.constant 0 : index
    %20 = vector.load %arg2[%c6, %c0_28, %c0_29] : memref<9x3x10xf32, #tpu.memory_space<vmem>>, vector<1x3x10xf32>
    %21 = vector.shape_cast %20 : vector<1x3x10xf32> to vector<3x10xf32>
    %c7 = arith.constant 7 : index
    %c0_30 = arith.constant 0 : index
    %c0_31 = arith.constant 0 : index
    %22 = vector.load %arg2[%c7, %c0_30, %c0_31] : memref<9x3x10xf32, #tpu.memory_space<vmem>>, vector<1x3x10xf32>
    %23 = vector.shape_cast %22 : vector<1x3x10xf32> to vector<3x10xf32>
    %c8 = arith.constant 8 : index
    %c0_32 = arith.constant 0 : index
    %c0_33 = arith.constant 0 : index
    %24 = vector.load %arg2[%c8, %c0_32, %c0_33] : memref<9x3x10xf32, #tpu.memory_space<vmem>>, vector<1x3x10xf32>
    %25 = vector.shape_cast %24 : vector<1x3x10xf32> to vector<3x10xf32>
    %c0_34 = arith.constant 0 : index
    %c0_35 = arith.constant 0 : index
    %c0_36 = arith.constant 0 : index
    %26 = vector.load %arg5[%c0_34, %c0_35, %c0_36] : memref<9x10x16xf32, #tpu.memory_space<vmem>>, vector<1x10x16xf32>
    %27 = vector.shape_cast %26 : vector<1x10x16xf32> to vector<10x16xf32>
    %c1_37 = arith.constant 1 : index
    %c0_38 = arith.constant 0 : index
    %c0_39 = arith.constant 0 : index
    %28 = vector.load %arg5[%c1_37, %c0_38, %c0_39] : memref<9x10x16xf32, #tpu.memory_space<vmem>>, vector<1x10x16xf32>
    %29 = vector.shape_cast %28 : vector<1x10x16xf32> to vector<10x16xf32>
    %c2_40 = arith.constant 2 : index
    %c0_41 = arith.constant 0 : index
    %c0_42 = arith.constant 0 : index
    %30 = vector.load %arg5[%c2_40, %c0_41, %c0_42] : memref<9x10x16xf32, #tpu.memory_space<vmem>>, vector<1x10x16xf32>
    %31 = vector.shape_cast %30 : vector<1x10x16xf32> to vector<10x16xf32>
    %c3_43 = arith.constant 3 : index
    %c0_44 = arith.constant 0 : index
    %c0_45 = arith.constant 0 : index
    %32 = vector.load %arg5[%c3_43, %c0_44, %c0_45] : memref<9x10x16xf32, #tpu.memory_space<vmem>>, vector<1x10x16xf32>
    %33 = vector.shape_cast %32 : vector<1x10x16xf32> to vector<10x16xf32>
    %c4_46 = arith.constant 4 : index
    %c0_47 = arith.constant 0 : index
    %c0_48 = arith.constant 0 : index
    %34 = vector.load %arg5[%c4_46, %c0_47, %c0_48] : memref<9x10x16xf32, #tpu.memory_space<vmem>>, vector<1x10x16xf32>
    %35 = vector.shape_cast %34 : vector<1x10x16xf32> to vector<10x16xf32>
    %c5_49 = arith.constant 5 : index
    %c0_50 = arith.constant 0 : index
    %c0_51 = arith.constant 0 : index
    %36 = vector.load %arg5[%c5_49, %c0_50, %c0_51] : memref<9x10x16xf32, #tpu.memory_space<vmem>>, vector<1x10x16xf32>
    %37 = vector.shape_cast %36 : vector<1x10x16xf32> to vector<10x16xf32>
    %c6_52 = arith.constant 6 : index
    %c0_53 = arith.constant 0 : index
    %c0_54 = arith.constant 0 : index
    %38 = vector.load %arg5[%c6_52, %c0_53, %c0_54] : memref<9x10x16xf32, #tpu.memory_space<vmem>>, vector<1x10x16xf32>
    %39 = vector.shape_cast %38 : vector<1x10x16xf32> to vector<10x16xf32>
    %c7_55 = arith.constant 7 : index
    %c0_56 = arith.constant 0 : index
    %c0_57 = arith.constant 0 : index
    %40 = vector.load %arg5[%c7_55, %c0_56, %c0_57] : memref<9x10x16xf32, #tpu.memory_space<vmem>>, vector<1x10x16xf32>
    %41 = vector.shape_cast %40 : vector<1x10x16xf32> to vector<10x16xf32>
    %c8_58 = arith.constant 8 : index
    %c0_59 = arith.constant 0 : index
    %c0_60 = arith.constant 0 : index
    %42 = vector.load %arg5[%c8_58, %c0_59, %c0_60] : memref<9x10x16xf32, #tpu.memory_space<vmem>>, vector<1x10x16xf32>
    %43 = vector.shape_cast %42 : vector<1x10x16xf32> to vector<10x16xf32>
    %c0_61 = arith.constant 0 : index
    %c0_62 = arith.constant 0 : index
    %c0_63 = arith.constant 0 : index
    %44 = vector.load %arg8[%c0_61, %c0_62, %c0_63] : memref<9x16x32xf32, #tpu.memory_space<vmem>>, vector<1x16x32xf32>
    %45 = vector.shape_cast %44 : vector<1x16x32xf32> to vector<16x32xf32>
    %c1_64 = arith.constant 1 : index
    %c0_65 = arith.constant 0 : index
    %c0_66 = arith.constant 0 : index
    %46 = vector.load %arg8[%c1_64, %c0_65, %c0_66] : memref<9x16x32xf32, #tpu.memory_space<vmem>>, vector<1x16x32xf32>
    %47 = vector.shape_cast %46 : vector<1x16x32xf32> to vector<16x32xf32>
    %c2_67 = arith.constant 2 : index
    %c0_68 = arith.constant 0 : index
    %c0_69 = arith.constant 0 : index
    %48 = vector.load %arg8[%c2_67, %c0_68, %c0_69] : memref<9x16x32xf32, #tpu.memory_space<vmem>>, vector<1x16x32xf32>
    %49 = vector.shape_cast %48 : vector<1x16x32xf32> to vector<16x32xf32>
    %c3_70 = arith.constant 3 : index
    %c0_71 = arith.constant 0 : index
    %c0_72 = arith.constant 0 : index
    %50 = vector.load %arg8[%c3_70, %c0_71, %c0_72] : memref<9x16x32xf32, #tpu.memory_space<vmem>>, vector<1x16x32xf32>
    %51 = vector.shape_cast %50 : vector<1x16x32xf32> to vector<16x32xf32>
    %c4_73 = arith.constant 4 : index
    %c0_74 = arith.constant 0 : index
    %c0_75 = arith.constant 0 : index
    %52 = vector.load %arg8[%c4_73, %c0_74, %c0_75] : memref<9x16x32xf32, #tpu.memory_space<vmem>>, vector<1x16x32xf32>
    %53 = vector.shape_cast %52 : vector<1x16x32xf32> to vector<16x32xf32>
    %c5_76 = arith.constant 5 : index
    %c0_77 = arith.constant 0 : index
    %c0_78 = arith.constant 0 : index
    %54 = vector.load %arg8[%c5_76, %c0_77, %c0_78] : memref<9x16x32xf32, #tpu.memory_space<vmem>>, vector<1x16x32xf32>
    %55 = vector.shape_cast %54 : vector<1x16x32xf32> to vector<16x32xf32>
    %c6_79 = arith.constant 6 : index
    %c0_80 = arith.constant 0 : index
    %c0_81 = arith.constant 0 : index
    %56 = vector.load %arg8[%c6_79, %c0_80, %c0_81] : memref<9x16x32xf32, #tpu.memory_space<vmem>>, vector<1x16x32xf32>
    %57 = vector.shape_cast %56 : vector<1x16x32xf32> to vector<16x32xf32>
    %c7_82 = arith.constant 7 : index
    %c0_83 = arith.constant 0 : index
    %c0_84 = arith.constant 0 : index
    %58 = vector.load %arg8[%c7_82, %c0_83, %c0_84] : memref<9x16x32xf32, #tpu.memory_space<vmem>>, vector<1x16x32xf32>
    %59 = vector.shape_cast %58 : vector<1x16x32xf32> to vector<16x32xf32>
    %c8_85 = arith.constant 8 : index
    %c0_86 = arith.constant 0 : index
    %c0_87 = arith.constant 0 : index
    %60 = vector.load %arg8[%c8_85, %c0_86, %c0_87] : memref<9x16x32xf32, #tpu.memory_space<vmem>>, vector<1x16x32xf32>
    %61 = vector.shape_cast %60 : vector<1x16x32xf32> to vector<16x32xf32>
    %cst = arith.constant 0xFF800000 : f32
    %62 = vector.broadcast %cst : f32 to vector<15x15x10xf32>
    %c0_88 = arith.constant 0 : index
    %c0_89 = arith.constant 0 : index
    %c0_90 = arith.constant 0 : index
    %63 = vector.load %arg14[%c0_88, %c0_89, %c0_90] : memref<15x15x10xf32, #tpu.memory_space<vmem>>, vector<15x15x10xf32>
    tpu.vector_store %arg14[%c0_88, %c0_89, %c0_90], %62 {strides = array<i32>} : memref<15x15x10xf32, #tpu.memory_space<vmem>>, vector<15x15x10xf32>,
    %64 = vector.extract_strided_slice %1 {offsets = [0, 0, 0], sizes = [1, 16, 3], strides = [1, 1, 1]} : vector<16x16x3xf32> to vector<1x16x3xf32>
    %65 = vector.shape_cast %64 : vector<1x16x3xf32> to vector<16x3xf32>
    %66 = vector.extract_strided_slice %1 {offsets = [1, 0, 0], sizes = [1, 16, 3], strides = [1, 1, 1]} : vector<16x16x3xf32> to vector<1x16x3xf32>
    %67 = vector.shape_cast %66 : vector<1x16x3xf32> to vector<16x3xf32>
    %68 = vector.extract_strided_slice %1 {offsets = [2, 0, 0], sizes = [1, 16, 3], strides = [1, 1, 1]} : vector<16x16x3xf32> to vector<1x16x3xf32>
    %69 = vector.shape_cast %68 : vector<1x16x3xf32> to vector<16x3xf32>
    %70 = vector.extract_strided_slice %1 {offsets = [3, 0, 0], sizes = [1, 16, 3], strides = [1, 1, 1]} : vector<16x16x3xf32> to vector<1x16x3xf32>
    %71 = vector.shape_cast %70 : vector<1x16x3xf32> to vector<16x3xf32>
    %72 = vector.extract_strided_slice %1 {offsets = [4, 0, 0], sizes = [1, 16, 3], strides = [1, 1, 1]} : vector<16x16x3xf32> to vector<1x16x3xf32>
    %73 = vector.shape_cast %72 : vector<1x16x3xf32> to vector<16x3xf32>
    %74 = vector.extract_strided_slice %1 {offsets = [5, 0, 0], sizes = [1, 16, 3], strides = [1, 1, 1]} : vector<16x16x3xf32> to vector<1x16x3xf32>
    %75 = vector.shape_cast %74 : vector<1x16x3xf32> to vector<16x3xf32>
    %76 = vector.extract_strided_slice %1 {offsets = [6, 0, 0], sizes = [1, 16, 3], strides = [1, 1, 1]} : vector<16x16x3xf32> to vector<1x16x3xf32>
    %77 = vector.shape_cast %76 : vector<1x16x3xf32> to vector<16x3xf32>
    %78 = vector.extract_strided_slice %1 {offsets = [7, 0, 0], sizes = [1, 16, 3], strides = [1, 1, 1]} : vector<16x16x3xf32> to vector<1x16x3xf32>
    %79 = vector.shape_cast %78 : vector<1x16x3xf32> to vector<16x3xf32>
    %80 = vector.extract_strided_slice %1 {offsets = [8, 0, 0], sizes = [1, 16, 3], strides = [1, 1, 1]} : vector<16x16x3xf32> to vector<1x16x3xf32>
    %81 = vector.shape_cast %80 : vector<1x16x3xf32> to vector<16x3xf32>
    %82 = vector.extract_strided_slice %1 {offsets = [9, 0, 0], sizes = [1, 16, 3], strides = [1, 1, 1]} : vector<16x16x3xf32> to vector<1x16x3xf32>
    %83 = vector.shape_cast %82 : vector<1x16x3xf32> to vector<16x3xf32>
    %84 = vector.extract_strided_slice %1 {offsets = [10, 0, 0], sizes = [1, 16, 3], strides = [1, 1, 1]} : vector<16x16x3xf32> to vector<1x16x3xf32>
    %85 = vector.shape_cast %84 : vector<1x16x3xf32> to vector<16x3xf32>
    %86 = vector.extract_strided_slice %1 {offsets = [11, 0, 0], sizes = [1, 16, 3], strides = [1, 1, 1]} : vector<16x16x3xf32> to vector<1x16x3xf32>
    %87 = vector.shape_cast %86 : vector<1x16x3xf32> to vector<16x3xf32>
    %88 = vector.extract_strided_slice %1 {offsets = [12, 0, 0], sizes = [1, 16, 3], strides = [1, 1, 1]} : vector<16x16x3xf32> to vector<1x16x3xf32>
    %89 = vector.shape_cast %88 : vector<1x16x3xf32> to vector<16x3xf32>
    %90 = vector.extract_strided_slice %1 {offsets = [13, 0, 0], sizes = [1, 16, 3], strides = [1, 1, 1]} : vector<16x16x3xf32> to vector<1x16x3xf32>
    %91 = vector.shape_cast %90 : vector<1x16x3xf32> to vector<16x3xf32>
    %92 = vector.extract_strided_slice %1 {offsets = [14, 0, 0], sizes = [1, 16, 3], strides = [1, 1, 1]} : vector<16x16x3xf32> to vector<1x16x3xf32>
    %93 = vector.shape_cast %92 : vector<1x16x3xf32> to vector<16x3xf32>
    %94 = vector.extract_strided_slice %1 {offsets = [15, 0, 0], sizes = [1, 16, 3], strides = [1, 1, 1]} : vector<16x16x3xf32> to vector<1x16x3xf32>
    %95 = vector.shape_cast %94 : vector<1x16x3xf32> to vector<16x3xf32>
    %96 = vector.extract_strided_slice %65 {offsets = [0, 0], sizes = [14, 3], strides = [1, 1]} : vector<16x3xf32> to vector<14x3xf32>
    %cst_91 = arith.constant dense<0.000000e+00> : vector<14x10xf32>
    %97 = tpu.matmul %96, %9, %cst_91 {dimension_numbers = #tpu.dot_dimension_numbers<[1], [0], [0], [1], [0, 0, 1, 1], [], []>} : vector<14x3xf32>, vector<3x10xf32>, vector<14x10xf32> -> vector<14x10xf32>
    %98 = vector.extract_strided_slice %65 {offsets = [1, 0], sizes = [14, 3], strides = [1, 1]} : vector<16x3xf32> to vector<14x3xf32>
    %cst_92 = arith.constant dense<0.000000e+00> : vector<14x10xf32>
    %99 = tpu.matmul %98, %11, %cst_92 {dimension_numbers = #tpu.dot_dimension_numbers<[1], [0], [0], [1], [0, 0, 1, 1], [], []>} : vector<14x3xf32>, vector<3x10xf32>, vector<14x10xf32> -> vector<14x10xf32>
    %100 = arith.addf %97, %99 : vector<14x10xf32>
    %101 = vector.extract_strided_slice %65 {offsets = [2, 0], sizes = [14, 3], strides = [1, 1]} : vector<16x3xf32> to vector<14x3xf32>
    %cst_93 = arith.constant dense<0.000000e+00> : vector<14x10xf32>
    %102 = tpu.matmul %101, %13, %cst_93 {dimension_numbers = #tpu.dot_dimension_numbers<[1], [0], [0], [1], [0, 0, 1, 1], [], []>} : vector<14x3xf32>, vector<3x10xf32>, vector<14x10xf32> -> vector<14x10xf32>
    %103 = arith.addf %100, %102 : vector<14x10xf32>
    %104 = vector.extract_strided_slice %67 {offsets = [0, 0], sizes = [14, 3], strides = [1, 1]} : vector<16x3xf32> to vector<14x3xf32>
    %cst_94 = arith.constant dense<0.000000e+00> : vector<14x10xf32>
    %105 = tpu.matmul %104, %15, %cst_94 {dimension_numbers = #tpu.dot_dimension_numbers<[1], [0], [0], [1], [0, 0, 1, 1], [], []>} : vector<14x3xf32>, vector<3x10xf32>, vector<14x10xf32> -> vector<14x10xf32>
    %106 = arith.addf %103, %105 : vector<14x10xf32>
    %107 = vector.extract_strided_slice %67 {offsets = [1, 0], sizes = [14, 3], strides = [1, 1]} : vector<16x3xf32> to vector<14x3xf32>
    %cst_95 = arith.constant dense<0.000000e+00> : vector<14x10xf32>
    %108 = tpu.matmul %107, %17, %cst_95 {dimension_numbers = #tpu.dot_dimension_numbers<[1], [0], [0], [1], [0, 0, 1, 1], [], []>} : vector<14x3xf32>, vector<3x10xf32>, vector<14x10xf32> -> vector<14x10xf32>
    %109 = arith.addf %106, %108 : vector<14x10xf32>
    %110 = vector.extract_strided_slice %67 {offsets = [2, 0], sizes = [14, 3], strides = [1, 1]} : vector<16x3xf32> to vector<14x3xf32>
    %cst_96 = arith.constant dense<0.000000e+00> : vector<14x10xf32>
    %111 = tpu.matmul %110, %19, %cst_96 {dimension_numbers = #tpu.dot_dimension_numbers<[1], [0], [0], [1], [0, 0, 1, 1], [], []>} : vector<14x3xf32>, vector<3x10xf32>, vector<14x10xf32> -> vector<14x10xf32>
    %112 = arith.addf %109, %111 : vector<14x10xf32>
    %113 = vector.extract_strided_slice %69 {offsets = [0, 0], sizes = [14, 3], strides = [1, 1]} : vector<16x3xf32> to vector<14x3xf32>
    %cst_97 = arith.constant dense<0.000000e+00> : vector<14x10xf32>
    %114 = tpu.matmul %113, %21, %cst_97 {dimension_numbers = #tpu.dot_dimension_numbers<[1], [0], [0], [1], [0, 0, 1, 1], [], []>} : vector<14x3xf32>, vector<3x10xf32>, vector<14x10xf32> -> vector<14x10xf32>
    %115 = arith.addf %112, %114 : vector<14x10xf32>
    %116 = vector.extract_strided_slice %69 {offsets = [1, 0], sizes = [14, 3], strides = [1, 1]} : vector<16x3xf32> to vector<14x3xf32>
    %cst_98 = arith.constant dense<0.000000e+00> : vector<14x10xf32>
    %117 = tpu.matmul %116, %23, %cst_98 {dimension_numbers = #tpu.dot_dimension_numbers<[1], [0], [0], [1], [0, 0, 1, 1], [], []>} : vector<14x3xf32>, vector<3x10xf32>, vector<14x10xf32> -> vector<14x10xf32>
    %118 = arith.addf %115, %117 : vector<14x10xf32>
    %119 = vector.extract_strided_slice %69 {offsets = [2, 0], sizes = [14, 3], strides = [1, 1]} : vector<16x3xf32> to vector<14x3xf32>
    %cst_99 = arith.constant dense<0.000000e+00> : vector<14x10xf32>
    %120 = tpu.matmul %119, %25, %cst_99 {dimension_numbers = #tpu.dot_dimension_numbers<[1], [0], [0], [1], [0, 0, 1, 1], [], []>} : vector<14x3xf32>, vector<3x10xf32>, vector<14x10xf32> -> vector<14x10xf32>
    %121 = arith.addf %118, %120 : vector<14x10xf32>
    %122 = vector.broadcast %2 : vector<1x10xf32> to vector<14x10xf32>
    %123 = arith.addf %121, %122 : vector<14x10xf32>
    %cst_100 = arith.constant 0.000000e+00 : f32
    %124 = vector.broadcast %cst_100 : f32 to vector<14x10xf32>
    %125 = arith.cmpf oge, %123, %124 : vector<14x10xf32>
    %126 = vector.broadcast %3 : vector<1x10xf32> to vector<14x10xf32>
    %127 = arith.mulf %126, %123 : vector<14x10xf32>
    %128 = arith.select %125, %123, %127 : vector<14x10xi1>, vector<14x10xf32>
    %129 = vector.extract_strided_slice %67 {offsets = [0, 0], sizes = [14, 3], strides = [1, 1]} : vector<16x3xf32> to vector<14x3xf32>
    %cst_101 = arith.constant dense<0.000000e+00> : vector<14x10xf32>
    %130 = tpu.matmul %129, %9, %cst_101 {dimension_numbers = #tpu.dot_dimension_numbers<[1], [0], [0], [1], [0, 0, 1, 1], [], []>} : vector<14x3xf32>, vector<3x10xf32>, vector<14x10xf32> -> vector<14x10xf32>
    %131 = vector.extract_strided_slice %67 {offsets = [1, 0], sizes = [14, 3], strides = [1, 1]} : vector<16x3xf32> to vector<14x3xf32>
    %cst_102 = arith.constant dense<0.000000e+00> : vector<14x10xf32>
    %132 = tpu.matmul %131, %11, %cst_102 {dimension_numbers = #tpu.dot_dimension_numbers<[1], [0], [0], [1], [0, 0, 1, 1], [], []>} : vector<14x3xf32>, vector<3x10xf32>, vector<14x10xf32> -> vector<14x10xf32>
    %133 = arith.addf %130, %132 : vector<14x10xf32>
    %134 = vector.extract_strided_slice %67 {offsets = [2, 0], sizes = [14, 3], strides = [1, 1]} : vector<16x3xf32> to vector<14x3xf32>
    %cst_103 = arith.constant dense<0.000000e+00> : vector<14x10xf32>
    %135 = tpu.matmul %134, %13, %cst_103 {dimension_numbers = #tpu.dot_dimension_numbers<[1], [0], [0], [1], [0, 0, 1, 1], [], []>} : vector<14x3xf32>, vector<3x10xf32>, vector<14x10xf32> -> vector<14x10xf32>
    %136 = arith.addf %133, %135 : vector<14x10xf32>
    %137 = vector.extract_strided_slice %69 {offsets = [0, 0], sizes = [14, 3], strides = [1, 1]} : vector<16x3xf32> to vector<14x3xf32>
    %cst_104 = arith.constant dense<0.000000e+00> : vector<14x10xf32>
    %138 = tpu.matmul %137, %15, %cst_104 {dimension_numbers = #tpu.dot_dimension_numbers<[1], [0], [0], [1], [0, 0, 1, 1], [], []>} : vector<14x3xf32>, vector<3x10xf32>, vector<14x10xf32> -> vector<14x10xf32>
    %139 = arith.addf %136, %138 : vector<14x10xf32>
    %140 = vector.extract_strided_slice %69 {offsets = [1, 0], sizes = [14, 3], strides = [1, 1]} : vector<16x3xf32> to vector<14x3xf32>
    %cst_105 = arith.constant dense<0.000000e+00> : vector<14x10xf32>
    %141 = tpu.matmul %140, %17, %cst_105 {dimension_numbers = #tpu.dot_dimension_numbers<[1], [0], [0], [1], [0, 0, 1, 1], [], []>} : vector<14x3xf32>, vector<3x10xf32>, vector<14x10xf32> -> vector<14x10xf32>
    %142 = arith.addf %139, %141 : vector<14x10xf32>
    %143 = vector.extract_strided_slice %69 {offsets = [2, 0], sizes = [14, 3], strides = [1, 1]} : vector<16x3xf32> to vector<14x3xf32>
    %cst_106 = arith.constant dense<0.000000e+00> : vector<14x10xf32>
    %144 = tpu.matmul %143, %19, %cst_106 {dimension_numbers = #tpu.dot_dimension_numbers<[1], [0], [0], [1], [0, 0, 1, 1], [], []>} : vector<14x3xf32>, vector<3x10xf32>, vector<14x10xf32> -> vector<14x10xf32>
    %145 = arith.addf %142, %144 : vector<14x10xf32>
    %146 = vector.extract_strided_slice %71 {offsets = [0, 0], sizes = [14, 3], strides = [1, 1]} : vector<16x3xf32> to vector<14x3xf32>
    %cst_107 = arith.constant dense<0.000000e+00> : vector<14x10xf32>
    %147 = tpu.matmul %146, %21, %cst_107 {dimension_numbers = #tpu.dot_dimension_numbers<[1], [0], [0], [1], [0, 0, 1, 1], [], []>} : vector<14x3xf32>, vector<3x10xf32>, vector<14x10xf32> -> vector<14x10xf32>
    %148 = arith.addf %145, %147 : vector<14x10xf32>
    %149 = vector.extract_strided_slice %71 {offsets = [1, 0], sizes = [14, 3], strides = [1, 1]} : vector<16x3xf32> to vector<14x3xf32>
    %cst_108 = arith.constant dense<0.000000e+00> : vector<14x10xf32>
    %150 = tpu.matmul %149, %23, %cst_108 {dimension_numbers = #tpu.dot_dimension_numbers<[1], [0], [0], [1], [0, 0, 1, 1], [], []>} : vector<14x3xf32>, vector<3x10xf32>, vector<14x10xf32> -> vector<14x10xf32>
    %151 = arith.addf %148, %150 : vector<14x10xf32>
    %152 = vector.extract_strided_slice %71 {offsets = [2, 0], sizes = [14, 3], strides = [1, 1]} : vector<16x3xf32> to vector<14x3xf32>
    %cst_109 = arith.constant dense<0.000000e+00> : vector<14x10xf32>
    %153 = tpu.matmul %152, %25, %cst_109 {dimension_numbers = #tpu.dot_dimension_numbers<[1], [0], [0], [1], [0, 0, 1, 1], [], []>} : vector<14x3xf32>, vector<3x10xf32>, vector<14x10xf32> -> vector<14x10xf32>
    %154 = arith.addf %151, %153 : vector<14x10xf32>
    %155 = vector.broadcast %2 : vector<1x10xf32> to vector<14x10xf32>
    %156 = arith.addf %154, %155 : vector<14x10xf32>
    %cst_110 = arith.constant 0.000000e+00 : f32
    %157 = vector.broadcast %cst_110 : f32 to vector<14x10xf32>
    %158 = arith.cmpf oge, %156, %157 : vector<14x10xf32>
    %159 = vector.broadcast %3 : vector<1x10xf32> to vector<14x10xf32>
    %160 = arith.mulf %159, %156 : vector<14x10xf32>
    %161 = arith.select %158, %156, %160 : vector<14x10xi1>, vector<14x10xf32>
    %162 = vector.extract_strided_slice %69 {offsets = [0, 0], sizes = [14, 3], strides = [1, 1]} : vector<16x3xf32> to vector<14x3xf32>
    %cst_111 = arith.constant dense<0.000000e+00> : vector<14x10xf32>
    %163 = tpu.matmul %162, %9, %cst_111 {dimension_numbers = #tpu.dot_dimension_numbers<[1], [0], [0], [1], [0, 0, 1, 1], [], []>} : vector<14x3xf32>, vector<3x10xf32>, vector<14x10xf32> -> vector<14x10xf32>
    %164 = vector.extract_strided_slice %69 {offsets = [1, 0], sizes = [14, 3], strides = [1, 1]} : vector<16x3xf32> to vector<14x3xf32>
    %cst_112 = arith.constant dense<0.000000e+00> : vector<14x10xf32>
    %165 = tpu.matmul %164, %11, %cst_112 {dimension_numbers = #tpu.dot_dimension_numbers<[1], [0], [0], [1], [0, 0, 1, 1], [], []>} : vector<14x3xf32>, vector<3x10xf32>, vector<14x10xf32> -> vector<14x10xf32>
    %166 = arith.addf %163, %165 : vector<14x10xf32>
    %167 = vector.extract_strided_slice %69 {offsets = [2, 0], sizes = [14, 3], strides = [1, 1]} : vector<16x3xf32> to vector<14x3xf32>
    %cst_113 = arith.constant dense<0.000000e+00> : vector<14x10xf32>
    %168 = tpu.matmul %167, %13, %cst_113 {dimension_numbers = #tpu.dot_dimension_numbers<[1], [0], [0], [1], [0, 0, 1, 1], [], []>} : vector<14x3xf32>, vector<3x10xf32>, vector<14x10xf32> -> vector<14x10xf32>
    %169 = arith.addf %166, %168 : vector<14x10xf32>
    %170 = vector.extract_strided_slice %71 {offsets = [0, 0], sizes = [14, 3], strides = [1, 1]} : vector<16x3xf32> to vector<14x3xf32>
    %cst_114 = arith.constant dense<0.000000e+00> : vector<14x10xf32>
    %171 = tpu.matmul %170, %15, %cst_114 {dimension_numbers = #tpu.dot_dimension_numbers<[1], [0], [0], [1], [0, 0, 1, 1], [], []>} : vector<14x3xf32>, vector<3x10xf32>, vector<14x10xf32> -> vector<14x10xf32>
    %172 = arith.addf %169, %171 : vector<14x10xf32>
    %173 = vector.extract_strided_slice %71 {offsets = [1, 0], sizes = [14, 3], strides = [1, 1]} : vector<16x3xf32> to vector<14x3xf32>
    %cst_115 = arith.constant dense<0.000000e+00> : vector<14x10xf32>
    %174 = tpu.matmul %173, %17, %cst_115 {dimension_numbers = #tpu.dot_dimension_numbers<[1], [0], [0], [1], [0, 0, 1, 1], [], []>} : vector<14x3xf32>, vector<3x10xf32>, vector<14x10xf32> -> vector<14x10xf32>
    %175 = arith.addf %172, %174 : vector<14x10xf32>
    %176 = vector.extract_strided_slice %71 {offsets = [2, 0], sizes = [14, 3], strides = [1, 1]} : vector<16x3xf32> to vector<14x3xf32>
    %cst_116 = arith.constant dense<0.000000e+00> : vector<14x10xf32>
    %177 = tpu.matmul %176, %19, %cst_116 {dimension_numbers = #tpu.dot_dimension_numbers<[1], [0], [0], [1], [0, 0, 1, 1], [], []>} : vector<14x3xf32>, vector<3x10xf32>, vector<14x10xf32> -> vector<14x10xf32>
    %178 = arith.addf %175, %177 : vector<14x10xf32>
    %179 = vector.extract_strided_slice %73 {offsets = [0, 0], sizes = [14, 3], strides = [1, 1]} : vector<16x3xf32> to vector<14x3xf32>
    %cst_117 = arith.constant dense<0.000000e+00> : vector<14x10xf32>
    %180 = tpu.matmul %179, %21, %cst_117 {dimension_numbers = #tpu.dot_dimension_numbers<[1], [0], [0], [1], [0, 0, 1, 1], [], []>} : vector<14x3xf32>, vector<3x10xf32>, vector<14x10xf32> -> vector<14x10xf32>
    %181 = arith.addf %178, %180 : vector<14x10xf32>
    %182 = vector.extract_strided_slice %73 {offsets = [1, 0], sizes = [14, 3], strides = [1, 1]} : vector<16x3xf32> to vector<14x3xf32>
    %cst_118 = arith.constant dense<0.000000e+00> : vector<14x10xf32>
    %183 = tpu.matmul %182, %23, %cst_118 {dimension_numbers = #tpu.dot_dimension_numbers<[1], [0], [0], [1], [0, 0, 1, 1], [], []>} : vector<14x3xf32>, vector<3x10xf32>, vector<14x10xf32> -> vector<14x10xf32>
    %184 = arith.addf %181, %183 : vector<14x10xf32>
    %185 = vector.extract_strided_slice %73 {offsets = [2, 0], sizes = [14, 3], strides = [1, 1]} : vector<16x3xf32> to vector<14x3xf32>
    %cst_119 = arith.constant dense<0.000000e+00> : vector<14x10xf32>
    %186 = tpu.matmul %185, %25, %cst_119 {dimension_numbers = #tpu.dot_dimension_numbers<[1], [0], [0], [1], [0, 0, 1, 1], [], []>} : vector<14x3xf32>, vector<3x10xf32>, vector<14x10xf32> -> vector<14x10xf32>
    %187 = arith.addf %184, %186 : vector<14x10xf32>
    %188 = vector.broadcast %2 : vector<1x10xf32> to vector<14x10xf32>
    %189 = arith.addf %187, %188 : vector<14x10xf32>
    %cst_120 = arith.constant 0.000000e+00 : f32
    %190 = vector.broadcast %cst_120 : f32 to vector<14x10xf32>
    %191 = arith.cmpf oge, %189, %190 : vector<14x10xf32>
    %192 = vector.broadcast %3 : vector<1x10xf32> to vector<14x10xf32>
    %193 = arith.mulf %192, %189 : vector<14x10xf32>
    %194 = arith.select %191, %189, %193 : vector<14x10xi1>, vector<14x10xf32>
    %195 = vector.extract_strided_slice %71 {offsets = [0, 0], sizes = [14, 3], strides = [1, 1]} : vector<16x3xf32> to vector<14x3xf32>
    %cst_121 = arith.constant dense<0.000000e+00> : vector<14x10xf32>
    %196 = tpu.matmul %195, %9, %cst_121 {dimension_numbers = #tpu.dot_dimension_numbers<[1], [0], [0], [1], [0, 0, 1, 1], [], []>} : vector<14x3xf32>, vector<3x10xf32>, vector<14x10xf32> -> vector<14x10xf32>
    %197 = vector.extract_strided_slice %71 {offsets = [1, 0], sizes = [14, 3], strides = [1, 1]} : vector<16x3xf32> to vector<14x3xf32>
    %cst_122 = arith.constant dense<0.000000e+00> : vector<14x10xf32>
    %198 = tpu.matmul %197, %11, %cst_122 {dimension_numbers = #tpu.dot_dimension_numbers<[1], [0], [0], [1], [0, 0, 1, 1], [], []>} : vector<14x3xf32>, vector<3x10xf32>, vector<14x10xf32> -> vector<14x10xf32>
    %199 = arith.addf %196, %198 : vector<14x10xf32>
    %200 = vector.extract_strided_slice %71 {offsets = [2, 0], sizes = [14, 3], strides = [1, 1]} : vector<16x3xf32> to vector<14x3xf32>
    %cst_123 = arith.constant dense<0.000000e+00> : vector<14x10xf32>
    %201 = tpu.matmul %200, %13, %cst_123 {dimension_numbers = #tpu.dot_dimension_numbers<[1], [0], [0], [1], [0, 0, 1, 1], [], []>} : vector<14x3xf32>, vector<3x10xf32>, vector<14x10xf32> -> vector<14x10xf32>
    %202 = arith.addf %199, %201 : vector<14x10xf32>
    %203 = vector.extract_strided_slice %73 {offsets = [0, 0], sizes = [14, 3], strides = [1, 1]} : vector<16x3xf32> to vector<14x3xf32>
    %cst_124 = arith.constant dense<0.000000e+00> : vector<14x10xf32>
    %204 = tpu.matmul %203, %15, %cst_124 {dimension_numbers = #tpu.dot_dimension_numbers<[1], [0], [0], [1], [0, 0, 1, 1], [], []>} : vector<14x3xf32>, vector<3x10xf32>, vector<14x10xf32> -> vector<14x10xf32>
    %205 = arith.addf %202, %204 : vector<14x10xf32>
    %206 = vector.extract_strided_slice %73 {offsets = [1, 0], sizes = [14, 3], strides = [1, 1]} : vector<16x3xf32> to vector<14x3xf32>
    %cst_125 = arith.constant dense<0.000000e+00> : vector<14x10xf32>
    %207 = tpu.matmul %206, %17, %cst_125 {dimension_numbers = #tpu.dot_dimension_numbers<[1], [0], [0], [1], [0, 0, 1, 1], [], []>} : vector<14x3xf32>, vector<3x10xf32>, vector<14x10xf32> -> vector<14x10xf32>
    %208 = arith.addf %205, %207 : vector<14x10xf32>
    %209 = vector.extract_strided_slice %73 {offsets = [2, 0], sizes = [14, 3], strides = [1, 1]} : vector<16x3xf32> to vector<14x3xf32>
    %cst_126 = arith.constant dense<0.000000e+00> : vector<14x10xf32>
    %210 = tpu.matmul %209, %19, %cst_126 {dimension_numbers = #tpu.dot_dimension_numbers<[1], [0], [0], [1], [0, 0, 1, 1], [], []>} : vector<14x3xf32>, vector<3x10xf32>, vector<14x10xf32> -> vector<14x10xf32>
    %211 = arith.addf %208, %210 : vector<14x10xf32>
    %212 = vector.extract_strided_slice %75 {offsets = [0, 0], sizes = [14, 3], strides = [1, 1]} : vector<16x3xf32> to vector<14x3xf32>
    %cst_127 = arith.constant dense<0.000000e+00> : vector<14x10xf32>
    %213 = tpu.matmul %212, %21, %cst_127 {dimension_numbers = #tpu.dot_dimension_numbers<[1], [0], [0], [1], [0, 0, 1, 1], [], []>} : vector<14x3xf32>, vector<3x10xf32>, vector<14x10xf32> -> vector<14x10xf32>
    %214 = arith.addf %211, %213 : vector<14x10xf32>
    %215 = vector.extract_strided_slice %75 {offsets = [1, 0], sizes = [14, 3], strides = [1, 1]} : vector<16x3xf32> to vector<14x3xf32>
    %cst_128 = arith.constant dense<0.000000e+00> : vector<14x10xf32>
    %216 = tpu.matmul %215, %23, %cst_128 {dimension_numbers = #tpu.dot_dimension_numbers<[1], [0], [0], [1], [0, 0, 1, 1], [], []>} : vector<14x3xf32>, vector<3x10xf32>, vector<14x10xf32> -> vector<14x10xf32>
    %217 = arith.addf %214, %216 : vector<14x10xf32>
    %218 = vector.extract_strided_slice %75 {offsets = [2, 0], sizes = [14, 3], strides = [1, 1]} : vector<16x3xf32> to vector<14x3xf32>
    %cst_129 = arith.constant dense<0.000000e+00> : vector<14x10xf32>
    %219 = tpu.matmul %218, %25, %cst_129 {dimension_numbers = #tpu.dot_dimension_numbers<[1], [0], [0], [1], [0, 0, 1, 1], [], []>} : vector<14x3xf32>, vector<3x10xf32>, vector<14x10xf32> -> vector<14x10xf32>
    %220 = arith.addf %217, %219 : vector<14x10xf32>
    %221 = vector.broadcast %2 : vector<1x10xf32> to vector<14x10xf32>
    %222 = arith.addf %220, %221 : vector<14x10xf32>
    %cst_130 = arith.constant 0.000000e+00 : f32
    %223 = vector.broadcast %cst_130 : f32 to vector<14x10xf32>
    %224 = arith.cmpf oge, %222, %223 : vector<14x10xf32>
    %225 = vector.broadcast %3 : vector<1x10xf32> to vector<14x10xf32>
    %226 = arith.mulf %225, %222 : vector<14x10xf32>
    %227 = arith.select %224, %222, %226 : vector<14x10xi1>, vector<14x10xf32>
    %228 = vector.extract_strided_slice %73 {offsets = [0, 0], sizes = [14, 3], strides = [1, 1]} : vector<16x3xf32> to vector<14x3xf32>
    %cst_131 = arith.constant dense<0.000000e+00> : vector<14x10xf32>
    %229 = tpu.matmul %228, %9, %cst_131 {dimension_numbers = #tpu.dot_dimension_numbers<[1], [0], [0], [1], [0, 0, 1, 1], [], []>} : vector<14x3xf32>, vector<3x10xf32>, vector<14x10xf32> -> vector<14x10xf32>
    %230 = vector.extract_strided_slice %73 {offsets = [1, 0], sizes = [14, 3], strides = [1, 1]} : vector<16x3xf32> to vector<14x3xf32>
    %cst_132 = arith.constant dense<0.000000e+00> : vector<14x10xf32>
    %231 = tpu.matmul %230, %11, %cst_132 {dimension_numbers = #tpu.dot_dimension_numbers<[1], [0], [0], [1], [0, 0, 1, 1], [], []>} : vector<14x3xf32>, vector<3x10xf32>, vector<14x10xf32> -> vector<14x10xf32>
    %232 = arith.addf %229, %231 : vector<14x10xf32>
    %233 = vector.extract_strided_slice %73 {offsets = [2, 0], sizes = [14, 3], strides = [1, 1]} : vector<16x3xf32> to vector<14x3xf32>
    %cst_133 = arith.constant dense<0.000000e+00> : vector<14x10xf32>
    %234 = tpu.matmul %233, %13, %cst_133 {dimension_numbers = #tpu.dot_dimension_numbers<[1], [0], [0], [1], [0, 0, 1, 1], [], []>} : vector<14x3xf32>, vector<3x10xf32>, vector<14x10xf32> -> vector<14x10xf32>
    %235 = arith.addf %232, %234 : vector<14x10xf32>
    %236 = vector.extract_strided_slice %75 {offsets = [0, 0], sizes = [14, 3], strides = [1, 1]} : vector<16x3xf32> to vector<14x3xf32>
    %cst_134 = arith.constant dense<0.000000e+00> : vector<14x10xf32>
    %237 = tpu.matmul %236, %15, %cst_134 {dimension_numbers = #tpu.dot_dimension_numbers<[1], [0], [0], [1], [0, 0, 1, 1], [], []>} : vector<14x3xf32>, vector<3x10xf32>, vector<14x10xf32> -> vector<14x10xf32>
    %238 = arith.addf %235, %237 : vector<14x10xf32>
    %239 = vector.extract_strided_slice %75 {offsets = [1, 0], sizes = [14, 3], strides = [1, 1]} : vector<16x3xf32> to vector<14x3xf32>
    %cst_135 = arith.constant dense<0.000000e+00> : vector<14x10xf32>
    %240 = tpu.matmul %239, %17, %cst_135 {dimension_numbers = #tpu.dot_dimension_numbers<[1], [0], [0], [1], [0, 0, 1, 1], [], []>} : vector<14x3xf32>, vector<3x10xf32>, vector<14x10xf32> -> vector<14x10xf32>
    %241 = arith.addf %238, %240 : vector<14x10xf32>
    %242 = vector.extract_strided_slice %75 {offsets = [2, 0], sizes = [14, 3], strides = [1, 1]} : vector<16x3xf32> to vector<14x3xf32>
    %cst_136 = arith.constant dense<0.000000e+00> : vector<14x10xf32>
    %243 = tpu.matmul %242, %19, %cst_136 {dimension_numbers = #tpu.dot_dimension_numbers<[1], [0], [0], [1], [0, 0, 1, 1], [], []>} : vector<14x3xf32>, vector<3x10xf32>, vector<14x10xf32> -> vector<14x10xf32>
    %244 = arith.addf %241, %243 : vector<14x10xf32>
    %245 = vector.extract_strided_slice %77 {offsets = [0, 0], sizes = [14, 3], strides = [1, 1]} : vector<16x3xf32> to vector<14x3xf32>
    %cst_137 = arith.constant dense<0.000000e+00> : vector<14x10xf32>
    %246 = tpu.matmul %245, %21, %cst_137 {dimension_numbers = #tpu.dot_dimension_numbers<[1], [0], [0], [1], [0, 0, 1, 1], [], []>} : vector<14x3xf32>, vector<3x10xf32>, vector<14x10xf32> -> vector<14x10xf32>
    %247 = arith.addf %244, %246 : vector<14x10xf32>
    %248 = vector.extract_strided_slice %77 {offsets = [1, 0], sizes = [14, 3], strides = [1, 1]} : vector<16x3xf32> to vector<14x3xf32>
    %cst_138 = arith.constant dense<0.000000e+00> : vector<14x10xf32>
    %249 = tpu.matmul %248, %23, %cst_138 {dimension_numbers = #tpu.dot_dimension_numbers<[1], [0], [0], [1], [0, 0, 1, 1], [], []>} : vector<14x3xf32>, vector<3x10xf32>, vector<14x10xf32> -> vector<14x10xf32>
    %250 = arith.addf %247, %249 : vector<14x10xf32>
    %251 = vector.extract_strided_slice %77 {offsets = [2, 0], sizes = [14, 3], strides = [1, 1]} : vector<16x3xf32> to vector<14x3xf32>
    %cst_139 = arith.constant dense<0.000000e+00> : vector<14x10xf32>
    %252 = tpu.matmul %251, %25, %cst_139 {dimension_numbers = #tpu.dot_dimension_numbers<[1], [0], [0], [1], [0, 0, 1, 1], [], []>} : vector<14x3xf32>, vector<3x10xf32>, vector<14x10xf32> -> vector<14x10xf32>
    %253 = arith.addf %250, %252 : vector<14x10xf32>
    %254 = vector.broadcast %2 : vector<1x10xf32> to vector<14x10xf32>
    %255 = arith.addf %253, %254 : vector<14x10xf32>
    %cst_140 = arith.constant 0.000000e+00 : f32
    %256 = vector.broadcast %cst_140 : f32 to vector<14x10xf32>
    %257 = arith.cmpf oge, %255, %256 : vector<14x10xf32>
    %258 = vector.broadcast %3 : vector<1x10xf32> to vector<14x10xf32>
    %259 = arith.mulf %258, %255 : vector<14x10xf32>
    %260 = arith.select %257, %255, %259 : vector<14x10xi1>, vector<14x10xf32>
    %261 = vector.extract_strided_slice %75 {offsets = [0, 0], sizes = [14, 3], strides = [1, 1]} : vector<16x3xf32> to vector<14x3xf32>
    %cst_141 = arith.constant dense<0.000000e+00> : vector<14x10xf32>
    %262 = tpu.matmul %261, %9, %cst_141 {dimension_numbers = #tpu.dot_dimension_numbers<[1], [0], [0], [1], [0, 0, 1, 1], [], []>} : vector<14x3xf32>, vector<3x10xf32>, vector<14x10xf32> -> vector<14x10xf32>
    %263 = vector.extract_strided_slice %75 {offsets = [1, 0], sizes = [14, 3], strides = [1, 1]} : vector<16x3xf32> to vector<14x3xf32>
    %cst_142 = arith.constant dense<0.000000e+00> : vector<14x10xf32>
    %264 = tpu.matmul %263, %11, %cst_142 {dimension_numbers = #tpu.dot_dimension_numbers<[1], [0], [0], [1], [0, 0, 1, 1], [], []>} : vector<14x3xf32>, vector<3x10xf32>, vector<14x10xf32> -> vector<14x10xf32>
    %265 = arith.addf %262, %264 : vector<14x10xf32>
    %266 = vector.extract_strided_slice %75 {offsets = [2, 0], sizes = [14, 3], strides = [1, 1]} : vector<16x3xf32> to vector<14x3xf32>
    %cst_143 = arith.constant dense<0.000000e+00> : vector<14x10xf32>
    %267 = tpu.matmul %266, %13, %cst_143 {dimension_numbers = #tpu.dot_dimension_numbers<[1], [0], [0], [1], [0, 0, 1, 1], [], []>} : vector<14x3xf32>, vector<3x10xf32>, vector<14x10xf32> -> vector<14x10xf32>
    %268 = arith.addf %265, %267 : vector<14x10xf32>
    %269 = vector.extract_strided_slice %77 {offsets = [0, 0], sizes = [14, 3], strides = [1, 1]} : vector<16x3xf32> to vector<14x3xf32>
    %cst_144 = arith.constant dense<0.000000e+00> : vector<14x10xf32>
    %270 = tpu.matmul %269, %15, %cst_144 {dimension_numbers = #tpu.dot_dimension_numbers<[1], [0], [0], [1], [0, 0, 1, 1], [], []>} : vector<14x3xf32>, vector<3x10xf32>, vector<14x10xf32> -> vector<14x10xf32>
    %271 = arith.addf %268, %270 : vector<14x10xf32>
    %272 = vector.extract_strided_slice %77 {offsets = [1, 0], sizes = [14, 3], strides = [1, 1]} : vector<16x3xf32> to vector<14x3xf32>
    %cst_145 = arith.constant dense<0.000000e+00> : vector<14x10xf32>
    %273 = tpu.matmul %272, %17, %cst_145 {dimension_numbers = #tpu.dot_dimension_numbers<[1], [0], [0], [1], [0, 0, 1, 1], [], []>} : vector<14x3xf32>, vector<3x10xf32>, vector<14x10xf32> -> vector<14x10xf32>
    %274 = arith.addf %271, %273 : vector<14x10xf32>
    %275 = vector.extract_strided_slice %77 {offsets = [2, 0], sizes = [14, 3], strides = [1, 1]} : vector<16x3xf32> to vector<14x3xf32>
    %cst_146 = arith.constant dense<0.000000e+00> : vector<14x10xf32>
    %276 = tpu.matmul %275, %19, %cst_146 {dimension_numbers = #tpu.dot_dimension_numbers<[1], [0], [0], [1], [0, 0, 1, 1], [], []>} : vector<14x3xf32>, vector<3x10xf32>, vector<14x10xf32> -> vector<14x10xf32>
    %277 = arith.addf %274, %276 : vector<14x10xf32>
    %278 = vector.extract_strided_slice %79 {offsets = [0, 0], sizes = [14, 3], strides = [1, 1]} : vector<16x3xf32> to vector<14x3xf32>
    %cst_147 = arith.constant dense<0.000000e+00> : vector<14x10xf32>
    %279 = tpu.matmul %278, %21, %cst_147 {dimension_numbers = #tpu.dot_dimension_numbers<[1], [0], [0], [1], [0, 0, 1, 1], [], []>} : vector<14x3xf32>, vector<3x10xf32>, vector<14x10xf32> -> vector<14x10xf32>
    %280 = arith.addf %277, %279 : vector<14x10xf32>
    %281 = vector.extract_strided_slice %79 {offsets = [1, 0], sizes = [14, 3], strides = [1, 1]} : vector<16x3xf32> to vector<14x3xf32>
    %cst_148 = arith.constant dense<0.000000e+00> : vector<14x10xf32>
    %282 = tpu.matmul %281, %23, %cst_148 {dimension_numbers = #tpu.dot_dimension_numbers<[1], [0], [0], [1], [0, 0, 1, 1], [], []>} : vector<14x3xf32>, vector<3x10xf32>, vector<14x10xf32> -> vector<14x10xf32>
    %283 = arith.addf %280, %282 : vector<14x10xf32>
    %284 = vector.extract_strided_slice %79 {offsets = [2, 0], sizes = [14, 3], strides = [1, 1]} : vector<16x3xf32> to vector<14x3xf32>
    %cst_149 = arith.constant dense<0.000000e+00> : vector<14x10xf32>
    %285 = tpu.matmul %284, %25, %cst_149 {dimension_numbers = #tpu.dot_dimension_numbers<[1], [0], [0], [1], [0, 0, 1, 1], [], []>} : vector<14x3xf32>, vector<3x10xf32>, vector<14x10xf32> -> vector<14x10xf32>
    %286 = arith.addf %283, %285 : vector<14x10xf32>
    %287 = vector.broadcast %2 : vector<1x10xf32> to vector<14x10xf32>
    %288 = arith.addf %286, %287 : vector<14x10xf32>
    %cst_150 = arith.constant 0.000000e+00 : f32
    %289 = vector.broadcast %cst_150 : f32 to vector<14x10xf32>
    %290 = arith.cmpf oge, %288, %289 : vector<14x10xf32>
    %291 = vector.broadcast %3 : vector<1x10xf32> to vector<14x10xf32>
    %292 = arith.mulf %291, %288 : vector<14x10xf32>
    %293 = arith.select %290, %288, %292 : vector<14x10xi1>, vector<14x10xf32>
    %294 = vector.extract_strided_slice %77 {offsets = [0, 0], sizes = [14, 3], strides = [1, 1]} : vector<16x3xf32> to vector<14x3xf32>
    %cst_151 = arith.constant dense<0.000000e+00> : vector<14x10xf32>
    %295 = tpu.matmul %294, %9, %cst_151 {dimension_numbers = #tpu.dot_dimension_numbers<[1], [0], [0], [1], [0, 0, 1, 1], [], []>} : vector<14x3xf32>, vector<3x10xf32>, vector<14x10xf32> -> vector<14x10xf32>
    %296 = vector.extract_strided_slice %77 {offsets = [1, 0], sizes = [14, 3], strides = [1, 1]} : vector<16x3xf32> to vector<14x3xf32>
    %cst_152 = arith.constant dense<0.000000e+00> : vector<14x10xf32>
    %297 = tpu.matmul %296, %11, %cst_152 {dimension_numbers = #tpu.dot_dimension_numbers<[1], [0], [0], [1], [0, 0, 1, 1], [], []>} : vector<14x3xf32>, vector<3x10xf32>, vector<14x10xf32> -> vector<14x10xf32>
    %298 = arith.addf %295, %297 : vector<14x10xf32>
    %299 = vector.extract_strided_slice %77 {offsets = [2, 0], sizes = [14, 3], strides = [1, 1]} : vector<16x3xf32> to vector<14x3xf32>
    %cst_153 = arith.constant dense<0.000000e+00> : vector<14x10xf32>
    %300 = tpu.matmul %299, %13, %cst_153 {dimension_numbers = #tpu.dot_dimension_numbers<[1], [0], [0], [1], [0, 0, 1, 1], [], []>} : vector<14x3xf32>, vector<3x10xf32>, vector<14x10xf32> -> vector<14x10xf32>
    %301 = arith.addf %298, %300 : vector<14x10xf32>
    %302 = vector.extract_strided_slice %79 {offsets = [0, 0], sizes = [14, 3], strides = [1, 1]} : vector<16x3xf32> to vector<14x3xf32>
    %cst_154 = arith.constant dense<0.000000e+00> : vector<14x10xf32>
    %303 = tpu.matmul %302, %15, %cst_154 {dimension_numbers = #tpu.dot_dimension_numbers<[1], [0], [0], [1], [0, 0, 1, 1], [], []>} : vector<14x3xf32>, vector<3x10xf32>, vector<14x10xf32> -> vector<14x10xf32>
    %304 = arith.addf %301, %303 : vector<14x10xf32>
    %305 = vector.extract_strided_slice %79 {offsets = [1, 0], sizes = [14, 3], strides = [1, 1]} : vector<16x3xf32> to vector<14x3xf32>
    %cst_155 = arith.constant dense<0.000000e+00> : vector<14x10xf32>
    %306 = tpu.matmul %305, %17, %cst_155 {dimension_numbers = #tpu.dot_dimension_numbers<[1], [0], [0], [1], [0, 0, 1, 1], [], []>} : vector<14x3xf32>, vector<3x10xf32>, vector<14x10xf32> -> vector<14x10xf32>
    %307 = arith.addf %304, %306 : vector<14x10xf32>
    %308 = vector.extract_strided_slice %79 {offsets = [2, 0], sizes = [14, 3], strides = [1, 1]} : vector<16x3xf32> to vector<14x3xf32>
    %cst_156 = arith.constant dense<0.000000e+00> : vector<14x10xf32>
    %309 = tpu.matmul %308, %19, %cst_156 {dimension_numbers = #tpu.dot_dimension_numbers<[1], [0], [0], [1], [0, 0, 1, 1], [], []>} : vector<14x3xf32>, vector<3x10xf32>, vector<14x10xf32> -> vector<14x10xf32>
    %310 = arith.addf %307, %309 : vector<14x10xf32>
    %311 = vector.extract_strided_slice %81 {offsets = [0, 0], sizes = [14, 3], strides = [1, 1]} : vector<16x3xf32> to vector<14x3xf32>
    %cst_157 = arith.constant dense<0.000000e+00> : vector<14x10xf32>
    %312 = tpu.matmul %311, %21, %cst_157 {dimension_numbers = #tpu.dot_dimension_numbers<[1], [0], [0], [1], [0, 0, 1, 1], [], []>} : vector<14x3xf32>, vector<3x10xf32>, vector<14x10xf32> -> vector<14x10xf32>
    %313 = arith.addf %310, %312 : vector<14x10xf32>
    %314 = vector.extract_strided_slice %81 {offsets = [1, 0], sizes = [14, 3], strides = [1, 1]} : vector<16x3xf32> to vector<14x3xf32>
    %cst_158 = arith.constant dense<0.000000e+00> : vector<14x10xf32>
    %315 = tpu.matmul %314, %23, %cst_158 {dimension_numbers = #tpu.dot_dimension_numbers<[1], [0], [0], [1], [0, 0, 1, 1], [], []>} : vector<14x3xf32>, vector<3x10xf32>, vector<14x10xf32> -> vector<14x10xf32>
    %316 = arith.addf %313, %315 : vector<14x10xf32>
    %317 = vector.extract_strided_slice %81 {offsets = [2, 0], sizes = [14, 3], strides = [1, 1]} : vector<16x3xf32> to vector<14x3xf32>
    %cst_159 = arith.constant dense<0.000000e+00> : vector<14x10xf32>
    %318 = tpu.matmul %317, %25, %cst_159 {dimension_numbers = #tpu.dot_dimension_numbers<[1], [0], [0], [1], [0, 0, 1, 1], [], []>} : vector<14x3xf32>, vector<3x10xf32>, vector<14x10xf32> -> vector<14x10xf32>
    %319 = arith.addf %316, %318 : vector<14x10xf32>
    %320 = vector.broadcast %2 : vector<1x10xf32> to vector<14x10xf32>
    %321 = arith.addf %319, %320 : vector<14x10xf32>
    %cst_160 = arith.constant 0.000000e+00 : f32
    %322 = vector.broadcast %cst_160 : f32 to vector<14x10xf32>
    %323 = arith.cmpf oge, %321, %322 : vector<14x10xf32>
    %324 = vector.broadcast %3 : vector<1x10xf32> to vector<14x10xf32>
    %325 = arith.mulf %324, %321 : vector<14x10xf32>
    %326 = arith.select %323, %321, %325 : vector<14x10xi1>, vector<14x10xf32>
    %327 = vector.extract_strided_slice %79 {offsets = [0, 0], sizes = [14, 3], strides = [1, 1]} : vector<16x3xf32> to vector<14x3xf32>
    %cst_161 = arith.constant dense<0.000000e+00> : vector<14x10xf32>
    %328 = tpu.matmul %327, %9, %cst_161 {dimension_numbers = #tpu.dot_dimension_numbers<[1], [0], [0], [1], [0, 0, 1, 1], [], []>} : vector<14x3xf32>, vector<3x10xf32>, vector<14x10xf32> -> vector<14x10xf32>
    %329 = vector.extract_strided_slice %79 {offsets = [1, 0], sizes = [14, 3], strides = [1, 1]} : vector<16x3xf32> to vector<14x3xf32>
    %cst_162 = arith.constant dense<0.000000e+00> : vector<14x10xf32>
    %330 = tpu.matmul %329, %11, %cst_162 {dimension_numbers = #tpu.dot_dimension_numbers<[1], [0], [0], [1], [0, 0, 1, 1], [], []>} : vector<14x3xf32>, vector<3x10xf32>, vector<14x10xf32> -> vector<14x10xf32>
    %331 = arith.addf %328, %330 : vector<14x10xf32>
    %332 = vector.extract_strided_slice %79 {offsets = [2, 0], sizes = [14, 3], strides = [1, 1]} : vector<16x3xf32> to vector<14x3xf32>
    %cst_163 = arith.constant dense<0.000000e+00> : vector<14x10xf32>
    %333 = tpu.matmul %332, %13, %cst_163 {dimension_numbers = #tpu.dot_dimension_numbers<[1], [0], [0], [1], [0, 0, 1, 1], [], []>} : vector<14x3xf32>, vector<3x10xf32>, vector<14x10xf32> -> vector<14x10xf32>
    %334 = arith.addf %331, %333 : vector<14x10xf32>
    %335 = vector.extract_strided_slice %81 {offsets = [0, 0], sizes = [14, 3], strides = [1, 1]} : vector<16x3xf32> to vector<14x3xf32>
    %cst_164 = arith.constant dense<0.000000e+00> : vector<14x10xf32>
    %336 = tpu.matmul %335, %15, %cst_164 {dimension_numbers = #tpu.dot_dimension_numbers<[1], [0], [0], [1], [0, 0, 1, 1], [], []>} : vector<14x3xf32>, vector<3x10xf32>, vector<14x10xf32> -> vector<14x10xf32>
    %337 = arith.addf %334, %336 : vector<14x10xf32>
    %338 = vector.extract_strided_slice %81 {offsets = [1, 0], sizes = [14, 3], strides = [1, 1]} : vector<16x3xf32> to vector<14x3xf32>
    %cst_165 = arith.constant dense<0.000000e+00> : vector<14x10xf32>
    %339 = tpu.matmul %338, %17, %cst_165 {dimension_numbers = #tpu.dot_dimension_numbers<[1], [0], [0], [1], [0, 0, 1, 1], [], []>} : vector<14x3xf32>, vector<3x10xf32>, vector<14x10xf32> -> vector<14x10xf32>
    %340 = arith.addf %337, %339 : vector<14x10xf32>
    %341 = vector.extract_strided_slice %81 {offsets = [2, 0], sizes = [14, 3], strides = [1, 1]} : vector<16x3xf32> to vector<14x3xf32>
    %cst_166 = arith.constant dense<0.000000e+00> : vector<14x10xf32>
    %342 = tpu.matmul %341, %19, %cst_166 {dimension_numbers = #tpu.dot_dimension_numbers<[1], [0], [0], [1], [0, 0, 1, 1], [], []>} : vector<14x3xf32>, vector<3x10xf32>, vector<14x10xf32> -> vector<14x10xf32>
    %343 = arith.addf %340, %342 : vector<14x10xf32>
    %344 = vector.extract_strided_slice %83 {offsets = [0, 0], sizes = [14, 3], strides = [1, 1]} : vector<16x3xf32> to vector<14x3xf32>
    %cst_167 = arith.constant dense<0.000000e+00> : vector<14x10xf32>
    %345 = tpu.matmul %344, %21, %cst_167 {dimension_numbers = #tpu.dot_dimension_numbers<[1], [0], [0], [1], [0, 0, 1, 1], [], []>} : vector<14x3xf32>, vector<3x10xf32>, vector<14x10xf32> -> vector<14x10xf32>
    %346 = arith.addf %343, %345 : vector<14x10xf32>
    %347 = vector.extract_strided_slice %83 {offsets = [1, 0], sizes = [14, 3], strides = [1, 1]} : vector<16x3xf32> to vector<14x3xf32>
    %cst_168 = arith.constant dense<0.000000e+00> : vector<14x10xf32>
    %348 = tpu.matmul %347, %23, %cst_168 {dimension_numbers = #tpu.dot_dimension_numbers<[1], [0], [0], [1], [0, 0, 1, 1], [], []>} : vector<14x3xf32>, vector<3x10xf32>, vector<14x10xf32> -> vector<14x10xf32>
    %349 = arith.addf %346, %348 : vector<14x10xf32>
    %350 = vector.extract_strided_slice %83 {offsets = [2, 0], sizes = [14, 3], strides = [1, 1]} : vector<16x3xf32> to vector<14x3xf32>
    %cst_169 = arith.constant dense<0.000000e+00> : vector<14x10xf32>
    %351 = tpu.matmul %350, %25, %cst_169 {dimension_numbers = #tpu.dot_dimension_numbers<[1], [0], [0], [1], [0, 0, 1, 1], [], []>} : vector<14x3xf32>, vector<3x10xf32>, vector<14x10xf32> -> vector<14x10xf32>
    %352 = arith.addf %349, %351 : vector<14x10xf32>
    %353 = vector.broadcast %2 : vector<1x10xf32> to vector<14x10xf32>
    %354 = arith.addf %352, %353 : vector<14x10xf32>
    %cst_170 = arith.constant 0.000000e+00 : f32
    %355 = vector.broadcast %cst_170 : f32 to vector<14x10xf32>
    %356 = arith.cmpf oge, %354, %355 : vector<14x10xf32>
    %357 = vector.broadcast %3 : vector<1x10xf32> to vector<14x10xf32>
    %358 = arith.mulf %357, %354 : vector<14x10xf32>
    %359 = arith.select %356, %354, %358 : vector<14x10xi1>, vector<14x10xf32>
    %360 = vector.extract_strided_slice %81 {offsets = [0, 0], sizes = [14, 3], strides = [1, 1]} : vector<16x3xf32> to vector<14x3xf32>
    %cst_171 = arith.constant dense<0.000000e+00> : vector<14x10xf32>
    %361 = tpu.matmul %360, %9, %cst_171 {dimension_numbers = #tpu.dot_dimension_numbers<[1], [0], [0], [1], [0, 0, 1, 1], [], []>} : vector<14x3xf32>, vector<3x10xf32>, vector<14x10xf32> -> vector<14x10xf32>
    %362 = vector.extract_strided_slice %81 {offsets = [1, 0], sizes = [14, 3], strides = [1, 1]} : vector<16x3xf32> to vector<14x3xf32>
    %cst_172 = arith.constant dense<0.000000e+00> : vector<14x10xf32>
    %363 = tpu.matmul %362, %11, %cst_172 {dimension_numbers = #tpu.dot_dimension_numbers<[1], [0], [0], [1], [0, 0, 1, 1], [], []>} : vector<14x3xf32>, vector<3x10xf32>, vector<14x10xf32> -> vector<14x10xf32>
    %364 = arith.addf %361, %363 : vector<14x10xf32>
    %365 = vector.extract_strided_slice %81 {offsets = [2, 0], sizes = [14, 3], strides = [1, 1]} : vector<16x3xf32> to vector<14x3xf32>
    %cst_173 = arith.constant dense<0.000000e+00> : vector<14x10xf32>
    %366 = tpu.matmul %365, %13, %cst_173 {dimension_numbers = #tpu.dot_dimension_numbers<[1], [0], [0], [1], [0, 0, 1, 1], [], []>} : vector<14x3xf32>, vector<3x10xf32>, vector<14x10xf32> -> vector<14x10xf32>
    %367 = arith.addf %364, %366 : vector<14x10xf32>
    %368 = vector.extract_strided_slice %83 {offsets = [0, 0], sizes = [14, 3], strides = [1, 1]} : vector<16x3xf32> to vector<14x3xf32>
    %cst_174 = arith.constant dense<0.000000e+00> : vector<14x10xf32>
    %369 = tpu.matmul %368, %15, %cst_174 {dimension_numbers = #tpu.dot_dimension_numbers<[1], [0], [0], [1], [0, 0, 1, 1], [], []>} : vector<14x3xf32>, vector<3x10xf32>, vector<14x10xf32> -> vector<14x10xf32>
    %370 = arith.addf %367, %369 : vector<14x10xf32>
    %371 = vector.extract_strided_slice %83 {offsets = [1, 0], sizes = [14, 3], strides = [1, 1]} : vector<16x3xf32> to vector<14x3xf32>
    %cst_175 = arith.constant dense<0.000000e+00> : vector<14x10xf32>
    %372 = tpu.matmul %371, %17, %cst_175 {dimension_numbers = #tpu.dot_dimension_numbers<[1], [0], [0], [1], [0, 0, 1, 1], [], []>} : vector<14x3xf32>, vector<3x10xf32>, vector<14x10xf32> -> vector<14x10xf32>
    %373 = arith.addf %370, %372 : vector<14x10xf32>
    %374 = vector.extract_strided_slice %83 {offsets = [2, 0], sizes = [14, 3], strides = [1, 1]} : vector<16x3xf32> to vector<14x3xf32>
    %cst_176 = arith.constant dense<0.000000e+00> : vector<14x10xf32>
    %375 = tpu.matmul %374, %19, %cst_176 {dimension_numbers = #tpu.dot_dimension_numbers<[1], [0], [0], [1], [0, 0, 1, 1], [], []>} : vector<14x3xf32>, vector<3x10xf32>, vector<14x10xf32> -> vector<14x10xf32>
    %376 = arith.addf %373, %375 : vector<14x10xf32>
    %377 = vector.extract_strided_slice %85 {offsets = [0, 0], sizes = [14, 3], strides = [1, 1]} : vector<16x3xf32> to vector<14x3xf32>
    %cst_177 = arith.constant dense<0.000000e+00> : vector<14x10xf32>
    %378 = tpu.matmul %377, %21, %cst_177 {dimension_numbers = #tpu.dot_dimension_numbers<[1], [0], [0], [1], [0, 0, 1, 1], [], []>} : vector<14x3xf32>, vector<3x10xf32>, vector<14x10xf32> -> vector<14x10xf32>
    %379 = arith.addf %376, %378 : vector<14x10xf32>
    %380 = vector.extract_strided_slice %85 {offsets = [1, 0], sizes = [14, 3], strides = [1, 1]} : vector<16x3xf32> to vector<14x3xf32>
    %cst_178 = arith.constant dense<0.000000e+00> : vector<14x10xf32>
    %381 = tpu.matmul %380, %23, %cst_178 {dimension_numbers = #tpu.dot_dimension_numbers<[1], [0], [0], [1], [0, 0, 1, 1], [], []>} : vector<14x3xf32>, vector<3x10xf32>, vector<14x10xf32> -> vector<14x10xf32>
    %382 = arith.addf %379, %381 : vector<14x10xf32>
    %383 = vector.extract_strided_slice %85 {offsets = [2, 0], sizes = [14, 3], strides = [1, 1]} : vector<16x3xf32> to vector<14x3xf32>
    %cst_179 = arith.constant dense<0.000000e+00> : vector<14x10xf32>
    %384 = tpu.matmul %383, %25, %cst_179 {dimension_numbers = #tpu.dot_dimension_numbers<[1], [0], [0], [1], [0, 0, 1, 1], [], []>} : vector<14x3xf32>, vector<3x10xf32>, vector<14x10xf32> -> vector<14x10xf32>
    %385 = arith.addf %382, %384 : vector<14x10xf32>
    %386 = vector.broadcast %2 : vector<1x10xf32> to vector<14x10xf32>
    %387 = arith.addf %385, %386 : vector<14x10xf32>
    %cst_180 = arith.constant 0.000000e+00 : f32
    %388 = vector.broadcast %cst_180 : f32 to vector<14x10xf32>
    %389 = arith.cmpf oge, %387, %388 : vector<14x10xf32>
    %390 = vector.broadcast %3 : vector<1x10xf32> to vector<14x10xf32>
    %391 = arith.mulf %390, %387 : vector<14x10xf32>
    %392 = arith.select %389, %387, %391 : vector<14x10xi1>, vector<14x10xf32>
    %393 = vector.extract_strided_slice %83 {offsets = [0, 0], sizes = [14, 3], strides = [1, 1]} : vector<16x3xf32> to vector<14x3xf32>
    %cst_181 = arith.constant dense<0.000000e+00> : vector<14x10xf32>
    %394 = tpu.matmul %393, %9, %cst_181 {dimension_numbers = #tpu.dot_dimension_numbers<[1], [0], [0], [1], [0, 0, 1, 1], [], []>} : vector<14x3xf32>, vector<3x10xf32>, vector<14x10xf32> -> vector<14x10xf32>
    %395 = vector.extract_strided_slice %83 {offsets = [1, 0], sizes = [14, 3], strides = [1, 1]} : vector<16x3xf32> to vector<14x3xf32>
    %cst_182 = arith.constant dense<0.000000e+00> : vector<14x10xf32>
    %396 = tpu.matmul %395, %11, %cst_182 {dimension_numbers = #tpu.dot_dimension_numbers<[1], [0], [0], [1], [0, 0, 1, 1], [], []>} : vector<14x3xf32>, vector<3x10xf32>, vector<14x10xf32> -> vector<14x10xf32>
    %397 = arith.addf %394, %396 : vector<14x10xf32>
    %398 = vector.extract_strided_slice %83 {offsets = [2, 0], sizes = [14, 3], strides = [1, 1]} : vector<16x3xf32> to vector<14x3xf32>
    %cst_183 = arith.constant dense<0.000000e+00> : vector<14x10xf32>
    %399 = tpu.matmul %398, %13, %cst_183 {dimension_numbers = #tpu.dot_dimension_numbers<[1], [0], [0], [1], [0, 0, 1, 1], [], []>} : vector<14x3xf32>, vector<3x10xf32>, vector<14x10xf32> -> vector<14x10xf32>
    %400 = arith.addf %397, %399 : vector<14x10xf32>
    %401 = vector.extract_strided_slice %85 {offsets = [0, 0], sizes = [14, 3], strides = [1, 1]} : vector<16x3xf32> to vector<14x3xf32>
    %cst_184 = arith.constant dense<0.000000e+00> : vector<14x10xf32>
    %402 = tpu.matmul %401, %15, %cst_184 {dimension_numbers = #tpu.dot_dimension_numbers<[1], [0], [0], [1], [0, 0, 1, 1], [], []>} : vector<14x3xf32>, vector<3x10xf32>, vector<14x10xf32> -> vector<14x10xf32>
    %403 = arith.addf %400, %402 : vector<14x10xf32>
    %404 = vector.extract_strided_slice %85 {offsets = [1, 0], sizes = [14, 3], strides = [1, 1]} : vector<16x3xf32> to vector<14x3xf32>
    %cst_185 = arith.constant dense<0.000000e+00> : vector<14x10xf32>
    %405 = tpu.matmul %404, %17, %cst_185 {dimension_numbers = #tpu.dot_dimension_numbers<[1], [0], [0], [1], [0, 0, 1, 1], [], []>} : vector<14x3xf32>, vector<3x10xf32>, vector<14x10xf32> -> vector<14x10xf32>
    %406 = arith.addf %403, %405 : vector<14x10xf32>
    %407 = vector.extract_strided_slice %85 {offsets = [2, 0], sizes = [14, 3], strides = [1, 1]} : vector<16x3xf32> to vector<14x3xf32>
    %cst_186 = arith.constant dense<0.000000e+00> : vector<14x10xf32>
    %408 = tpu.matmul %407, %19, %cst_186 {dimension_numbers = #tpu.dot_dimension_numbers<[1], [0], [0], [1], [0, 0, 1, 1], [], []>} : vector<14x3xf32>, vector<3x10xf32>, vector<14x10xf32> -> vector<14x10xf32>
    %409 = arith.addf %406, %408 : vector<14x10xf32>
    %410 = vector.extract_strided_slice %87 {offsets = [0, 0], sizes = [14, 3], strides = [1, 1]} : vector<16x3xf32> to vector<14x3xf32>
    %cst_187 = arith.constant dense<0.000000e+00> : vector<14x10xf32>
    %411 = tpu.matmul %410, %21, %cst_187 {dimension_numbers = #tpu.dot_dimension_numbers<[1], [0], [0], [1], [0, 0, 1, 1], [], []>} : vector<14x3xf32>, vector<3x10xf32>, vector<14x10xf32> -> vector<14x10xf32>
    %412 = arith.addf %409, %411 : vector<14x10xf32>
    %413 = vector.extract_strided_slice %87 {offsets = [1, 0], sizes = [14, 3], strides = [1, 1]} : vector<16x3xf32> to vector<14x3xf32>
    %cst_188 = arith.constant dense<0.000000e+00> : vector<14x10xf32>
    %414 = tpu.matmul %413, %23, %cst_188 {dimension_numbers = #tpu.dot_dimension_numbers<[1], [0], [0], [1], [0, 0, 1, 1], [], []>} : vector<14x3xf32>, vector<3x10xf32>, vector<14x10xf32> -> vector<14x10xf32>
    %415 = arith.addf %412, %414 : vector<14x10xf32>
    %416 = vector.extract_strided_slice %87 {offsets = [2, 0], sizes = [14, 3], strides = [1, 1]} : vector<16x3xf32> to vector<14x3xf32>
    %cst_189 = arith.constant dense<0.000000e+00> : vector<14x10xf32>
    %417 = tpu.matmul %416, %25, %cst_189 {dimension_numbers = #tpu.dot_dimension_numbers<[1], [0], [0], [1], [0, 0, 1, 1], [], []>} : vector<14x3xf32>, vector<3x10xf32>, vector<14x10xf32> -> vector<14x10xf32>
    %418 = arith.addf %415, %417 : vector<14x10xf32>
    %419 = vector.broadcast %2 : vector<1x10xf32> to vector<14x10xf32>
    %420 = arith.addf %418, %419 : vector<14x10xf32>
    %cst_190 = arith.constant 0.000000e+00 : f32
    %421 = vector.broadcast %cst_190 : f32 to vector<14x10xf32>
    %422 = arith.cmpf oge, %420, %421 : vector<14x10xf32>
    %423 = vector.broadcast %3 : vector<1x10xf32> to vector<14x10xf32>
    %424 = arith.mulf %423, %420 : vector<14x10xf32>
    %425 = arith.select %422, %420, %424 : vector<14x10xi1>, vector<14x10xf32>
    %426 = vector.extract_strided_slice %85 {offsets = [0, 0], sizes = [14, 3], strides = [1, 1]} : vector<16x3xf32> to vector<14x3xf32>
    %cst_191 = arith.constant dense<0.000000e+00> : vector<14x10xf32>
    %427 = tpu.matmul %426, %9, %cst_191 {dimension_numbers = #tpu.dot_dimension_numbers<[1], [0], [0], [1], [0, 0, 1, 1], [], []>} : vector<14x3xf32>, vector<3x10xf32>, vector<14x10xf32> -> vector<14x10xf32>
    %428 = vector.extract_strided_slice %85 {offsets = [1, 0], sizes = [14, 3], strides = [1, 1]} : vector<16x3xf32> to vector<14x3xf32>
    %cst_192 = arith.constant dense<0.000000e+00> : vector<14x10xf32>
    %429 = tpu.matmul %428, %11, %cst_192 {dimension_numbers = #tpu.dot_dimension_numbers<[1], [0], [0], [1], [0, 0, 1, 1], [], []>} : vector<14x3xf32>, vector<3x10xf32>, vector<14x10xf32> -> vector<14x10xf32>
    %430 = arith.addf %427, %429 : vector<14x10xf32>
    %431 = vector.extract_strided_slice %85 {offsets = [2, 0], sizes = [14, 3], strides = [1, 1]} : vector<16x3xf32> to vector<14x3xf32>
    %cst_193 = arith.constant dense<0.000000e+00> : vector<14x10xf32>
    %432 = tpu.matmul %431, %13, %cst_193 {dimension_numbers = #tpu.dot_dimension_numbers<[1], [0], [0], [1], [0, 0, 1, 1], [], []>} : vector<14x3xf32>, vector<3x10xf32>, vector<14x10xf32> -> vector<14x10xf32>
    %433 = arith.addf %430, %432 : vector<14x10xf32>
    %434 = vector.extract_strided_slice %87 {offsets = [0, 0], sizes = [14, 3], strides = [1, 1]} : vector<16x3xf32> to vector<14x3xf32>
    %cst_194 = arith.constant dense<0.000000e+00> : vector<14x10xf32>
    %435 = tpu.matmul %434, %15, %cst_194 {dimension_numbers = #tpu.dot_dimension_numbers<[1], [0], [0], [1], [0, 0, 1, 1], [], []>} : vector<14x3xf32>, vector<3x10xf32>, vector<14x10xf32> -> vector<14x10xf32>
    %436 = arith.addf %433, %435 : vector<14x10xf32>
    %437 = vector.extract_strided_slice %87 {offsets = [1, 0], sizes = [14, 3], strides = [1, 1]} : vector<16x3xf32> to vector<14x3xf32>
    %cst_195 = arith.constant dense<0.000000e+00> : vector<14x10xf32>
    %438 = tpu.matmul %437, %17, %cst_195 {dimension_numbers = #tpu.dot_dimension_numbers<[1], [0], [0], [1], [0, 0, 1, 1], [], []>} : vector<14x3xf32>, vector<3x10xf32>, vector<14x10xf32> -> vector<14x10xf32>
    %439 = arith.addf %436, %438 : vector<14x10xf32>
    %440 = vector.extract_strided_slice %87 {offsets = [2, 0], sizes = [14, 3], strides = [1, 1]} : vector<16x3xf32> to vector<14x3xf32>
    %cst_196 = arith.constant dense<0.000000e+00> : vector<14x10xf32>
    %441 = tpu.matmul %440, %19, %cst_196 {dimension_numbers = #tpu.dot_dimension_numbers<[1], [0], [0], [1], [0, 0, 1, 1], [], []>} : vector<14x3xf32>, vector<3x10xf32>, vector<14x10xf32> -> vector<14x10xf32>
    %442 = arith.addf %439, %441 : vector<14x10xf32>
    %443 = vector.extract_strided_slice %89 {offsets = [0, 0], sizes = [14, 3], strides = [1, 1]} : vector<16x3xf32> to vector<14x3xf32>
    %cst_197 = arith.constant dense<0.000000e+00> : vector<14x10xf32>
    %444 = tpu.matmul %443, %21, %cst_197 {dimension_numbers = #tpu.dot_dimension_numbers<[1], [0], [0], [1], [0, 0, 1, 1], [], []>} : vector<14x3xf32>, vector<3x10xf32>, vector<14x10xf32> -> vector<14x10xf32>
    %445 = arith.addf %442, %444 : vector<14x10xf32>
    %446 = vector.extract_strided_slice %89 {offsets = [1, 0], sizes = [14, 3], strides = [1, 1]} : vector<16x3xf32> to vector<14x3xf32>
    %cst_198 = arith.constant dense<0.000000e+00> : vector<14x10xf32>
    %447 = tpu.matmul %446, %23, %cst_198 {dimension_numbers = #tpu.dot_dimension_numbers<[1], [0], [0], [1], [0, 0, 1, 1], [], []>} : vector<14x3xf32>, vector<3x10xf32>, vector<14x10xf32> -> vector<14x10xf32>
    %448 = arith.addf %445, %447 : vector<14x10xf32>
    %449 = vector.extract_strided_slice %89 {offsets = [2, 0], sizes = [14, 3], strides = [1, 1]} : vector<16x3xf32> to vector<14x3xf32>
    %cst_199 = arith.constant dense<0.000000e+00> : vector<14x10xf32>
    %450 = tpu.matmul %449, %25, %cst_199 {dimension_numbers = #tpu.dot_dimension_numbers<[1], [0], [0], [1], [0, 0, 1, 1], [], []>} : vector<14x3xf32>, vector<3x10xf32>, vector<14x10xf32> -> vector<14x10xf32>
    %451 = arith.addf %448, %450 : vector<14x10xf32>
    %452 = vector.broadcast %2 : vector<1x10xf32> to vector<14x10xf32>
    %453 = arith.addf %451, %452 : vector<14x10xf32>
    %cst_200 = arith.constant 0.000000e+00 : f32
    %454 = vector.broadcast %cst_200 : f32 to vector<14x10xf32>
    %455 = arith.cmpf oge, %453, %454 : vector<14x10xf32>
    %456 = vector.broadcast %3 : vector<1x10xf32> to vector<14x10xf32>
    %457 = arith.mulf %456, %453 : vector<14x10xf32>
    %458 = arith.select %455, %453, %457 : vector<14x10xi1>, vector<14x10xf32>
    %459 = vector.extract_strided_slice %87 {offsets = [0, 0], sizes = [14, 3], strides = [1, 1]} : vector<16x3xf32> to vector<14x3xf32>
    %cst_201 = arith.constant dense<0.000000e+00> : vector<14x10xf32>
    %460 = tpu.matmul %459, %9, %cst_201 {dimension_numbers = #tpu.dot_dimension_numbers<[1], [0], [0], [1], [0, 0, 1, 1], [], []>} : vector<14x3xf32>, vector<3x10xf32>, vector<14x10xf32> -> vector<14x10xf32>
    %461 = vector.extract_strided_slice %87 {offsets = [1, 0], sizes = [14, 3], strides = [1, 1]} : vector<16x3xf32> to vector<14x3xf32>
    %cst_202 = arith.constant dense<0.000000e+00> : vector<14x10xf32>
    %462 = tpu.matmul %461, %11, %cst_202 {dimension_numbers = #tpu.dot_dimension_numbers<[1], [0], [0], [1], [0, 0, 1, 1], [], []>} : vector<14x3xf32>, vector<3x10xf32>, vector<14x10xf32> -> vector<14x10xf32>
    %463 = arith.addf %460, %462 : vector<14x10xf32>
    %464 = vector.extract_strided_slice %87 {offsets = [2, 0], sizes = [14, 3], strides = [1, 1]} : vector<16x3xf32> to vector<14x3xf32>
    %cst_203 = arith.constant dense<0.000000e+00> : vector<14x10xf32>
    %465 = tpu.matmul %464, %13, %cst_203 {dimension_numbers = #tpu.dot_dimension_numbers<[1], [0], [0], [1], [0, 0, 1, 1], [], []>} : vector<14x3xf32>, vector<3x10xf32>, vector<14x10xf32> -> vector<14x10xf32>
    %466 = arith.addf %463, %465 : vector<14x10xf32>
    %467 = vector.extract_strided_slice %89 {offsets = [0, 0], sizes = [14, 3], strides = [1, 1]} : vector<16x3xf32> to vector<14x3xf32>
    %cst_204 = arith.constant dense<0.000000e+00> : vector<14x10xf32>
    %468 = tpu.matmul %467, %15, %cst_204 {dimension_numbers = #tpu.dot_dimension_numbers<[1], [0], [0], [1], [0, 0, 1, 1], [], []>} : vector<14x3xf32>, vector<3x10xf32>, vector<14x10xf32> -> vector<14x10xf32>
    %469 = arith.addf %466, %468 : vector<14x10xf32>
    %470 = vector.extract_strided_slice %89 {offsets = [1, 0], sizes = [14, 3], strides = [1, 1]} : vector<16x3xf32> to vector<14x3xf32>
    %cst_205 = arith.constant dense<0.000000e+00> : vector<14x10xf32>
    %471 = tpu.matmul %470, %17, %cst_205 {dimension_numbers = #tpu.dot_dimension_numbers<[1], [0], [0], [1], [0, 0, 1, 1], [], []>} : vector<14x3xf32>, vector<3x10xf32>, vector<14x10xf32> -> vector<14x10xf32>
    %472 = arith.addf %469, %471 : vector<14x10xf32>
    %473 = vector.extract_strided_slice %89 {offsets = [2, 0], sizes = [14, 3], strides = [1, 1]} : vector<16x3xf32> to vector<14x3xf32>
    %cst_206 = arith.constant dense<0.000000e+00> : vector<14x10xf32>
    %474 = tpu.matmul %473, %19, %cst_206 {dimension_numbers = #tpu.dot_dimension_numbers<[1], [0], [0], [1], [0, 0, 1, 1], [], []>} : vector<14x3xf32>, vector<3x10xf32>, vector<14x10xf32> -> vector<14x10xf32>
    %475 = arith.addf %472, %474 : vector<14x10xf32>
    %476 = vector.extract_strided_slice %91 {offsets = [0, 0], sizes = [14, 3], strides = [1, 1]} : vector<16x3xf32> to vector<14x3xf32>
    %cst_207 = arith.constant dense<0.000000e+00> : vector<14x10xf32>
    %477 = tpu.matmul %476, %21, %cst_207 {dimension_numbers = #tpu.dot_dimension_numbers<[1], [0], [0], [1], [0, 0, 1, 1], [], []>} : vector<14x3xf32>, vector<3x10xf32>, vector<14x10xf32> -> vector<14x10xf32>
    %478 = arith.addf %475, %477 : vector<14x10xf32>
    %479 = vector.extract_strided_slice %91 {offsets = [1, 0], sizes = [14, 3], strides = [1, 1]} : vector<16x3xf32> to vector<14x3xf32>
    %cst_208 = arith.constant dense<0.000000e+00> : vector<14x10xf32>
    %480 = tpu.matmul %479, %23, %cst_208 {dimension_numbers = #tpu.dot_dimension_numbers<[1], [0], [0], [1], [0, 0, 1, 1], [], []>} : vector<14x3xf32>, vector<3x10xf32>, vector<14x10xf32> -> vector<14x10xf32>
    %481 = arith.addf %478, %480 : vector<14x10xf32>
    %482 = vector.extract_strided_slice %91 {offsets = [2, 0], sizes = [14, 3], strides = [1, 1]} : vector<16x3xf32> to vector<14x3xf32>
    %cst_209 = arith.constant dense<0.000000e+00> : vector<14x10xf32>
    %483 = tpu.matmul %482, %25, %cst_209 {dimension_numbers = #tpu.dot_dimension_numbers<[1], [0], [0], [1], [0, 0, 1, 1], [], []>} : vector<14x3xf32>, vector<3x10xf32>, vector<14x10xf32> -> vector<14x10xf32>
    %484 = arith.addf %481, %483 : vector<14x10xf32>
    %485 = vector.broadcast %2 : vector<1x10xf32> to vector<14x10xf32>
    %486 = arith.addf %484, %485 : vector<14x10xf32>
    %cst_210 = arith.constant 0.000000e+00 : f32
    %487 = vector.broadcast %cst_210 : f32 to vector<14x10xf32>
    %488 = arith.cmpf oge, %486, %487 : vector<14x10xf32>
    %489 = vector.broadcast %3 : vector<1x10xf32> to vector<14x10xf32>
    %490 = arith.mulf %489, %486 : vector<14x10xf32>
    %491 = arith.select %488, %486, %490 : vector<14x10xi1>, vector<14x10xf32>
    %492 = vector.extract_strided_slice %89 {offsets = [0, 0], sizes = [14, 3], strides = [1, 1]} : vector<16x3xf32> to vector<14x3xf32>
    %cst_211 = arith.constant dense<0.000000e+00> : vector<14x10xf32>
    %493 = tpu.matmul %492, %9, %cst_211 {dimension_numbers = #tpu.dot_dimension_numbers<[1], [0], [0], [1], [0, 0, 1, 1], [], []>} : vector<14x3xf32>, vector<3x10xf32>, vector<14x10xf32> -> vector<14x10xf32>
    %494 = vector.extract_strided_slice %89 {offsets = [1, 0], sizes = [14, 3], strides = [1, 1]} : vector<16x3xf32> to vector<14x3xf32>
    %cst_212 = arith.constant dense<0.000000e+00> : vector<14x10xf32>
    %495 = tpu.matmul %494, %11, %cst_212 {dimension_numbers = #tpu.dot_dimension_numbers<[1], [0], [0], [1], [0, 0, 1, 1], [], []>} : vector<14x3xf32>, vector<3x10xf32>, vector<14x10xf32> -> vector<14x10xf32>
    %496 = arith.addf %493, %495 : vector<14x10xf32>
    %497 = vector.extract_strided_slice %89 {offsets = [2, 0], sizes = [14, 3], strides = [1, 1]} : vector<16x3xf32> to vector<14x3xf32>
    %cst_213 = arith.constant dense<0.000000e+00> : vector<14x10xf32>
    %498 = tpu.matmul %497, %13, %cst_213 {dimension_numbers = #tpu.dot_dimension_numbers<[1], [0], [0], [1], [0, 0, 1, 1], [], []>} : vector<14x3xf32>, vector<3x10xf32>, vector<14x10xf32> -> vector<14x10xf32>
    %499 = arith.addf %496, %498 : vector<14x10xf32>
    %500 = vector.extract_strided_slice %91 {offsets = [0, 0], sizes = [14, 3], strides = [1, 1]} : vector<16x3xf32> to vector<14x3xf32>
    %cst_214 = arith.constant dense<0.000000e+00> : vector<14x10xf32>
    %501 = tpu.matmul %500, %15, %cst_214 {dimension_numbers = #tpu.dot_dimension_numbers<[1], [0], [0], [1], [0, 0, 1, 1], [], []>} : vector<14x3xf32>, vector<3x10xf32>, vector<14x10xf32> -> vector<14x10xf32>
    %502 = arith.addf %499, %501 : vector<14x10xf32>
    %503 = vector.extract_strided_slice %91 {offsets = [1, 0], sizes = [14, 3], strides = [1, 1]} : vector<16x3xf32> to vector<14x3xf32>
    %cst_215 = arith.constant dense<0.000000e+00> : vector<14x10xf32>
    %504 = tpu.matmul %503, %17, %cst_215 {dimension_numbers = #tpu.dot_dimension_numbers<[1], [0], [0], [1], [0, 0, 1, 1], [], []>} : vector<14x3xf32>, vector<3x10xf32>, vector<14x10xf32> -> vector<14x10xf32>
    %505 = arith.addf %502, %504 : vector<14x10xf32>
    %506 = vector.extract_strided_slice %91 {offsets = [2, 0], sizes = [14, 3], strides = [1, 1]} : vector<16x3xf32> to vector<14x3xf32>
    %cst_216 = arith.constant dense<0.000000e+00> : vector<14x10xf32>
    %507 = tpu.matmul %506, %19, %cst_216 {dimension_numbers = #tpu.dot_dimension_numbers<[1], [0], [0], [1], [0, 0, 1, 1], [], []>} : vector<14x3xf32>, vector<3x10xf32>, vector<14x10xf32> -> vector<14x10xf32>
    %508 = arith.addf %505, %507 : vector<14x10xf32>
    %509 = vector.extract_strided_slice %93 {offsets = [0, 0], sizes = [14, 3], strides = [1, 1]} : vector<16x3xf32> to vector<14x3xf32>
    %cst_217 = arith.constant dense<0.000000e+00> : vector<14x10xf32>
    %510 = tpu.matmul %509, %21, %cst_217 {dimension_numbers = #tpu.dot_dimension_numbers<[1], [0], [0], [1], [0, 0, 1, 1], [], []>} : vector<14x3xf32>, vector<3x10xf32>, vector<14x10xf32> -> vector<14x10xf32>
    %511 = arith.addf %508, %510 : vector<14x10xf32>
    %512 = vector.extract_strided_slice %93 {offsets = [1, 0], sizes = [14, 3], strides = [1, 1]} : vector<16x3xf32> to vector<14x3xf32>
    %cst_218 = arith.constant dense<0.000000e+00> : vector<14x10xf32>
    %513 = tpu.matmul %512, %23, %cst_218 {dimension_numbers = #tpu.dot_dimension_numbers<[1], [0], [0], [1], [0, 0, 1, 1], [], []>} : vector<14x3xf32>, vector<3x10xf32>, vector<14x10xf32> -> vector<14x10xf32>
    %514 = arith.addf %511, %513 : vector<14x10xf32>
    %515 = vector.extract_strided_slice %93 {offsets = [2, 0], sizes = [14, 3], strides = [1, 1]} : vector<16x3xf32> to vector<14x3xf32>
    %cst_219 = arith.constant dense<0.000000e+00> : vector<14x10xf32>
    %516 = tpu.matmul %515, %25, %cst_219 {dimension_numbers = #tpu.dot_dimension_numbers<[1], [0], [0], [1], [0, 0, 1, 1], [], []>} : vector<14x3xf32>, vector<3x10xf32>, vector<14x10xf32> -> vector<14x10xf32>
    %517 = arith.addf %514, %516 : vector<14x10xf32>
    %518 = vector.broadcast %2 : vector<1x10xf32> to vector<14x10xf32>
    %519 = arith.addf %517, %518 : vector<14x10xf32>
    %cst_220 = arith.constant 0.000000e+00 : f32
    %520 = vector.broadcast %cst_220 : f32 to vector<14x10xf32>
    %521 = arith.cmpf oge, %519, %520 : vector<14x10xf32>
    %522 = vector.broadcast %3 : vector<1x10xf32> to vector<14x10xf32>
    %523 = arith.mulf %522, %519 : vector<14x10xf32>
    %524 = arith.select %521, %519, %523 : vector<14x10xi1>, vector<14x10xf32>
    %525 = vector.extract_strided_slice %91 {offsets = [0, 0], sizes = [14, 3], strides = [1, 1]} : vector<16x3xf32> to vector<14x3xf32>
    %cst_221 = arith.constant dense<0.000000e+00> : vector<14x10xf32>
    %526 = tpu.matmul %525, %9, %cst_221 {dimension_numbers = #tpu.dot_dimension_numbers<[1], [0], [0], [1], [0, 0, 1, 1], [], []>} : vector<14x3xf32>, vector<3x10xf32>, vector<14x10xf32> -> vector<14x10xf32>
    %527 = vector.extract_strided_slice %91 {offsets = [1, 0], sizes = [14, 3], strides = [1, 1]} : vector<16x3xf32> to vector<14x3xf32>
    %cst_222 = arith.constant dense<0.000000e+00> : vector<14x10xf32>
    %528 = tpu.matmul %527, %11, %cst_222 {dimension_numbers = #tpu.dot_dimension_numbers<[1], [0], [0], [1], [0, 0, 1, 1], [], []>} : vector<14x3xf32>, vector<3x10xf32>, vector<14x10xf32> -> vector<14x10xf32>
    %529 = arith.addf %526, %528 : vector<14x10xf32>
    %530 = vector.extract_strided_slice %91 {offsets = [2, 0], sizes = [14, 3], strides = [1, 1]} : vector<16x3xf32> to vector<14x3xf32>
    %cst_223 = arith.constant dense<0.000000e+00> : vector<14x10xf32>
    %531 = tpu.matmul %530, %13, %cst_223 {dimension_numbers = #tpu.dot_dimension_numbers<[1], [0], [0], [1], [0, 0, 1, 1], [], []>} : vector<14x3xf32>, vector<3x10xf32>, vector<14x10xf32> -> vector<14x10xf32>
    %532 = arith.addf %529, %531 : vector<14x10xf32>
    %533 = vector.extract_strided_slice %93 {offsets = [0, 0], sizes = [14, 3], strides = [1, 1]} : vector<16x3xf32> to vector<14x3xf32>
    %cst_224 = arith.constant dense<0.000000e+00> : vector<14x10xf32>
    %534 = tpu.matmul %533, %15, %cst_224 {dimension_numbers = #tpu.dot_dimension_numbers<[1], [0], [0], [1], [0, 0, 1, 1], [], []>} : vector<14x3xf32>, vector<3x10xf32>, vector<14x10xf32> -> vector<14x10xf32>
    %535 = arith.addf %532, %534 : vector<14x10xf32>
    %536 = vector.extract_strided_slice %93 {offsets = [1, 0], sizes = [14, 3], strides = [1, 1]} : vector<16x3xf32> to vector<14x3xf32>
    %cst_225 = arith.constant dense<0.000000e+00> : vector<14x10xf32>
    %537 = tpu.matmul %536, %17, %cst_225 {dimension_numbers = #tpu.dot_dimension_numbers<[1], [0], [0], [1], [0, 0, 1, 1], [], []>} : vector<14x3xf32>, vector<3x10xf32>, vector<14x10xf32> -> vector<14x10xf32>
    %538 = arith.addf %535, %537 : vector<14x10xf32>
    %539 = vector.extract_strided_slice %93 {offsets = [2, 0], sizes = [14, 3], strides = [1, 1]} : vector<16x3xf32> to vector<14x3xf32>
    %cst_226 = arith.constant dense<0.000000e+00> : vector<14x10xf32>
    %540 = tpu.matmul %539, %19, %cst_226 {dimension_numbers = #tpu.dot_dimension_numbers<[1], [0], [0], [1], [0, 0, 1, 1], [], []>} : vector<14x3xf32>, vector<3x10xf32>, vector<14x10xf32> -> vector<14x10xf32>
    %541 = arith.addf %538, %540 : vector<14x10xf32>
    %542 = vector.extract_strided_slice %95 {offsets = [0, 0], sizes = [14, 3], strides = [1, 1]} : vector<16x3xf32> to vector<14x3xf32>
    %cst_227 = arith.constant dense<0.000000e+00> : vector<14x10xf32>
    %543 = tpu.matmul %542, %21, %cst_227 {dimension_numbers = #tpu.dot_dimension_numbers<[1], [0], [0], [1], [0, 0, 1, 1], [], []>} : vector<14x3xf32>, vector<3x10xf32>, vector<14x10xf32> -> vector<14x10xf32>
    %544 = arith.addf %541, %543 : vector<14x10xf32>
    %545 = vector.extract_strided_slice %95 {offsets = [1, 0], sizes = [14, 3], strides = [1, 1]} : vector<16x3xf32> to vector<14x3xf32>
    %cst_228 = arith.constant dense<0.000000e+00> : vector<14x10xf32>
    %546 = tpu.matmul %545, %23, %cst_228 {dimension_numbers = #tpu.dot_dimension_numbers<[1], [0], [0], [1], [0, 0, 1, 1], [], []>} : vector<14x3xf32>, vector<3x10xf32>, vector<14x10xf32> -> vector<14x10xf32>
    %547 = arith.addf %544, %546 : vector<14x10xf32>
    %548 = vector.extract_strided_slice %95 {offsets = [2, 0], sizes = [14, 3], strides = [1, 1]} : vector<16x3xf32> to vector<14x3xf32>
    %cst_229 = arith.constant dense<0.000000e+00> : vector<14x10xf32>
    %549 = tpu.matmul %548, %25, %cst_229 {dimension_numbers = #tpu.dot_dimension_numbers<[1], [0], [0], [1], [0, 0, 1, 1], [], []>} : vector<14x3xf32>, vector<3x10xf32>, vector<14x10xf32> -> vector<14x10xf32>
    %550 = arith.addf %547, %549 : vector<14x10xf32>
    %551 = vector.broadcast %2 : vector<1x10xf32> to vector<14x10xf32>
    %552 = arith.addf %550, %551 : vector<14x10xf32>
    %cst_230 = arith.constant 0.000000e+00 : f32
    %553 = vector.broadcast %cst_230 : f32 to vector<14x10xf32>
    %554 = arith.cmpf oge, %552, %553 : vector<14x10xf32>
    %555 = vector.broadcast %3 : vector<1x10xf32> to vector<14x10xf32>
    %556 = arith.mulf %555, %552 : vector<14x10xf32>
    %557 = arith.select %554, %552, %556 : vector<14x10xi1>, vector<14x10xf32>
    %c0_231 = arith.constant 0 : index
    %c0_232 = arith.constant 0 : index
    %c0_233 = arith.constant 0 : index
    %558 = vector.load %arg14[%c0_231, %c0_232, %c0_233] : memref<15x15x10xf32, #tpu.memory_space<vmem>>, vector<1x14x10xf32>
    %559 = vector.shape_cast %558 : vector<1x14x10xf32> to vector<14x10xf32>
    %560 = vector.shape_cast %128 : vector<14x10xf32> to vector<1x14x10xf32>
    tpu.vector_store %arg14[%c0_231, %c0_232, %c0_233], %560 {strides = array<i32>} : memref<15x15x10xf32, #tpu.memory_space<vmem>>, vector<1x14x10xf32>,
    %c1_234 = arith.constant 1 : index
    %c0_235 = arith.constant 0 : index
    %c0_236 = arith.constant 0 : index
    %561 = vector.load %arg14[%c1_234, %c0_235, %c0_236] : memref<15x15x10xf32, #tpu.memory_space<vmem>>, vector<1x14x10xf32>
    %562 = vector.shape_cast %561 : vector<1x14x10xf32> to vector<14x10xf32>
    %563 = vector.shape_cast %161 : vector<14x10xf32> to vector<1x14x10xf32>
    tpu.vector_store %arg14[%c1_234, %c0_235, %c0_236], %563 {strides = array<i32>} : memref<15x15x10xf32, #tpu.memory_space<vmem>>, vector<1x14x10xf32>,
    %c2_237 = arith.constant 2 : index
    %c0_238 = arith.constant 0 : index
    %c0_239 = arith.constant 0 : index
    %564 = vector.load %arg14[%c2_237, %c0_238, %c0_239] : memref<15x15x10xf32, #tpu.memory_space<vmem>>, vector<1x14x10xf32>
    %565 = vector.shape_cast %564 : vector<1x14x10xf32> to vector<14x10xf32>
    %566 = vector.shape_cast %194 : vector<14x10xf32> to vector<1x14x10xf32>
    tpu.vector_store %arg14[%c2_237, %c0_238, %c0_239], %566 {strides = array<i32>} : memref<15x15x10xf32, #tpu.memory_space<vmem>>, vector<1x14x10xf32>,
    %c3_240 = arith.constant 3 : index
    %c0_241 = arith.constant 0 : index
    %c0_242 = arith.constant 0 : index
    %567 = vector.load %arg14[%c3_240, %c0_241, %c0_242] : memref<15x15x10xf32, #tpu.memory_space<vmem>>, vector<1x14x10xf32>
    %568 = vector.shape_cast %567 : vector<1x14x10xf32> to vector<14x10xf32>
    %569 = vector.shape_cast %227 : vector<14x10xf32> to vector<1x14x10xf32>
    tpu.vector_store %arg14[%c3_240, %c0_241, %c0_242], %569 {strides = array<i32>} : memref<15x15x10xf32, #tpu.memory_space<vmem>>, vector<1x14x10xf32>,
    %c4_243 = arith.constant 4 : index
    %c0_244 = arith.constant 0 : index
    %c0_245 = arith.constant 0 : index
    %570 = vector.load %arg14[%c4_243, %c0_244, %c0_245] : memref<15x15x10xf32, #tpu.memory_space<vmem>>, vector<1x14x10xf32>
    %571 = vector.shape_cast %570 : vector<1x14x10xf32> to vector<14x10xf32>
    %572 = vector.shape_cast %260 : vector<14x10xf32> to vector<1x14x10xf32>
    tpu.vector_store %arg14[%c4_243, %c0_244, %c0_245], %572 {strides = array<i32>} : memref<15x15x10xf32, #tpu.memory_space<vmem>>, vector<1x14x10xf32>,
    %c5_246 = arith.constant 5 : index
    %c0_247 = arith.constant 0 : index
    %c0_248 = arith.constant 0 : index
    %573 = vector.load %arg14[%c5_246, %c0_247, %c0_248] : memref<15x15x10xf32, #tpu.memory_space<vmem>>, vector<1x14x10xf32>
    %574 = vector.shape_cast %573 : vector<1x14x10xf32> to vector<14x10xf32>
    %575 = vector.shape_cast %293 : vector<14x10xf32> to vector<1x14x10xf32>
    tpu.vector_store %arg14[%c5_246, %c0_247, %c0_248], %575 {strides = array<i32>} : memref<15x15x10xf32, #tpu.memory_space<vmem>>, vector<1x14x10xf32>,
    %c6_249 = arith.constant 6 : index
    %c0_250 = arith.constant 0 : index
    %c0_251 = arith.constant 0 : index
    %576 = vector.load %arg14[%c6_249, %c0_250, %c0_251] : memref<15x15x10xf32, #tpu.memory_space<vmem>>, vector<1x14x10xf32>
    %577 = vector.shape_cast %576 : vector<1x14x10xf32> to vector<14x10xf32>
    %578 = vector.shape_cast %326 : vector<14x10xf32> to vector<1x14x10xf32>
    tpu.vector_store %arg14[%c6_249, %c0_250, %c0_251], %578 {strides = array<i32>} : memref<15x15x10xf32, #tpu.memory_space<vmem>>, vector<1x14x10xf32>,
    %c7_252 = arith.constant 7 : index
    %c0_253 = arith.constant 0 : index
    %c0_254 = arith.constant 0 : index
    %579 = vector.load %arg14[%c7_252, %c0_253, %c0_254] : memref<15x15x10xf32, #tpu.memory_space<vmem>>, vector<1x14x10xf32>
    %580 = vector.shape_cast %579 : vector<1x14x10xf32> to vector<14x10xf32>
    %581 = vector.shape_cast %359 : vector<14x10xf32> to vector<1x14x10xf32>
    tpu.vector_store %arg14[%c7_252, %c0_253, %c0_254], %581 {strides = array<i32>} : memref<15x15x10xf32, #tpu.memory_space<vmem>>, vector<1x14x10xf32>,
    %c8_255 = arith.constant 8 : index
    %c0_256 = arith.constant 0 : index
    %c0_257 = arith.constant 0 : index
    %582 = vector.load %arg14[%c8_255, %c0_256, %c0_257] : memref<15x15x10xf32, #tpu.memory_space<vmem>>, vector<1x14x10xf32>
    %583 = vector.shape_cast %582 : vector<1x14x10xf32> to vector<14x10xf32>
    %584 = vector.shape_cast %392 : vector<14x10xf32> to vector<1x14x10xf32>
    tpu.vector_store %arg14[%c8_255, %c0_256, %c0_257], %584 {strides = array<i32>} : memref<15x15x10xf32, #tpu.memory_space<vmem>>, vector<1x14x10xf32>,
    %c9 = arith.constant 9 : index
    %c0_258 = arith.constant 0 : index
    %c0_259 = arith.constant 0 : index
    %585 = vector.load %arg14[%c9, %c0_258, %c0_259] : memref<15x15x10xf32, #tpu.memory_space<vmem>>, vector<1x14x10xf32>
    %586 = vector.shape_cast %585 : vector<1x14x10xf32> to vector<14x10xf32>
    %587 = vector.shape_cast %425 : vector<14x10xf32> to vector<1x14x10xf32>
    tpu.vector_store %arg14[%c9, %c0_258, %c0_259], %587 {strides = array<i32>} : memref<15x15x10xf32, #tpu.memory_space<vmem>>, vector<1x14x10xf32>,
    %c10 = arith.constant 10 : index
    %c0_260 = arith.constant 0 : index
    %c0_261 = arith.constant 0 : index
    %588 = vector.load %arg14[%c10, %c0_260, %c0_261] : memref<15x15x10xf32, #tpu.memory_space<vmem>>, vector<1x14x10xf32>
    %589 = vector.shape_cast %588 : vector<1x14x10xf32> to vector<14x10xf32>
    %590 = vector.shape_cast %458 : vector<14x10xf32> to vector<1x14x10xf32>
    tpu.vector_store %arg14[%c10, %c0_260, %c0_261], %590 {strides = array<i32>} : memref<15x15x10xf32, #tpu.memory_space<vmem>>, vector<1x14x10xf32>,
    %c11 = arith.constant 11 : index
    %c0_262 = arith.constant 0 : index
    %c0_263 = arith.constant 0 : index
    %591 = vector.load %arg14[%c11, %c0_262, %c0_263] : memref<15x15x10xf32, #tpu.memory_space<vmem>>, vector<1x14x10xf32>
    %592 = vector.shape_cast %591 : vector<1x14x10xf32> to vector<14x10xf32>
    %593 = vector.shape_cast %491 : vector<14x10xf32> to vector<1x14x10xf32>
    tpu.vector_store %arg14[%c11, %c0_262, %c0_263], %593 {strides = array<i32>} : memref<15x15x10xf32, #tpu.memory_space<vmem>>, vector<1x14x10xf32>,
    %c12 = arith.constant 12 : index
    %c0_264 = arith.constant 0 : index
    %c0_265 = arith.constant 0 : index
    %594 = vector.load %arg14[%c12, %c0_264, %c0_265] : memref<15x15x10xf32, #tpu.memory_space<vmem>>, vector<1x14x10xf32>
    %595 = vector.shape_cast %594 : vector<1x14x10xf32> to vector<14x10xf32>
    %596 = vector.shape_cast %524 : vector<14x10xf32> to vector<1x14x10xf32>
    tpu.vector_store %arg14[%c12, %c0_264, %c0_265], %596 {strides = array<i32>} : memref<15x15x10xf32, #tpu.memory_space<vmem>>, vector<1x14x10xf32>,
    %c13 = arith.constant 13 : index
    %c0_266 = arith.constant 0 : index
    %c0_267 = arith.constant 0 : index
    %597 = vector.load %arg14[%c13, %c0_266, %c0_267] : memref<15x15x10xf32, #tpu.memory_space<vmem>>, vector<1x14x10xf32>
    %598 = vector.shape_cast %597 : vector<1x14x10xf32> to vector<14x10xf32>
    %599 = vector.shape_cast %557 : vector<14x10xf32> to vector<1x14x10xf32>
    tpu.vector_store %arg14[%c13, %c0_266, %c0_267], %599 {strides = array<i32>} : memref<15x15x10xf32, #tpu.memory_space<vmem>>, vector<1x14x10xf32>,
    %c0_268 = arith.constant 0 : index
    %c0_269 = arith.constant 0 : index
    %c0_270 = arith.constant 0 : index
    %600 = tpu.strided_load %arg14[%c0_268, %c0_269, %c0_270] {strides = array<i32: 2, 1, 1>} : memref<15x15x10xf32, #tpu.memory_space<vmem>>, vector<7x15x10xf32>
    %c1_271 = arith.constant 1 : index
    %c0_272 = arith.constant 0 : index
    %c0_273 = arith.constant 0 : index
    %601 = tpu.strided_load %arg14[%c1_271, %c0_272, %c0_273] {strides = array<i32: 2, 1, 1>} : memref<15x15x10xf32, #tpu.memory_space<vmem>>, vector<7x15x10xf32>
    %602 = arith.maximumf %600, %601 : vector<7x15x10xf32>
    %c2_274 = arith.constant 2 : index
    %c0_275 = arith.constant 0 : index
    %c0_276 = arith.constant 0 : index
    %603 = tpu.strided_load %arg14[%c2_274, %c0_275, %c0_276] {strides = array<i32: 2, 1, 1>} : memref<15x15x10xf32, #tpu.memory_space<vmem>>, vector<7x15x10xf32>
    %604 = arith.maximumf %602, %603 : vector<7x15x10xf32>
    %c0_277 = arith.constant 0 : index
    %c0_278 = arith.constant 0 : index
    %c0_279 = arith.constant 0 : index
    %605 = vector.load %arg15[%c0_277, %c0_278, %c0_279] : memref<7x15x10xf32, #tpu.memory_space<vmem>>, vector<7x15x10xf32>
    tpu.vector_store %arg15[%c0_277, %c0_278, %c0_279], %604 {strides = array<i32>} : memref<7x15x10xf32, #tpu.memory_space<vmem>>, vector<7x15x10xf32>,
    %c0_280 = arith.constant 0 : index
    %c0_281 = arith.constant 0 : index
    %c0_282 = arith.constant 0 : index
    %606 = tpu.strided_load %arg15[%c0_280, %c0_281, %c0_282] {strides = array<i32: 1, 2, 1>} : memref<7x15x10xf32, #tpu.memory_space<vmem>>, vector<7x7x10xf32>
    %c0_283 = arith.constant 0 : index
    %c1_284 = arith.constant 1 : index
    %c0_285 = arith.constant 0 : index
    %607 = tpu.strided_load %arg15[%c0_283, %c1_284, %c0_285] {strides = array<i32: 1, 2, 1>} : memref<7x15x10xf32, #tpu.memory_space<vmem>>, vector<7x7x10xf32>
    %608 = arith.maximumf %606, %607 : vector<7x7x10xf32>
    %c0_286 = arith.constant 0 : index
    %c2_287 = arith.constant 2 : index
    %c0_288 = arith.constant 0 : index
    %609 = tpu.strided_load %arg15[%c0_286, %c2_287, %c0_288] {strides = array<i32: 1, 2, 1>} : memref<7x15x10xf32, #tpu.memory_space<vmem>>, vector<7x7x10xf32>
    %610 = arith.maximumf %608, %609 : vector<7x7x10xf32>
    %611 = vector.extract_strided_slice %610 {offsets = [0, 0, 0], sizes = [1, 7, 10], strides = [1, 1, 1]} : vector<7x7x10xf32> to vector<1x7x10xf32>
    %612 = vector.shape_cast %611 : vector<1x7x10xf32> to vector<7x10xf32>
    %613 = vector.extract_strided_slice %610 {offsets = [1, 0, 0], sizes = [1, 7, 10], strides = [1, 1, 1]} : vector<7x7x10xf32> to vector<1x7x10xf32>
    %614 = vector.shape_cast %613 : vector<1x7x10xf32> to vector<7x10xf32>
    %615 = vector.extract_strided_slice %610 {offsets = [2, 0, 0], sizes = [1, 7, 10], strides = [1, 1, 1]} : vector<7x7x10xf32> to vector<1x7x10xf32>
    %616 = vector.shape_cast %615 : vector<1x7x10xf32> to vector<7x10xf32>
    %617 = vector.extract_strided_slice %610 {offsets = [3, 0, 0], sizes = [1, 7, 10], strides = [1, 1, 1]} : vector<7x7x10xf32> to vector<1x7x10xf32>
    %618 = vector.shape_cast %617 : vector<1x7x10xf32> to vector<7x10xf32>
    %619 = vector.extract_strided_slice %610 {offsets = [4, 0, 0], sizes = [1, 7, 10], strides = [1, 1, 1]} : vector<7x7x10xf32> to vector<1x7x10xf32>
    %620 = vector.shape_cast %619 : vector<1x7x10xf32> to vector<7x10xf32>
    %621 = vector.extract_strided_slice %610 {offsets = [5, 0, 0], sizes = [1, 7, 10], strides = [1, 1, 1]} : vector<7x7x10xf32> to vector<1x7x10xf32>
    %622 = vector.shape_cast %621 : vector<1x7x10xf32> to vector<7x10xf32>
    %623 = vector.extract_strided_slice %610 {offsets = [6, 0, 0], sizes = [1, 7, 10], strides = [1, 1, 1]} : vector<7x7x10xf32> to vector<1x7x10xf32>
    %624 = vector.shape_cast %623 : vector<1x7x10xf32> to vector<7x10xf32>
    %625 = vector.extract_strided_slice %612 {offsets = [0, 0], sizes = [5, 10], strides = [1, 1]} : vector<7x10xf32> to vector<5x10xf32>
    %cst_289 = arith.constant dense<0.000000e+00> : vector<5x16xf32>
    %626 = tpu.matmul %625, %27, %cst_289 {dimension_numbers = #tpu.dot_dimension_numbers<[1], [0], [0], [1], [0, 0, 1, 1], [], []>} : vector<5x10xf32>, vector<10x16xf32>, vector<5x16xf32> -> vector<5x16xf32>
    %627 = vector.extract_strided_slice %612 {offsets = [1, 0], sizes = [5, 10], strides = [1, 1]} : vector<7x10xf32> to vector<5x10xf32>
    %cst_290 = arith.constant dense<0.000000e+00> : vector<5x16xf32>
    %628 = tpu.matmul %627, %29, %cst_290 {dimension_numbers = #tpu.dot_dimension_numbers<[1], [0], [0], [1], [0, 0, 1, 1], [], []>} : vector<5x10xf32>, vector<10x16xf32>, vector<5x16xf32> -> vector<5x16xf32>
    %629 = arith.addf %626, %628 : vector<5x16xf32>
    %630 = vector.extract_strided_slice %612 {offsets = [2, 0], sizes = [5, 10], strides = [1, 1]} : vector<7x10xf32> to vector<5x10xf32>
    %cst_291 = arith.constant dense<0.000000e+00> : vector<5x16xf32>
    %631 = tpu.matmul %630, %31, %cst_291 {dimension_numbers = #tpu.dot_dimension_numbers<[1], [0], [0], [1], [0, 0, 1, 1], [], []>} : vector<5x10xf32>, vector<10x16xf32>, vector<5x16xf32> -> vector<5x16xf32>
    %632 = arith.addf %629, %631 : vector<5x16xf32>
    %633 = vector.extract_strided_slice %614 {offsets = [0, 0], sizes = [5, 10], strides = [1, 1]} : vector<7x10xf32> to vector<5x10xf32>
    %cst_292 = arith.constant dense<0.000000e+00> : vector<5x16xf32>
    %634 = tpu.matmul %633, %33, %cst_292 {dimension_numbers = #tpu.dot_dimension_numbers<[1], [0], [0], [1], [0, 0, 1, 1], [], []>} : vector<5x10xf32>, vector<10x16xf32>, vector<5x16xf32> -> vector<5x16xf32>
    %635 = arith.addf %632, %634 : vector<5x16xf32>
    %636 = vector.extract_strided_slice %614 {offsets = [1, 0], sizes = [5, 10], strides = [1, 1]} : vector<7x10xf32> to vector<5x10xf32>
    %cst_293 = arith.constant dense<0.000000e+00> : vector<5x16xf32>
    %637 = tpu.matmul %636, %35, %cst_293 {dimension_numbers = #tpu.dot_dimension_numbers<[1], [0], [0], [1], [0, 0, 1, 1], [], []>} : vector<5x10xf32>, vector<10x16xf32>, vector<5x16xf32> -> vector<5x16xf32>
    %638 = arith.addf %635, %637 : vector<5x16xf32>
    %639 = vector.extract_strided_slice %614 {offsets = [2, 0], sizes = [5, 10], strides = [1, 1]} : vector<7x10xf32> to vector<5x10xf32>
    %cst_294 = arith.constant dense<0.000000e+00> : vector<5x16xf32>
    %640 = tpu.matmul %639, %37, %cst_294 {dimension_numbers = #tpu.dot_dimension_numbers<[1], [0], [0], [1], [0, 0, 1, 1], [], []>} : vector<5x10xf32>, vector<10x16xf32>, vector<5x16xf32> -> vector<5x16xf32>
    %641 = arith.addf %638, %640 : vector<5x16xf32>
    %642 = vector.extract_strided_slice %616 {offsets = [0, 0], sizes = [5, 10], strides = [1, 1]} : vector<7x10xf32> to vector<5x10xf32>
    %cst_295 = arith.constant dense<0.000000e+00> : vector<5x16xf32>
    %643 = tpu.matmul %642, %39, %cst_295 {dimension_numbers = #tpu.dot_dimension_numbers<[1], [0], [0], [1], [0, 0, 1, 1], [], []>} : vector<5x10xf32>, vector<10x16xf32>, vector<5x16xf32> -> vector<5x16xf32>
    %644 = arith.addf %641, %643 : vector<5x16xf32>
    %645 = vector.extract_strided_slice %616 {offsets = [1, 0], sizes = [5, 10], strides = [1, 1]} : vector<7x10xf32> to vector<5x10xf32>
    %cst_296 = arith.constant dense<0.000000e+00> : vector<5x16xf32>
    %646 = tpu.matmul %645, %41, %cst_296 {dimension_numbers = #tpu.dot_dimension_numbers<[1], [0], [0], [1], [0, 0, 1, 1], [], []>} : vector<5x10xf32>, vector<10x16xf32>, vector<5x16xf32> -> vector<5x16xf32>
    %647 = arith.addf %644, %646 : vector<5x16xf32>
    %648 = vector.extract_strided_slice %616 {offsets = [2, 0], sizes = [5, 10], strides = [1, 1]} : vector<7x10xf32> to vector<5x10xf32>
    %cst_297 = arith.constant dense<0.000000e+00> : vector<5x16xf32>
    %649 = tpu.matmul %648, %43, %cst_297 {dimension_numbers = #tpu.dot_dimension_numbers<[1], [0], [0], [1], [0, 0, 1, 1], [], []>} : vector<5x10xf32>, vector<10x16xf32>, vector<5x16xf32> -> vector<5x16xf32>
    %650 = arith.addf %647, %649 : vector<5x16xf32>
    %651 = vector.broadcast %4 : vector<1x16xf32> to vector<5x16xf32>
    %652 = arith.addf %650, %651 : vector<5x16xf32>
    %cst_298 = arith.constant 0.000000e+00 : f32
    %653 = vector.broadcast %cst_298 : f32 to vector<5x16xf32>
    %654 = arith.cmpf oge, %652, %653 : vector<5x16xf32>
    %655 = vector.broadcast %5 : vector<1x16xf32> to vector<5x16xf32>
    %656 = arith.mulf %655, %652 : vector<5x16xf32>
    %657 = arith.select %654, %652, %656 : vector<5x16xi1>, vector<5x16xf32>
    %658 = vector.extract_strided_slice %614 {offsets = [0, 0], sizes = [5, 10], strides = [1, 1]} : vector<7x10xf32> to vector<5x10xf32>
    %cst_299 = arith.constant dense<0.000000e+00> : vector<5x16xf32>
    %659 = tpu.matmul %658, %27, %cst_299 {dimension_numbers = #tpu.dot_dimension_numbers<[1], [0], [0], [1], [0, 0, 1, 1], [], []>} : vector<5x10xf32>, vector<10x16xf32>, vector<5x16xf32> -> vector<5x16xf32>
    %660 = vector.extract_strided_slice %614 {offsets = [1, 0], sizes = [5, 10], strides = [1, 1]} : vector<7x10xf32> to vector<5x10xf32>
    %cst_300 = arith.constant dense<0.000000e+00> : vector<5x16xf32>
    %661 = tpu.matmul %660, %29, %cst_300 {dimension_numbers = #tpu.dot_dimension_numbers<[1], [0], [0], [1], [0, 0, 1, 1], [], []>} : vector<5x10xf32>, vector<10x16xf32>, vector<5x16xf32> -> vector<5x16xf32>
    %662 = arith.addf %659, %661 : vector<5x16xf32>
    %663 = vector.extract_strided_slice %614 {offsets = [2, 0], sizes = [5, 10], strides = [1, 1]} : vector<7x10xf32> to vector<5x10xf32>
    %cst_301 = arith.constant dense<0.000000e+00> : vector<5x16xf32>
    %664 = tpu.matmul %663, %31, %cst_301 {dimension_numbers = #tpu.dot_dimension_numbers<[1], [0], [0], [1], [0, 0, 1, 1], [], []>} : vector<5x10xf32>, vector<10x16xf32>, vector<5x16xf32> -> vector<5x16xf32>
    %665 = arith.addf %662, %664 : vector<5x16xf32>
    %666 = vector.extract_strided_slice %616 {offsets = [0, 0], sizes = [5, 10], strides = [1, 1]} : vector<7x10xf32> to vector<5x10xf32>
    %cst_302 = arith.constant dense<0.000000e+00> : vector<5x16xf32>
    %667 = tpu.matmul %666, %33, %cst_302 {dimension_numbers = #tpu.dot_dimension_numbers<[1], [0], [0], [1], [0, 0, 1, 1], [], []>} : vector<5x10xf32>, vector<10x16xf32>, vector<5x16xf32> -> vector<5x16xf32>
    %668 = arith.addf %665, %667 : vector<5x16xf32>
    %669 = vector.extract_strided_slice %616 {offsets = [1, 0], sizes = [5, 10], strides = [1, 1]} : vector<7x10xf32> to vector<5x10xf32>
    %cst_303 = arith.constant dense<0.000000e+00> : vector<5x16xf32>
    %670 = tpu.matmul %669, %35, %cst_303 {dimension_numbers = #tpu.dot_dimension_numbers<[1], [0], [0], [1], [0, 0, 1, 1], [], []>} : vector<5x10xf32>, vector<10x16xf32>, vector<5x16xf32> -> vector<5x16xf32>
    %671 = arith.addf %668, %670 : vector<5x16xf32>
    %672 = vector.extract_strided_slice %616 {offsets = [2, 0], sizes = [5, 10], strides = [1, 1]} : vector<7x10xf32> to vector<5x10xf32>
    %cst_304 = arith.constant dense<0.000000e+00> : vector<5x16xf32>
    %673 = tpu.matmul %672, %37, %cst_304 {dimension_numbers = #tpu.dot_dimension_numbers<[1], [0], [0], [1], [0, 0, 1, 1], [], []>} : vector<5x10xf32>, vector<10x16xf32>, vector<5x16xf32> -> vector<5x16xf32>
    %674 = arith.addf %671, %673 : vector<5x16xf32>
    %675 = vector.extract_strided_slice %618 {offsets = [0, 0], sizes = [5, 10], strides = [1, 1]} : vector<7x10xf32> to vector<5x10xf32>
    %cst_305 = arith.constant dense<0.000000e+00> : vector<5x16xf32>
    %676 = tpu.matmul %675, %39, %cst_305 {dimension_numbers = #tpu.dot_dimension_numbers<[1], [0], [0], [1], [0, 0, 1, 1], [], []>} : vector<5x10xf32>, vector<10x16xf32>, vector<5x16xf32> -> vector<5x16xf32>
    %677 = arith.addf %674, %676 : vector<5x16xf32>
    %678 = vector.extract_strided_slice %618 {offsets = [1, 0], sizes = [5, 10], strides = [1, 1]} : vector<7x10xf32> to vector<5x10xf32>
    %cst_306 = arith.constant dense<0.000000e+00> : vector<5x16xf32>
    %679 = tpu.matmul %678, %41, %cst_306 {dimension_numbers = #tpu.dot_dimension_numbers<[1], [0], [0], [1], [0, 0, 1, 1], [], []>} : vector<5x10xf32>, vector<10x16xf32>, vector<5x16xf32> -> vector<5x16xf32>
    %680 = arith.addf %677, %679 : vector<5x16xf32>
    %681 = vector.extract_strided_slice %618 {offsets = [2, 0], sizes = [5, 10], strides = [1, 1]} : vector<7x10xf32> to vector<5x10xf32>
    %cst_307 = arith.constant dense<0.000000e+00> : vector<5x16xf32>
    %682 = tpu.matmul %681, %43, %cst_307 {dimension_numbers = #tpu.dot_dimension_numbers<[1], [0], [0], [1], [0, 0, 1, 1], [], []>} : vector<5x10xf32>, vector<10x16xf32>, vector<5x16xf32> -> vector<5x16xf32>
    %683 = arith.addf %680, %682 : vector<5x16xf32>
    %684 = vector.broadcast %4 : vector<1x16xf32> to vector<5x16xf32>
    %685 = arith.addf %683, %684 : vector<5x16xf32>
    %cst_308 = arith.constant 0.000000e+00 : f32
    %686 = vector.broadcast %cst_308 : f32 to vector<5x16xf32>
    %687 = arith.cmpf oge, %685, %686 : vector<5x16xf32>
    %688 = vector.broadcast %5 : vector<1x16xf32> to vector<5x16xf32>
    %689 = arith.mulf %688, %685 : vector<5x16xf32>
    %690 = arith.select %687, %685, %689 : vector<5x16xi1>, vector<5x16xf32>
    %691 = vector.extract_strided_slice %616 {offsets = [0, 0], sizes = [5, 10], strides = [1, 1]} : vector<7x10xf32> to vector<5x10xf32>
    %cst_309 = arith.constant dense<0.000000e+00> : vector<5x16xf32>
    %692 = tpu.matmul %691, %27, %cst_309 {dimension_numbers = #tpu.dot_dimension_numbers<[1], [0], [0], [1], [0, 0, 1, 1], [], []>} : vector<5x10xf32>, vector<10x16xf32>, vector<5x16xf32> -> vector<5x16xf32>
    %693 = vector.extract_strided_slice %616 {offsets = [1, 0], sizes = [5, 10], strides = [1, 1]} : vector<7x10xf32> to vector<5x10xf32>
    %cst_310 = arith.constant dense<0.000000e+00> : vector<5x16xf32>
    %694 = tpu.matmul %693, %29, %cst_310 {dimension_numbers = #tpu.dot_dimension_numbers<[1], [0], [0], [1], [0, 0, 1, 1], [], []>} : vector<5x10xf32>, vector<10x16xf32>, vector<5x16xf32> -> vector<5x16xf32>
    %695 = arith.addf %692, %694 : vector<5x16xf32>
    %696 = vector.extract_strided_slice %616 {offsets = [2, 0], sizes = [5, 10], strides = [1, 1]} : vector<7x10xf32> to vector<5x10xf32>
    %cst_311 = arith.constant dense<0.000000e+00> : vector<5x16xf32>
    %697 = tpu.matmul %696, %31, %cst_311 {dimension_numbers = #tpu.dot_dimension_numbers<[1], [0], [0], [1], [0, 0, 1, 1], [], []>} : vector<5x10xf32>, vector<10x16xf32>, vector<5x16xf32> -> vector<5x16xf32>
    %698 = arith.addf %695, %697 : vector<5x16xf32>
    %699 = vector.extract_strided_slice %618 {offsets = [0, 0], sizes = [5, 10], strides = [1, 1]} : vector<7x10xf32> to vector<5x10xf32>
    %cst_312 = arith.constant dense<0.000000e+00> : vector<5x16xf32>
    %700 = tpu.matmul %699, %33, %cst_312 {dimension_numbers = #tpu.dot_dimension_numbers<[1], [0], [0], [1], [0, 0, 1, 1], [], []>} : vector<5x10xf32>, vector<10x16xf32>, vector<5x16xf32> -> vector<5x16xf32>
    %701 = arith.addf %698, %700 : vector<5x16xf32>
    %702 = vector.extract_strided_slice %618 {offsets = [1, 0], sizes = [5, 10], strides = [1, 1]} : vector<7x10xf32> to vector<5x10xf32>
    %cst_313 = arith.constant dense<0.000000e+00> : vector<5x16xf32>
    %703 = tpu.matmul %702, %35, %cst_313 {dimension_numbers = #tpu.dot_dimension_numbers<[1], [0], [0], [1], [0, 0, 1, 1], [], []>} : vector<5x10xf32>, vector<10x16xf32>, vector<5x16xf32> -> vector<5x16xf32>
    %704 = arith.addf %701, %703 : vector<5x16xf32>
    %705 = vector.extract_strided_slice %618 {offsets = [2, 0], sizes = [5, 10], strides = [1, 1]} : vector<7x10xf32> to vector<5x10xf32>
    %cst_314 = arith.constant dense<0.000000e+00> : vector<5x16xf32>
    %706 = tpu.matmul %705, %37, %cst_314 {dimension_numbers = #tpu.dot_dimension_numbers<[1], [0], [0], [1], [0, 0, 1, 1], [], []>} : vector<5x10xf32>, vector<10x16xf32>, vector<5x16xf32> -> vector<5x16xf32>
    %707 = arith.addf %704, %706 : vector<5x16xf32>
    %708 = vector.extract_strided_slice %620 {offsets = [0, 0], sizes = [5, 10], strides = [1, 1]} : vector<7x10xf32> to vector<5x10xf32>
    %cst_315 = arith.constant dense<0.000000e+00> : vector<5x16xf32>
    %709 = tpu.matmul %708, %39, %cst_315 {dimension_numbers = #tpu.dot_dimension_numbers<[1], [0], [0], [1], [0, 0, 1, 1], [], []>} : vector<5x10xf32>, vector<10x16xf32>, vector<5x16xf32> -> vector<5x16xf32>
    %710 = arith.addf %707, %709 : vector<5x16xf32>
    %711 = vector.extract_strided_slice %620 {offsets = [1, 0], sizes = [5, 10], strides = [1, 1]} : vector<7x10xf32> to vector<5x10xf32>
    %cst_316 = arith.constant dense<0.000000e+00> : vector<5x16xf32>
    %712 = tpu.matmul %711, %41, %cst_316 {dimension_numbers = #tpu.dot_dimension_numbers<[1], [0], [0], [1], [0, 0, 1, 1], [], []>} : vector<5x10xf32>, vector<10x16xf32>, vector<5x16xf32> -> vector<5x16xf32>
    %713 = arith.addf %710, %712 : vector<5x16xf32>
    %714 = vector.extract_strided_slice %620 {offsets = [2, 0], sizes = [5, 10], strides = [1, 1]} : vector<7x10xf32> to vector<5x10xf32>
    %cst_317 = arith.constant dense<0.000000e+00> : vector<5x16xf32>
    %715 = tpu.matmul %714, %43, %cst_317 {dimension_numbers = #tpu.dot_dimension_numbers<[1], [0], [0], [1], [0, 0, 1, 1], [], []>} : vector<5x10xf32>, vector<10x16xf32>, vector<5x16xf32> -> vector<5x16xf32>
    %716 = arith.addf %713, %715 : vector<5x16xf32>
    %717 = vector.broadcast %4 : vector<1x16xf32> to vector<5x16xf32>
    %718 = arith.addf %716, %717 : vector<5x16xf32>
    %cst_318 = arith.constant 0.000000e+00 : f32
    %719 = vector.broadcast %cst_318 : f32 to vector<5x16xf32>
    %720 = arith.cmpf oge, %718, %719 : vector<5x16xf32>
    %721 = vector.broadcast %5 : vector<1x16xf32> to vector<5x16xf32>
    %722 = arith.mulf %721, %718 : vector<5x16xf32>
    %723 = arith.select %720, %718, %722 : vector<5x16xi1>, vector<5x16xf32>
    %724 = vector.extract_strided_slice %618 {offsets = [0, 0], sizes = [5, 10], strides = [1, 1]} : vector<7x10xf32> to vector<5x10xf32>
    %cst_319 = arith.constant dense<0.000000e+00> : vector<5x16xf32>
    %725 = tpu.matmul %724, %27, %cst_319 {dimension_numbers = #tpu.dot_dimension_numbers<[1], [0], [0], [1], [0, 0, 1, 1], [], []>} : vector<5x10xf32>, vector<10x16xf32>, vector<5x16xf32> -> vector<5x16xf32>
    %726 = vector.extract_strided_slice %618 {offsets = [1, 0], sizes = [5, 10], strides = [1, 1]} : vector<7x10xf32> to vector<5x10xf32>
    %cst_320 = arith.constant dense<0.000000e+00> : vector<5x16xf32>
    %727 = tpu.matmul %726, %29, %cst_320 {dimension_numbers = #tpu.dot_dimension_numbers<[1], [0], [0], [1], [0, 0, 1, 1], [], []>} : vector<5x10xf32>, vector<10x16xf32>, vector<5x16xf32> -> vector<5x16xf32>
    %728 = arith.addf %725, %727 : vector<5x16xf32>
    %729 = vector.extract_strided_slice %618 {offsets = [2, 0], sizes = [5, 10], strides = [1, 1]} : vector<7x10xf32> to vector<5x10xf32>
    %cst_321 = arith.constant dense<0.000000e+00> : vector<5x16xf32>
    %730 = tpu.matmul %729, %31, %cst_321 {dimension_numbers = #tpu.dot_dimension_numbers<[1], [0], [0], [1], [0, 0, 1, 1], [], []>} : vector<5x10xf32>, vector<10x16xf32>, vector<5x16xf32> -> vector<5x16xf32>
    %731 = arith.addf %728, %730 : vector<5x16xf32>
    %732 = vector.extract_strided_slice %620 {offsets = [0, 0], sizes = [5, 10], strides = [1, 1]} : vector<7x10xf32> to vector<5x10xf32>
    %cst_322 = arith.constant dense<0.000000e+00> : vector<5x16xf32>
    %733 = tpu.matmul %732, %33, %cst_322 {dimension_numbers = #tpu.dot_dimension_numbers<[1], [0], [0], [1], [0, 0, 1, 1], [], []>} : vector<5x10xf32>, vector<10x16xf32>, vector<5x16xf32> -> vector<5x16xf32>
    %734 = arith.addf %731, %733 : vector<5x16xf32>
    %735 = vector.extract_strided_slice %620 {offsets = [1, 0], sizes = [5, 10], strides = [1, 1]} : vector<7x10xf32> to vector<5x10xf32>
    %cst_323 = arith.constant dense<0.000000e+00> : vector<5x16xf32>
    %736 = tpu.matmul %735, %35, %cst_323 {dimension_numbers = #tpu.dot_dimension_numbers<[1], [0], [0], [1], [0, 0, 1, 1], [], []>} : vector<5x10xf32>, vector<10x16xf32>, vector<5x16xf32> -> vector<5x16xf32>
    %737 = arith.addf %734, %736 : vector<5x16xf32>
    %738 = vector.extract_strided_slice %620 {offsets = [2, 0], sizes = [5, 10], strides = [1, 1]} : vector<7x10xf32> to vector<5x10xf32>
    %cst_324 = arith.constant dense<0.000000e+00> : vector<5x16xf32>
    %739 = tpu.matmul %738, %37, %cst_324 {dimension_numbers = #tpu.dot_dimension_numbers<[1], [0], [0], [1], [0, 0, 1, 1], [], []>} : vector<5x10xf32>, vector<10x16xf32>, vector<5x16xf32> -> vector<5x16xf32>
    %740 = arith.addf %737, %739 : vector<5x16xf32>
    %741 = vector.extract_strided_slice %622 {offsets = [0, 0], sizes = [5, 10], strides = [1, 1]} : vector<7x10xf32> to vector<5x10xf32>
    %cst_325 = arith.constant dense<0.000000e+00> : vector<5x16xf32>
    %742 = tpu.matmul %741, %39, %cst_325 {dimension_numbers = #tpu.dot_dimension_numbers<[1], [0], [0], [1], [0, 0, 1, 1], [], []>} : vector<5x10xf32>, vector<10x16xf32>, vector<5x16xf32> -> vector<5x16xf32>
    %743 = arith.addf %740, %742 : vector<5x16xf32>
    %744 = vector.extract_strided_slice %622 {offsets = [1, 0], sizes = [5, 10], strides = [1, 1]} : vector<7x10xf32> to vector<5x10xf32>
    %cst_326 = arith.constant dense<0.000000e+00> : vector<5x16xf32>
    %745 = tpu.matmul %744, %41, %cst_326 {dimension_numbers = #tpu.dot_dimension_numbers<[1], [0], [0], [1], [0, 0, 1, 1], [], []>} : vector<5x10xf32>, vector<10x16xf32>, vector<5x16xf32> -> vector<5x16xf32>
    %746 = arith.addf %743, %745 : vector<5x16xf32>
    %747 = vector.extract_strided_slice %622 {offsets = [2, 0], sizes = [5, 10], strides = [1, 1]} : vector<7x10xf32> to vector<5x10xf32>
    %cst_327 = arith.constant dense<0.000000e+00> : vector<5x16xf32>
    %748 = tpu.matmul %747, %43, %cst_327 {dimension_numbers = #tpu.dot_dimension_numbers<[1], [0], [0], [1], [0, 0, 1, 1], [], []>} : vector<5x10xf32>, vector<10x16xf32>, vector<5x16xf32> -> vector<5x16xf32>
    %749 = arith.addf %746, %748 : vector<5x16xf32>
    %750 = vector.broadcast %4 : vector<1x16xf32> to vector<5x16xf32>
    %751 = arith.addf %749, %750 : vector<5x16xf32>
    %cst_328 = arith.constant 0.000000e+00 : f32
    %752 = vector.broadcast %cst_328 : f32 to vector<5x16xf32>
    %753 = arith.cmpf oge, %751, %752 : vector<5x16xf32>
    %754 = vector.broadcast %5 : vector<1x16xf32> to vector<5x16xf32>
    %755 = arith.mulf %754, %751 : vector<5x16xf32>
    %756 = arith.select %753, %751, %755 : vector<5x16xi1>, vector<5x16xf32>
    %757 = vector.extract_strided_slice %620 {offsets = [0, 0], sizes = [5, 10], strides = [1, 1]} : vector<7x10xf32> to vector<5x10xf32>
    %cst_329 = arith.constant dense<0.000000e+00> : vector<5x16xf32>
    %758 = tpu.matmul %757, %27, %cst_329 {dimension_numbers = #tpu.dot_dimension_numbers<[1], [0], [0], [1], [0, 0, 1, 1], [], []>} : vector<5x10xf32>, vector<10x16xf32>, vector<5x16xf32> -> vector<5x16xf32>
    %759 = vector.extract_strided_slice %620 {offsets = [1, 0], sizes = [5, 10], strides = [1, 1]} : vector<7x10xf32> to vector<5x10xf32>
    %cst_330 = arith.constant dense<0.000000e+00> : vector<5x16xf32>
    %760 = tpu.matmul %759, %29, %cst_330 {dimension_numbers = #tpu.dot_dimension_numbers<[1], [0], [0], [1], [0, 0, 1, 1], [], []>} : vector<5x10xf32>, vector<10x16xf32>, vector<5x16xf32> -> vector<5x16xf32>
    %761 = arith.addf %758, %760 : vector<5x16xf32>
    %762 = vector.extract_strided_slice %620 {offsets = [2, 0], sizes = [5, 10], strides = [1, 1]} : vector<7x10xf32> to vector<5x10xf32>
    %cst_331 = arith.constant dense<0.000000e+00> : vector<5x16xf32>
    %763 = tpu.matmul %762, %31, %cst_331 {dimension_numbers = #tpu.dot_dimension_numbers<[1], [0], [0], [1], [0, 0, 1, 1], [], []>} : vector<5x10xf32>, vector<10x16xf32>, vector<5x16xf32> -> vector<5x16xf32>
    %764 = arith.addf %761, %763 : vector<5x16xf32>
    %765 = vector.extract_strided_slice %622 {offsets = [0, 0], sizes = [5, 10], strides = [1, 1]} : vector<7x10xf32> to vector<5x10xf32>
    %cst_332 = arith.constant dense<0.000000e+00> : vector<5x16xf32>
    %766 = tpu.matmul %765, %33, %cst_332 {dimension_numbers = #tpu.dot_dimension_numbers<[1], [0], [0], [1], [0, 0, 1, 1], [], []>} : vector<5x10xf32>, vector<10x16xf32>, vector<5x16xf32> -> vector<5x16xf32>
    %767 = arith.addf %764, %766 : vector<5x16xf32>
    %768 = vector.extract_strided_slice %622 {offsets = [1, 0], sizes = [5, 10], strides = [1, 1]} : vector<7x10xf32> to vector<5x10xf32>
    %cst_333 = arith.constant dense<0.000000e+00> : vector<5x16xf32>
    %769 = tpu.matmul %768, %35, %cst_333 {dimension_numbers = #tpu.dot_dimension_numbers<[1], [0], [0], [1], [0, 0, 1, 1], [], []>} : vector<5x10xf32>, vector<10x16xf32>, vector<5x16xf32> -> vector<5x16xf32>
    %770 = arith.addf %767, %769 : vector<5x16xf32>
    %771 = vector.extract_strided_slice %622 {offsets = [2, 0], sizes = [5, 10], strides = [1, 1]} : vector<7x10xf32> to vector<5x10xf32>
    %cst_334 = arith.constant dense<0.000000e+00> : vector<5x16xf32>
    %772 = tpu.matmul %771, %37, %cst_334 {dimension_numbers = #tpu.dot_dimension_numbers<[1], [0], [0], [1], [0, 0, 1, 1], [], []>} : vector<5x10xf32>, vector<10x16xf32>, vector<5x16xf32> -> vector<5x16xf32>
    %773 = arith.addf %770, %772 : vector<5x16xf32>
    %774 = vector.extract_strided_slice %624 {offsets = [0, 0], sizes = [5, 10], strides = [1, 1]} : vector<7x10xf32> to vector<5x10xf32>
    %cst_335 = arith.constant dense<0.000000e+00> : vector<5x16xf32>
    %775 = tpu.matmul %774, %39, %cst_335 {dimension_numbers = #tpu.dot_dimension_numbers<[1], [0], [0], [1], [0, 0, 1, 1], [], []>} : vector<5x10xf32>, vector<10x16xf32>, vector<5x16xf32> -> vector<5x16xf32>
    %776 = arith.addf %773, %775 : vector<5x16xf32>
    %777 = vector.extract_strided_slice %624 {offsets = [1, 0], sizes = [5, 10], strides = [1, 1]} : vector<7x10xf32> to vector<5x10xf32>
    %cst_336 = arith.constant dense<0.000000e+00> : vector<5x16xf32>
    %778 = tpu.matmul %777, %41, %cst_336 {dimension_numbers = #tpu.dot_dimension_numbers<[1], [0], [0], [1], [0, 0, 1, 1], [], []>} : vector<5x10xf32>, vector<10x16xf32>, vector<5x16xf32> -> vector<5x16xf32>
    %779 = arith.addf %776, %778 : vector<5x16xf32>
    %780 = vector.extract_strided_slice %624 {offsets = [2, 0], sizes = [5, 10], strides = [1, 1]} : vector<7x10xf32> to vector<5x10xf32>
    %cst_337 = arith.constant dense<0.000000e+00> : vector<5x16xf32>
    %781 = tpu.matmul %780, %43, %cst_337 {dimension_numbers = #tpu.dot_dimension_numbers<[1], [0], [0], [1], [0, 0, 1, 1], [], []>} : vector<5x10xf32>, vector<10x16xf32>, vector<5x16xf32> -> vector<5x16xf32>
    %782 = arith.addf %779, %781 : vector<5x16xf32>
    %783 = vector.broadcast %4 : vector<1x16xf32> to vector<5x16xf32>
    %784 = arith.addf %782, %783 : vector<5x16xf32>
    %cst_338 = arith.constant 0.000000e+00 : f32
    %785 = vector.broadcast %cst_338 : f32 to vector<5x16xf32>
    %786 = arith.cmpf oge, %784, %785 : vector<5x16xf32>
    %787 = vector.broadcast %5 : vector<1x16xf32> to vector<5x16xf32>
    %788 = arith.mulf %787, %784 : vector<5x16xf32>
    %789 = arith.select %786, %784, %788 : vector<5x16xi1>, vector<5x16xf32>
    %790 = vector.extract_strided_slice %657 {offsets = [0, 0], sizes = [3, 16], strides = [1, 1]} : vector<5x16xf32> to vector<3x16xf32>
    %cst_339 = arith.constant dense<0.000000e+00> : vector<3x32xf32>
    %791 = tpu.matmul %790, %45, %cst_339 {dimension_numbers = #tpu.dot_dimension_numbers<[1], [0], [0], [1], [0, 0, 1, 1], [], []>} : vector<3x16xf32>, vector<16x32xf32>, vector<3x32xf32> -> vector<3x32xf32>
    %792 = vector.extract_strided_slice %657 {offsets = [1, 0], sizes = [3, 16], strides = [1, 1]} : vector<5x16xf32> to vector<3x16xf32>
    %cst_340 = arith.constant dense<0.000000e+00> : vector<3x32xf32>
    %793 = tpu.matmul %792, %47, %cst_340 {dimension_numbers = #tpu.dot_dimension_numbers<[1], [0], [0], [1], [0, 0, 1, 1], [], []>} : vector<3x16xf32>, vector<16x32xf32>, vector<3x32xf32> -> vector<3x32xf32>
    %794 = arith.addf %791, %793 : vector<3x32xf32>
    %795 = vector.extract_strided_slice %657 {offsets = [2, 0], sizes = [3, 16], strides = [1, 1]} : vector<5x16xf32> to vector<3x16xf32>
    %cst_341 = arith.constant dense<0.000000e+00> : vector<3x32xf32>
    %796 = tpu.matmul %795, %49, %cst_341 {dimension_numbers = #tpu.dot_dimension_numbers<[1], [0], [0], [1], [0, 0, 1, 1], [], []>} : vector<3x16xf32>, vector<16x32xf32>, vector<3x32xf32> -> vector<3x32xf32>
    %797 = arith.addf %794, %796 : vector<3x32xf32>
    %798 = vector.extract_strided_slice %690 {offsets = [0, 0], sizes = [3, 16], strides = [1, 1]} : vector<5x16xf32> to vector<3x16xf32>
    %cst_342 = arith.constant dense<0.000000e+00> : vector<3x32xf32>
    %799 = tpu.matmul %798, %51, %cst_342 {dimension_numbers = #tpu.dot_dimension_numbers<[1], [0], [0], [1], [0, 0, 1, 1], [], []>} : vector<3x16xf32>, vector<16x32xf32>, vector<3x32xf32> -> vector<3x32xf32>
    %800 = arith.addf %797, %799 : vector<3x32xf32>
    %801 = vector.extract_strided_slice %690 {offsets = [1, 0], sizes = [3, 16], strides = [1, 1]} : vector<5x16xf32> to vector<3x16xf32>
    %cst_343 = arith.constant dense<0.000000e+00> : vector<3x32xf32>
    %802 = tpu.matmul %801, %53, %cst_343 {dimension_numbers = #tpu.dot_dimension_numbers<[1], [0], [0], [1], [0, 0, 1, 1], [], []>} : vector<3x16xf32>, vector<16x32xf32>, vector<3x32xf32> -> vector<3x32xf32>
    %803 = arith.addf %800, %802 : vector<3x32xf32>
    %804 = vector.extract_strided_slice %690 {offsets = [2, 0], sizes = [3, 16], strides = [1, 1]} : vector<5x16xf32> to vector<3x16xf32>
    %cst_344 = arith.constant dense<0.000000e+00> : vector<3x32xf32>
    %805 = tpu.matmul %804, %55, %cst_344 {dimension_numbers = #tpu.dot_dimension_numbers<[1], [0], [0], [1], [0, 0, 1, 1], [], []>} : vector<3x16xf32>, vector<16x32xf32>, vector<3x32xf32> -> vector<3x32xf32>
    %806 = arith.addf %803, %805 : vector<3x32xf32>
    %807 = vector.extract_strided_slice %723 {offsets = [0, 0], sizes = [3, 16], strides = [1, 1]} : vector<5x16xf32> to vector<3x16xf32>
    %cst_345 = arith.constant dense<0.000000e+00> : vector<3x32xf32>
    %808 = tpu.matmul %807, %57, %cst_345 {dimension_numbers = #tpu.dot_dimension_numbers<[1], [0], [0], [1], [0, 0, 1, 1], [], []>} : vector<3x16xf32>, vector<16x32xf32>, vector<3x32xf32> -> vector<3x32xf32>
    %809 = arith.addf %806, %808 : vector<3x32xf32>
    %810 = vector.extract_strided_slice %723 {offsets = [1, 0], sizes = [3, 16], strides = [1, 1]} : vector<5x16xf32> to vector<3x16xf32>
    %cst_346 = arith.constant dense<0.000000e+00> : vector<3x32xf32>
    %811 = tpu.matmul %810, %59, %cst_346 {dimension_numbers = #tpu.dot_dimension_numbers<[1], [0], [0], [1], [0, 0, 1, 1], [], []>} : vector<3x16xf32>, vector<16x32xf32>, vector<3x32xf32> -> vector<3x32xf32>
    %812 = arith.addf %809, %811 : vector<3x32xf32>
    %813 = vector.extract_strided_slice %723 {offsets = [2, 0], sizes = [3, 16], strides = [1, 1]} : vector<5x16xf32> to vector<3x16xf32>
    %cst_347 = arith.constant dense<0.000000e+00> : vector<3x32xf32>
    %814 = tpu.matmul %813, %61, %cst_347 {dimension_numbers = #tpu.dot_dimension_numbers<[1], [0], [0], [1], [0, 0, 1, 1], [], []>} : vector<3x16xf32>, vector<16x32xf32>, vector<3x32xf32> -> vector<3x32xf32>
    %815 = arith.addf %812, %814 : vector<3x32xf32>
    %816 = vector.broadcast %6 : vector<1x32xf32> to vector<3x32xf32>
    %817 = arith.addf %815, %816 : vector<3x32xf32>
    %cst_348 = arith.constant 0.000000e+00 : f32
    %818 = vector.broadcast %cst_348 : f32 to vector<3x32xf32>
    %819 = arith.cmpf oge, %817, %818 : vector<3x32xf32>
    %820 = vector.broadcast %7 : vector<1x32xf32> to vector<3x32xf32>
    %821 = arith.mulf %820, %817 : vector<3x32xf32>
    %822 = arith.select %819, %817, %821 : vector<3x32xi1>, vector<3x32xf32>
    %823 = vector.extract_strided_slice %690 {offsets = [0, 0], sizes = [3, 16], strides = [1, 1]} : vector<5x16xf32> to vector<3x16xf32>
    %cst_349 = arith.constant dense<0.000000e+00> : vector<3x32xf32>
    %824 = tpu.matmul %823, %45, %cst_349 {dimension_numbers = #tpu.dot_dimension_numbers<[1], [0], [0], [1], [0, 0, 1, 1], [], []>} : vector<3x16xf32>, vector<16x32xf32>, vector<3x32xf32> -> vector<3x32xf32>
    %825 = vector.extract_strided_slice %690 {offsets = [1, 0], sizes = [3, 16], strides = [1, 1]} : vector<5x16xf32> to vector<3x16xf32>
    %cst_350 = arith.constant dense<0.000000e+00> : vector<3x32xf32>
    %826 = tpu.matmul %825, %47, %cst_350 {dimension_numbers = #tpu.dot_dimension_numbers<[1], [0], [0], [1], [0, 0, 1, 1], [], []>} : vector<3x16xf32>, vector<16x32xf32>, vector<3x32xf32> -> vector<3x32xf32>
    %827 = arith.addf %824, %826 : vector<3x32xf32>
    %828 = vector.extract_strided_slice %690 {offsets = [2, 0], sizes = [3, 16], strides = [1, 1]} : vector<5x16xf32> to vector<3x16xf32>
    %cst_351 = arith.constant dense<0.000000e+00> : vector<3x32xf32>
    %829 = tpu.matmul %828, %49, %cst_351 {dimension_numbers = #tpu.dot_dimension_numbers<[1], [0], [0], [1], [0, 0, 1, 1], [], []>} : vector<3x16xf32>, vector<16x32xf32>, vector<3x32xf32> -> vector<3x32xf32>
    %830 = arith.addf %827, %829 : vector<3x32xf32>
    %831 = vector.extract_strided_slice %723 {offsets = [0, 0], sizes = [3, 16], strides = [1, 1]} : vector<5x16xf32> to vector<3x16xf32>
    %cst_352 = arith.constant dense<0.000000e+00> : vector<3x32xf32>
    %832 = tpu.matmul %831, %51, %cst_352 {dimension_numbers = #tpu.dot_dimension_numbers<[1], [0], [0], [1], [0, 0, 1, 1], [], []>} : vector<3x16xf32>, vector<16x32xf32>, vector<3x32xf32> -> vector<3x32xf32>
    %833 = arith.addf %830, %832 : vector<3x32xf32>
    %834 = vector.extract_strided_slice %723 {offsets = [1, 0], sizes = [3, 16], strides = [1, 1]} : vector<5x16xf32> to vector<3x16xf32>
    %cst_353 = arith.constant dense<0.000000e+00> : vector<3x32xf32>
    %835 = tpu.matmul %834, %53, %cst_353 {dimension_numbers = #tpu.dot_dimension_numbers<[1], [0], [0], [1], [0, 0, 1, 1], [], []>} : vector<3x16xf32>, vector<16x32xf32>, vector<3x32xf32> -> vector<3x32xf32>
    %836 = arith.addf %833, %835 : vector<3x32xf32>
    %837 = vector.extract_strided_slice %723 {offsets = [2, 0], sizes = [3, 16], strides = [1, 1]} : vector<5x16xf32> to vector<3x16xf32>
    %cst_354 = arith.constant dense<0.000000e+00> : vector<3x32xf32>
    %838 = tpu.matmul %837, %55, %cst_354 {dimension_numbers = #tpu.dot_dimension_numbers<[1], [0], [0], [1], [0, 0, 1, 1], [], []>} : vector<3x16xf32>, vector<16x32xf32>, vector<3x32xf32> -> vector<3x32xf32>
    %839 = arith.addf %836, %838 : vector<3x32xf32>
    %840 = vector.extract_strided_slice %756 {offsets = [0, 0], sizes = [3, 16], strides = [1, 1]} : vector<5x16xf32> to vector<3x16xf32>
    %cst_355 = arith.constant dense<0.000000e+00> : vector<3x32xf32>
    %841 = tpu.matmul %840, %57, %cst_355 {dimension_numbers = #tpu.dot_dimension_numbers<[1], [0], [0], [1], [0, 0, 1, 1], [], []>} : vector<3x16xf32>, vector<16x32xf32>, vector<3x32xf32> -> vector<3x32xf32>
    %842 = arith.addf %839, %841 : vector<3x32xf32>
    %843 = vector.extract_strided_slice %756 {offsets = [1, 0], sizes = [3, 16], strides = [1, 1]} : vector<5x16xf32> to vector<3x16xf32>
    %cst_356 = arith.constant dense<0.000000e+00> : vector<3x32xf32>
    %844 = tpu.matmul %843, %59, %cst_356 {dimension_numbers = #tpu.dot_dimension_numbers<[1], [0], [0], [1], [0, 0, 1, 1], [], []>} : vector<3x16xf32>, vector<16x32xf32>, vector<3x32xf32> -> vector<3x32xf32>
    %845 = arith.addf %842, %844 : vector<3x32xf32>
    %846 = vector.extract_strided_slice %756 {offsets = [2, 0], sizes = [3, 16], strides = [1, 1]} : vector<5x16xf32> to vector<3x16xf32>
    %cst_357 = arith.constant dense<0.000000e+00> : vector<3x32xf32>
    %847 = tpu.matmul %846, %61, %cst_357 {dimension_numbers = #tpu.dot_dimension_numbers<[1], [0], [0], [1], [0, 0, 1, 1], [], []>} : vector<3x16xf32>, vector<16x32xf32>, vector<3x32xf32> -> vector<3x32xf32>
    %848 = arith.addf %845, %847 : vector<3x32xf32>
    %849 = vector.broadcast %6 : vector<1x32xf32> to vector<3x32xf32>
    %850 = arith.addf %848, %849 : vector<3x32xf32>
    %cst_358 = arith.constant 0.000000e+00 : f32
    %851 = vector.broadcast %cst_358 : f32 to vector<3x32xf32>
    %852 = arith.cmpf oge, %850, %851 : vector<3x32xf32>
    %853 = vector.broadcast %7 : vector<1x32xf32> to vector<3x32xf32>
    %854 = arith.mulf %853, %850 : vector<3x32xf32>
    %855 = arith.select %852, %850, %854 : vector<3x32xi1>, vector<3x32xf32>
    %856 = vector.extract_strided_slice %723 {offsets = [0, 0], sizes = [3, 16], strides = [1, 1]} : vector<5x16xf32> to vector<3x16xf32>
    %cst_359 = arith.constant dense<0.000000e+00> : vector<3x32xf32>
    %857 = tpu.matmul %856, %45, %cst_359 {dimension_numbers = #tpu.dot_dimension_numbers<[1], [0], [0], [1], [0, 0, 1, 1], [], []>} : vector<3x16xf32>, vector<16x32xf32>, vector<3x32xf32> -> vector<3x32xf32>
    %858 = vector.extract_strided_slice %723 {offsets = [1, 0], sizes = [3, 16], strides = [1, 1]} : vector<5x16xf32> to vector<3x16xf32>
    %cst_360 = arith.constant dense<0.000000e+00> : vector<3x32xf32>
    %859 = tpu.matmul %858, %47, %cst_360 {dimension_numbers = #tpu.dot_dimension_numbers<[1], [0], [0], [1], [0, 0, 1, 1], [], []>} : vector<3x16xf32>, vector<16x32xf32>, vector<3x32xf32> -> vector<3x32xf32>
    %860 = arith.addf %857, %859 : vector<3x32xf32>
    %861 = vector.extract_strided_slice %723 {offsets = [2, 0], sizes = [3, 16], strides = [1, 1]} : vector<5x16xf32> to vector<3x16xf32>
    %cst_361 = arith.constant dense<0.000000e+00> : vector<3x32xf32>
    %862 = tpu.matmul %861, %49, %cst_361 {dimension_numbers = #tpu.dot_dimension_numbers<[1], [0], [0], [1], [0, 0, 1, 1], [], []>} : vector<3x16xf32>, vector<16x32xf32>, vector<3x32xf32> -> vector<3x32xf32>
    %863 = arith.addf %860, %862 : vector<3x32xf32>
    %864 = vector.extract_strided_slice %756 {offsets = [0, 0], sizes = [3, 16], strides = [1, 1]} : vector<5x16xf32> to vector<3x16xf32>
    %cst_362 = arith.constant dense<0.000000e+00> : vector<3x32xf32>
    %865 = tpu.matmul %864, %51, %cst_362 {dimension_numbers = #tpu.dot_dimension_numbers<[1], [0], [0], [1], [0, 0, 1, 1], [], []>} : vector<3x16xf32>, vector<16x32xf32>, vector<3x32xf32> -> vector<3x32xf32>
    %866 = arith.addf %863, %865 : vector<3x32xf32>
    %867 = vector.extract_strided_slice %756 {offsets = [1, 0], sizes = [3, 16], strides = [1, 1]} : vector<5x16xf32> to vector<3x16xf32>
    %cst_363 = arith.constant dense<0.000000e+00> : vector<3x32xf32>
    %868 = tpu.matmul %867, %53, %cst_363 {dimension_numbers = #tpu.dot_dimension_numbers<[1], [0], [0], [1], [0, 0, 1, 1], [], []>} : vector<3x16xf32>, vector<16x32xf32>, vector<3x32xf32> -> vector<3x32xf32>
    %869 = arith.addf %866, %868 : vector<3x32xf32>
    %870 = vector.extract_strided_slice %756 {offsets = [2, 0], sizes = [3, 16], strides = [1, 1]} : vector<5x16xf32> to vector<3x16xf32>
    %cst_364 = arith.constant dense<0.000000e+00> : vector<3x32xf32>
    %871 = tpu.matmul %870, %55, %cst_364 {dimension_numbers = #tpu.dot_dimension_numbers<[1], [0], [0], [1], [0, 0, 1, 1], [], []>} : vector<3x16xf32>, vector<16x32xf32>, vector<3x32xf32> -> vector<3x32xf32>
    %872 = arith.addf %869, %871 : vector<3x32xf32>
    %873 = vector.extract_strided_slice %789 {offsets = [0, 0], sizes = [3, 16], strides = [1, 1]} : vector<5x16xf32> to vector<3x16xf32>
    %cst_365 = arith.constant dense<0.000000e+00> : vector<3x32xf32>
    %874 = tpu.matmul %873, %57, %cst_365 {dimension_numbers = #tpu.dot_dimension_numbers<[1], [0], [0], [1], [0, 0, 1, 1], [], []>} : vector<3x16xf32>, vector<16x32xf32>, vector<3x32xf32> -> vector<3x32xf32>
    %875 = arith.addf %872, %874 : vector<3x32xf32>
    %876 = vector.extract_strided_slice %789 {offsets = [1, 0], sizes = [3, 16], strides = [1, 1]} : vector<5x16xf32> to vector<3x16xf32>
    %cst_366 = arith.constant dense<0.000000e+00> : vector<3x32xf32>
    %877 = tpu.matmul %876, %59, %cst_366 {dimension_numbers = #tpu.dot_dimension_numbers<[1], [0], [0], [1], [0, 0, 1, 1], [], []>} : vector<3x16xf32>, vector<16x32xf32>, vector<3x32xf32> -> vector<3x32xf32>
    %878 = arith.addf %875, %877 : vector<3x32xf32>
    %879 = vector.extract_strided_slice %789 {offsets = [2, 0], sizes = [3, 16], strides = [1, 1]} : vector<5x16xf32> to vector<3x16xf32>
    %cst_367 = arith.constant dense<0.000000e+00> : vector<3x32xf32>
    %880 = tpu.matmul %879, %61, %cst_367 {dimension_numbers = #tpu.dot_dimension_numbers<[1], [0], [0], [1], [0, 0, 1, 1], [], []>} : vector<3x16xf32>, vector<16x32xf32>, vector<3x32xf32> -> vector<3x32xf32>
    %881 = arith.addf %878, %880 : vector<3x32xf32>
    %882 = vector.broadcast %6 : vector<1x32xf32> to vector<3x32xf32>
    %883 = arith.addf %881, %882 : vector<3x32xf32>
    %cst_368 = arith.constant 0.000000e+00 : f32
    %884 = vector.broadcast %cst_368 : f32 to vector<3x32xf32>
    %885 = arith.cmpf oge, %883, %884 : vector<3x32xf32>
    %886 = vector.broadcast %7 : vector<1x32xf32> to vector<3x32xf32>
    %887 = arith.mulf %886, %883 : vector<3x32xf32>
    %888 = arith.select %885, %883, %887 : vector<3x32xi1>, vector<3x32xf32>
    %c0_369 = arith.constant 0 : index
    %c0_370 = arith.constant 0 : index
    %889 = vector.load %arg11[%c0_369, %c0_370] : memref<32x128xf32, #tpu.memory_space<vmem>>, vector<32x128xf32>
    %c0_371 = arith.constant 0 : index
    %c0_372 = arith.constant 0 : index
    %890 = vector.load %arg12[%c0_371, %c0_372] : memref<1x128xf32, #tpu.memory_space<vmem>>, vector<1x128xf32>
    %891 = tpu.iota {dimensions = array<i32: 1>} : vector<3x128xi32>
    %cst_373 = arith.constant dense<0.000000e+00> : vector<3x128xf32>
    %892 = tpu.matmul %822, %889, %cst_373 {dimension_numbers = #tpu.dot_dimension_numbers<[1], [0], [0], [1], [0, 0, 1, 1], [], []>} : vector<3x32xf32>, vector<32x128xf32>, vector<3x128xf32> -> vector<3x128xf32>
    %893 = vector.broadcast %890 : vector<1x128xf32> to vector<3x128xf32>
    %894 = arith.addf %892, %893 : vector<3x128xf32>
    %cst_374 = arith.constant 0.000000e+00 : f32
    %895 = vector.broadcast %cst_374 : f32 to vector<3x128xf32>
    %896 = arith.subf %895, %894 : vector<3x128xf32>
    %897 = math.exp %896 : vector<3x128xf32>
    %cst_375 = arith.constant 1.000000e+00 : f32
    %898 = vector.broadcast %cst_375 : f32 to vector<3x128xf32>
    %899 = arith.addf %898, %897 : vector<3x128xf32>
    %cst_376 = arith.constant 1.000000e+00 : f32
    %900 = vector.broadcast %cst_376 : f32 to vector<3x128xf32>
    %901 = arith.divf %900, %899 : vector<3x128xf32>
    %c0_i32 = arith.constant 0 : i32
    %902 = vector.broadcast %c0_i32 : i32 to vector<3x128xi32>
    %903 = arith.cmpi eq, %891, %902 : vector<3x128xi32>
    %904 = arith.select %903, %901, %894 : vector<3x128xi1>, vector<3x128xf32>
    %c0_377 = arith.constant 0 : index
    %c0_378 = arith.constant 0 : index
    %c0_379 = arith.constant 0 : index
    %905 = vector.load %arg13[%c0_377, %c0_378, %c0_379] : memref<1x9x128xf32, #tpu.memory_space<vmem>>, vector<1x3x128xf32>
    %906 = vector.shape_cast %905 : vector<1x3x128xf32> to vector<3x128xf32>
    %907 = vector.shape_cast %904 : vector<3x128xf32> to vector<1x3x128xf32>
    tpu.vector_store %arg13[%c0_377, %c0_378, %c0_379], %907 {strides = array<i32>} : memref<1x9x128xf32, #tpu.memory_space<vmem>>, vector<1x3x128xf32>,
    %cst_380 = arith.constant dense<0.000000e+00> : vector<3x128xf32>
    %908 = tpu.matmul %855, %889, %cst_380 {dimension_numbers = #tpu.dot_dimension_numbers<[1], [0], [0], [1], [0, 0, 1, 1], [], []>} : vector<3x32xf32>, vector<32x128xf32>, vector<3x128xf32> -> vector<3x128xf32>
    %909 = vector.broadcast %890 : vector<1x128xf32> to vector<3x128xf32>
    %910 = arith.addf %908, %909 : vector<3x128xf32>
    %cst_381 = arith.constant 0.000000e+00 : f32
    %911 = vector.broadcast %cst_381 : f32 to vector<3x128xf32>
    %912 = arith.subf %911, %910 : vector<3x128xf32>
    %913 = math.exp %912 : vector<3x128xf32>
    %cst_382 = arith.constant 1.000000e+00 : f32
    %914 = vector.broadcast %cst_382 : f32 to vector<3x128xf32>
    %915 = arith.addf %914, %913 : vector<3x128xf32>
    %cst_383 = arith.constant 1.000000e+00 : f32
    %916 = vector.broadcast %cst_383 : f32 to vector<3x128xf32>
    %917 = arith.divf %916, %915 : vector<3x128xf32>
    %c0_i32_384 = arith.constant 0 : i32
    %918 = vector.broadcast %c0_i32_384 : i32 to vector<3x128xi32>
    %919 = arith.cmpi eq, %891, %918 : vector<3x128xi32>
    %920 = arith.select %919, %917, %910 : vector<3x128xi1>, vector<3x128xf32>
    %c0_385 = arith.constant 0 : index
    %c3_386 = arith.constant 3 : index
    %c0_387 = arith.constant 0 : index
    %921 = vector.load %arg13[%c0_385, %c3_386, %c0_387] : memref<1x9x128xf32, #tpu.memory_space<vmem>>, vector<1x3x128xf32>
    %922 = vector.shape_cast %921 : vector<1x3x128xf32> to vector<3x128xf32>
    %923 = vector.shape_cast %920 : vector<3x128xf32> to vector<1x3x128xf32>
    tpu.vector_store %arg13[%c0_385, %c3_386, %c0_387], %923 {strides = array<i32>} : memref<1x9x128xf32, #tpu.memory_space<vmem>>, vector<1x3x128xf32>,
    %cst_388 = arith.constant dense<0.000000e+00> : vector<3x128xf32>
    %924 = tpu.matmul %888, %889, %cst_388 {dimension_numbers = #tpu.dot_dimension_numbers<[1], [0], [0], [1], [0, 0, 1, 1], [], []>} : vector<3x32xf32>, vector<32x128xf32>, vector<3x128xf32> -> vector<3x128xf32>
    %925 = vector.broadcast %890 : vector<1x128xf32> to vector<3x128xf32>
    %926 = arith.addf %924, %925 : vector<3x128xf32>
    %cst_389 = arith.constant 0.000000e+00 : f32
    %927 = vector.broadcast %cst_389 : f32 to vector<3x128xf32>
    %928 = arith.subf %927, %926 : vector<3x128xf32>
    %929 = math.exp %928 : vector<3x128xf32>
    %cst_390 = arith.constant 1.000000e+00 : f32
    %930 = vector.broadcast %cst_390 : f32 to vector<3x128xf32>
    %931 = arith.addf %930, %929 : vector<3x128xf32>
    %cst_391 = arith.constant 1.000000e+00 : f32
    %932 = vector.broadcast %cst_391 : f32 to vector<3x128xf32>
    %933 = arith.divf %932, %931 : vector<3x128xf32>
    %c0_i32_392 = arith.constant 0 : i32
    %934 = vector.broadcast %c0_i32_392 : i32 to vector<3x128xi32>
    %935 = arith.cmpi eq, %891, %934 : vector<3x128xi32>
    %936 = arith.select %935, %933, %926 : vector<3x128xi1>, vector<3x128xf32>
    %c0_393 = arith.constant 0 : index
    %c6_394 = arith.constant 6 : index
    %c0_395 = arith.constant 0 : index
    %937 = vector.load %arg13[%c0_393, %c6_394, %c0_395] : memref<1x9x128xf32, #tpu.memory_space<vmem>>, vector<1x3x128xf32>
    %938 = vector.shape_cast %937 : vector<1x3x128xf32> to vector<3x128xf32>
    %939 = vector.shape_cast %936 : vector<3x128xf32> to vector<1x3x128xf32>
    tpu.vector_store %arg13[%c0_393, %c6_394, %c0_395], %939 {strides = array<i32>} : memref<1x9x128xf32, #tpu.memory_space<vmem>>, vector<1x3x128xf32>,
    return
  }
  func.func @transform_0(%arg0: i32) -> (i32, i32, i32, i32) {
    %c0_i32 = arith.constant 0 : i32
    %c0_i32_0 = arith.constant 0 : i32
    %c0_i32_1 = arith.constant 0 : i32
    %c0_i32_2 = arith.constant 0 : i32
    return %arg0, %c0_i32, %c0_i32_0, %c0_i32_1 : i32, i32, i32, i32
  }
  func.func @transform_1(%arg0: i32) -> (i32, i32, i32) {
    %c0_i32 = arith.constant 0 : i32
    %c0_i32_0 = arith.constant 0 : i32
    %c0_i32_1 = arith.constant 0 : i32
    %c0_i32_2 = arith.constant 0 : i32
    return %c0_i32, %c0_i32_0, %c0_i32_1 : i32, i32, i32
  }
  func.func @transform_2(%arg0: i32) -> (i32, i32) {
    %c0_i32 = arith.constant 0 : i32
    %c0_i32_0 = arith.constant 0 : i32
    %c0_i32_1 = arith.constant 0 : i32
    return %c0_i32, %c0_i32_0 : i32, i32
  }
  func.func @transform_3(%arg0: i32) -> (i32, i32) {
    %c0_i32 = arith.constant 0 : i32
    %c0_i32_0 = arith.constant 0 : i32
    %c0_i32_1 = arith.constant 0 : i32
    return %c0_i32, %c0_i32_0 : i32, i32
  }
  func.func @transform_4(%arg0: i32) -> (i32, i32, i32) {
    %c0_i32 = arith.constant 0 : i32
    %c0_i32_0 = arith.constant 0 : i32
    %c0_i32_1 = arith.constant 0 : i32
    %c0_i32_2 = arith.constant 0 : i32
    return %c0_i32, %c0_i32_0, %c0_i32_1 : i32, i32, i32
  }
  func.func @transform_5(%arg0: i32) -> (i32, i32) {
    %c0_i32 = arith.constant 0 : i32
    %c0_i32_0 = arith.constant 0 : i32
    %c0_i32_1 = arith.constant 0 : i32
    return %c0_i32, %c0_i32_0 : i32, i32
  }
  func.func @transform_6(%arg0: i32) -> (i32, i32) {
    %c0_i32 = arith.constant 0 : i32
    %c0_i32_0 = arith.constant 0 : i32
    %c0_i32_1 = arith.constant 0 : i32
    return %c0_i32, %c0_i32_0 : i32, i32
  }
  func.func @transform_7(%arg0: i32) -> (i32, i32, i32) {
    %c0_i32 = arith.constant 0 : i32
    %c0_i32_0 = arith.constant 0 : i32
    %c0_i32_1 = arith.constant 0 : i32
    %c0_i32_2 = arith.constant 0 : i32
    return %c0_i32, %c0_i32_0, %c0_i32_1 : i32, i32, i32
  }
  func.func @transform_8(%arg0: i32) -> (i32, i32) {
    %c0_i32 = arith.constant 0 : i32
    %c0_i32_0 = arith.constant 0 : i32
    %c0_i32_1 = arith.constant 0 : i32
    return %c0_i32, %c0_i32_0 : i32, i32
  }
  func.func @transform_9(%arg0: i32) -> (i32, i32) {
    %c0_i32 = arith.constant 0 : i32
    %c0_i32_0 = arith.constant 0 : i32
    %c0_i32_1 = arith.constant 0 : i32
    return %c0_i32, %c0_i32_0 : i32, i32
  }
  func.func @transform_10(%arg0: i32) -> (i32, i32) {
    %c0_i32 = arith.constant 0 : i32
    %c0_i32_0 = arith.constant 0 : i32
    %c0_i32_1 = arith.constant 0 : i32
    return %c0_i32, %c0_i32_0 : i32, i32
  }
  func.func @transform_11(%arg0: i32) -> (i32, i32) {
    %c0_i32 = arith.constant 0 : i32
    %c0_i32_0 = arith.constant 0 : i32
    %c0_i32_1 = arith.constant 0 : i32
    return %c0_i32, %c0_i32_0 : i32, i32
  }
  func.func @transform_12(%arg0: i32) -> (i32, i32, i32) {
    %c0_i32 = arith.constant 0 : i32
    %c0_i32_0 = arith.constant 0 : i32
    %c0_i32_1 = arith.constant 0 : i32
    return %arg0, %c0_i32, %c0_i32_0 : i32, i32, i32
  }
}

</mosaic_0001>

<bundles_post_ra>
// kernel: pnet_forward.1
= control target key start
LH: loop header
LB: loop body
LE: loop exit
PB: predicated region body
PF: predicated region fallthrough
CT: control target
= control target key end

     0   :  { %s19408_s21 = smov 0   ;;  %s21473_s0 = inlined_call_operand.vmem [shape: f32[2,16,16,3], index: 0, kind: input, shape index: {}]   ;;  %s21474_s1 = inlined_call_operand.vmem [shape: f32[9,3,10], index: 1, kind: input, shape index: {}]   ;;  %s21475_s2 = inlined_call_operand.vmem [shape: f32[1,10], index: 2, kind: input, shape index: {}]   ;;  %s21476_s3 = inlined_call_operand.vmem [shape: f32[1,10], index: 3, kind: input, shape index: {}]   ;;  %s21477_s4 = inlined_call_operand.vmem [shape: f32[9,10,16], index: 4, kind: input, shape index: {}]   ;;  %s21478_s5 = inlined_call_operand.vmem [shape: f32[1,16], index: 5, kind: input, shape index: {}]   ;;  %s21479_s6 = inlined_call_operand.vmem [shape: f32[1,16], index: 6, kind: input, shape index: {}]   ;;  %s21480_s7 = inlined_call_operand.vmem [shape: f32[9,16,32], index: 7, kind: input, shape index: {}]   ;;  %s21481_s8 = inlined_call_operand.vmem [shape: f32[1,32], index: 8, kind: input, shape index: {}]   ;;  %s21482_s9 = inlined_call_operand.vmem [shape: f32[1,32], index: 9, kind: input, shape index: {}]   ;;  %s21483_s10 = inlined_call_operand.vmem [shape: f32[32,128], index: 10, kind: input, shape index: {}]   ;;  %s21484_s11 = inlined_call_operand.vmem [shape: f32[1,128], index: 11, kind: input, shape index: {}]   ;;  %s21485_s12 = inlined_call_operand.vmem [shape: f32[2,9,128], index: 12, kind: output, shape index: {}]  }
   0x1 LB: > { %s16457_s22 = sadd.s32 4294967295, %s19336_s21   ;;  %p16461_p0 = scmp.ge.s32.totalorder %s19336_s21, 1  ;;  %s19336_s21 = sphi %s19408_s21, %s22_s21  }
   0x2   : > { %p362_p1 = scmp.lt.s32.totalorder %s19336_s21, 3 }
   0x4   : > { %p363_p2 = pnand %p16461_p0, %p362_p1 }
   0x5   : > { %v19419_v0 = vld [vmem:[%s21474_s1] sm:$0x7] (!%p363_p2)  ;;  %vm564_vm0 = vcmask (!%p363_p2), 1042432   ;;  %p404_p3 = scmp.lt.s32.totalorder (!%p363_p2), %s16457_s22, 1  ;;  %v19426_v1 = vld [vmem:[%s21474_s1 + $0x8] sm:$0x7] (!%p363_p2) }
   0x6   : > { %366 = sbr.rel (%p363_p2) target bundleno = 1431 (0x597), region = 68  ;;  %17629 = vmatprep.subr.msk.mxu0 (!%p363_p2), %vm564_vm0, %v19419_v0  ;;  %v19431_v2 = vld [vmem:[%s21474_s1 + $0x4] sm:$0x7] (!%p363_p2)  ;;  %vm559_vm1 = vcmask (!%p363_p2), 23552   ;;  %vm555_vm2 = vcmask (!%p363_p2), 1046528   ;;  %vm725_vm3 = vcmask (!%p363_p2), 1045504  }
   0x7   : > { %17630 = vmatpush3.msk.msra.mxu0 (!%p363_p2), %vm564_vm0, %v19419_v0  ;;  %17624 = vmatprep.subr.msk.mxu1 (!%p363_p2), %vm564_vm0, %v19431_v2  ;;  %v19460_v13 = vld [vmem:[%s21474_s1 + $0xc] sm:$0x7] (!%p363_p2)  ;;  %v19481_v17 = vld [vmem:[%s21474_s1 + $0x10] sm:$0x7] (!%p363_p2)  ;;  %v19499_v21 = vld [vmem:[%s21474_s1 + $0x14] sm:$0x7] (!%p363_p2) }
   0x8   : > { %17634 = vmatprep.subr.msk.mxu0 (!%p363_p2), %vm564_vm0, %v19426_v1  ;;  %17625 = vmatpush3.msk.msra.mxu1 (!%p363_p2), %vm564_vm0, %v19431_v2  ;;  %v19517_v23 = vld [vmem:[%s21474_s1 + $0x18] sm:$0x7] (!%p363_p2)  ;;  %v19536_v28 = vld [vmem:[%s21474_s1 + $0x1c] sm:$0x7] (!%p363_p2)  ;;  %v19554_v32 = vld [vmem:[%s21474_s1 + $0x20] sm:$0x7] (!%p363_p2) }
   0x9   : > { %17669 = vmatprep.subr.msk.mxu1 (!%p363_p2), %vm564_vm0, %v19431_v2  ;;  %vm523_vm4 = vcmask (!%p363_p2), 79872   ;;  %v19338_v57 = vmov (!%p363_p2), -inf   ;;  %vm521_vm5 = vcmask (!%p363_p2), 80896   ;;  %vm10675_vm7 = vcmask (!%p363_p2), 78848  }
   0xa   : > { %524 = vst.msk [vmem:[#allocation2 + $0x8] sm:$0x7f] (!%p363_p2), %vm523_vm4, %v19338_v57  ;;  %526 = vst.msk [vmem:[#allocation2 + $0x18] sm:$0x7f] (!%p363_p2), %vm523_vm4, %v19338_v57 }
   0xb   : > { %528 = vst.msk [vmem:[#allocation2 + $0x28] sm:$0x7f] (!%p363_p2), %vm523_vm4, %v19338_v57  ;;  %530 = vst.msk [vmem:[#allocation2 + $0x38] sm:$0x7f] (!%p363_p2), %vm523_vm4, %v19338_v57 }
   0xc   : > { %532 = vst.msk [vmem:[#allocation2 + $0x48] sm:$0x7f] (!%p363_p2), %vm523_vm4, %v19338_v57  ;;  %534 = vst.msk [vmem:[#allocation2 + $0x58] sm:$0x7f] (!%p363_p2), %vm523_vm4, %v19338_v57 }
   0xd   : > { %s21489_s22 = smov (!%p404_p3, %s16457_s22), 1  ;;  %536 = vst.msk [vmem:[#allocation2 + $0x68] sm:$0x7f] %vm523_vm4, %v19338_v57  ;;  %538 = vst.msk [vmem:[#allocation2 + $0x78] sm:$0x7f] %vm523_vm4, %v19338_v57 }
   0xe   : > { %s17013_s29 = sshll.u32 %s21489_s22, 8  ;;  %540 = vst.msk [vmem:[#allocation2 + $0x88] sm:$0x7f] %vm523_vm4, %v19338_v57  ;;  %542 = vst.msk [vmem:[#allocation2 + $0x98] sm:$0x7f] %vm523_vm4, %v19338_v57  ;;  %s17014_s17 = sshll.u32 %s21489_s22, 4 }
   0xf   : > { %s19449_s14 = scalar_lea.vmem %s21473_s0, %s17013_s29  ;;  %544 = vst.msk [vmem:[#allocation2 + $0xa8] sm:$0x7f] %vm523_vm4, %v19338_v57  ;;  %546 = vst.msk [vmem:[#allocation2 + $0xb8] sm:$0x7f] %vm523_vm4, %v19338_v57  ;;  %s413_s20 = scalar_lea.vmem %s21485_s12, %s17014_s17 }
  0x10   : > { %v414_v3 = vld [vmem:[%s19449_s14] sm:$0xff]  ;;  %v415_v4 = vld [vmem:[%s19449_s14 + $0x8] sm:$0xff]  ;;  %v416_v5 = vld [vmem:[%s19449_s14 + $0x10] sm:$0xff]  ;;  %548 = vst.msk [vmem:[#allocation2 + $0xc8] sm:$0x7f] %vm523_vm4, %v19338_v57 }
  0x11   : > { %v556_v6 = vrot.slane %v414_v3, 1  ;;  %17631 = vmatprep.mubr.msk.f32.mxu0 %vm559_vm1, %v414_v3  ;;  %v726_v7 = vrot.slane %v414_v3, 2  ;;  %v727_v8 = vrot.slane %v415_v4, 2  ;;  %v557_v9 = vrot.slane %v415_v4, 1  ;;  %v417_v10 = vld [vmem:[%s19449_s14 + $0x18] sm:$0xff]  ;;  %v418_v22 = vld [vmem:[%s19449_s14 + $0x20] sm:$0xff] }
  0x12   : > { %17632 = vmatmul.mubr.msk.f32.vlgmr.msra.gmra.mrb[0].mxu0 %vm559_vm1, %v415_v4  ;;  %v899_v11 = vrot.slane %v416_v5, 1  ;;  %v900_v12 = vrot.slane %v417_v10, 1  ;;  %v986_v18 = vrot.slane %v416_v5, 2  ;;  %v987_v19 = vrot.slane %v417_v10, 2  ;;  %v419_v24 = vld [vmem:[%s19449_s14 + $0x28] sm:$0xff]  ;;  %v420_v33 = vld [vmem:[%s19449_s14 + $0x30] sm:$0xff] }
  0x13   : > { %17635 = vmatpush3.msk.msra.mxu0 %vm564_vm0, %v19426_v1  ;;  %v558_v14 = vsel %vm555_vm2, %v556_v6, %v557_v9  ;;  %v728_v15 = vsel %vm725_vm3, %v726_v7, %v727_v8  ;;  %v1159_v25 = vrot.slane %v418_v22, 1  ;;  %v1160_v26 = vrot.slane %v419_v24, 1  ;;  %v421_v34 = vld [vmem:[%s19449_s14 + $0x38] sm:$0xff]  ;;  %v422_v41 = vld [vmem:[%s19449_s14 + $0x40] sm:$0xff]  ;;  %v423_v42 = vld [vmem:[%s19449_s14 + $0x48] sm:$0xff]  ;;  %522 = vst.msk [vmem:[#allocation2] sm:$0xff] %vm521_vm5, %v19338_v57 }
  0x14   : > { %17626 = vmatprep.mubr.msk.f32.mxu1 %vm559_vm1, %v558_v14  ;;  %v901_v16 = vsel %vm555_vm2, %v899_v11, %v900_v12  ;;  %17636 = vmatprep.mubr.msk.f32.mxu0 %vm559_vm1, %v728_v15  ;;  %v988_v20 = vsel %vm725_vm3, %v986_v18, %v987_v19  ;;  %v1246_v29 = vrot.slane %v418_v22, 2  ;;  %v1247_v30 = vrot.slane %v419_v24, 2  ;;  %v424_v49 = vld [vmem:[%s19449_s14 + $0x50] sm:$0xff]  ;;  %v19697_v50 = vld [vmem:[%s19449_s14 + $0x58] sm:$0xff]  ;;  %550 = vst.msk [vmem:[#allocation2 + $0xd8] sm:$0x7f] %vm523_vm4, %v19338_v57 }
  0x15   : > { %17627 = vmatmul.mubr.msk.f32.vlgmr.msra.gmra.mrb[0].mxu1 %vm559_vm1, %v557_v9  ;;  %17639 = vmatprep.subr.msk.mxu0 %vm564_vm0, %v19460_v13  ;;  %v1161_v27 = vsel %vm555_vm2, %v1159_v25, %v1160_v26  ;;  %v1894_v35 = vrot.slane %v420_v33, 1  ;;  %v1895_v36 = vrot.slane %v421_v34, 1  ;;  %v1978_v38 = vrot.slane %v420_v33, 2  ;;  %552 = vst.msk [vmem:[#allocation2 + $0xe8] sm:$0x7f] %vm523_vm4, %v19338_v57  ;;  %v426_v58 = vld [vmem:[%s19449_s14 + $0x60] sm:$0xff] }
  0x16   : > { %17670 = vmatpush3.msk.msra.mxu1 %vm564_vm0, %v19431_v2  ;;  %17671 = vmatprep.mubr.msk.f32.mxu1 %vm559_vm1, %v901_v16  ;;  %v1248_v31 = vsel %vm725_vm3, %v1246_v29, %v1247_v30  ;;  %v1979_v39 = vrot.slane %v421_v34, 2  ;;  %v2611_v43 = vrot.slane %v422_v41, 1  ;;  %v2612_v44 = vrot.slane %v423_v42, 1  ;;  %525 = vst.msk [vmem:[#allocation2 + $0x10] sm:$0xff] %vm521_vm5, %v19338_v57  ;;  %527 = vst.msk [vmem:[#allocation2 + $0x20] sm:$0xff] %vm521_vm5, %v19338_v57  ;;  %v427_v59 = vld [vmem:[%s19449_s14 + $0x68] sm:$0xff] }
  0x17   : > { %17674 = vmatprep.subr.msk.mxu1 %vm564_vm0, %v19419_v0  ;;  %v1896_v37 = vsel %vm555_vm2, %v1894_v35, %v1895_v36  ;;  %v2695_v46 = vrot.slane %v422_v41, 2  ;;  %v19668_v47 = vrot.slane %v423_v42, 2  ;;  %v3328_v51 = vrot.slane %v424_v49, 1  ;;  %529 = vst.msk [vmem:[#allocation2 + $0x30] sm:$0xff] %vm521_vm5, %v19338_v57  ;;  %531 = vst.msk [vmem:[#allocation2 + $0x40] sm:$0xff] %vm521_vm5, %v19338_v57  ;;  %v429_v6 = vld [vmem:[%s19449_s14 + $0x78] sm:$0xff] }
  0x18   : > { %v1980_v40 = vsel %vm725_vm3, %v1978_v38, %v1979_v39  ;;  %v2613_v45 = vsel %vm555_vm2, %v2611_v43, %v2612_v44  ;;  %v19704_v52 = vrot.slane %v19697_v50, 1  ;;  %v3412_v54 = vrot.slane %v424_v49, 2  ;;  %533 = vst.msk [vmem:[#allocation2 + $0x50] sm:$0xff] %vm521_vm5, %v19338_v57  ;;  %535 = vst.msk [vmem:[#allocation2 + $0x60] sm:$0xff] %vm521_vm5, %v19338_v57  ;;  %v19953_v18 = vld [vmem:[%s19449_s14 + $0x88] sm:$0xff]  ;;  %v20007_v29 = vld [vmem:[%s19449_s14 + $0x98] sm:$0xff] }
  0x19   : > { %17672 = vmatmul.mubr.msk.f32.vlgmr.msra.gmra.mrb[2].mxu1 %vm559_vm1, %v900_v12  ;;  %v2697_v48 = vsel %vm725_vm3, %v2695_v46, %v19668_v47  ;;  %v19720_v55 = vrot.slane %v19697_v50, 2  ;;  %537 = vst.msk [vmem:[#allocation2 + $0x70] sm:$0xff] %vm521_vm5, %v19338_v57  ;;  %539 = vst.msk [vmem:[#allocation2 + $0x80] sm:$0xff] %vm521_vm5, %v19338_v57  ;;  %v4045_v60 = vrot.slane %v426_v58, 1  ;;  %v4046_v61 = vrot.slane %v427_v59, 1 }
  0x1a   : > { %17637 = vmatmul.mubr.msk.f32.vlgmr.msra.gmra.mrb[0].mxu0 %vm559_vm1, %v727_v8  ;;  %17675 = vmatpush3.msk.msra.mxu1 %vm564_vm0, %v19419_v0  ;;  %v19710_v53 = vsel %vm555_vm2, %v3328_v51, %v19704_v52  ;;  %541 = vst.msk [vmem:[#allocation2 + $0x90] sm:$0xff] %vm521_vm5, %v19338_v57  ;;  %543 = vst.msk [vmem:[#allocation2 + $0xa0] sm:$0xff] %vm521_vm5, %v19338_v57  ;;  %v4129_v63 = vrot.slane %v426_v58, 2  ;;  %v4130_v3 = vrot.slane %v427_v59, 2  ;;  %v4763_v8 = vrot.slane %v429_v6, 1 }
  0x1b   : > { %17640 = vmatpush3.msk.msra.mxu0 %vm564_vm0, %v19460_v13  ;;  %17676 = vmatprep.mubr.msk.f32.mxu1 %vm559_vm1, %v416_v5  ;;  %v19734_v56 = vsel %vm725_vm3, %v3412_v54, %v19720_v55  ;;  %545 = vst.msk [vmem:[#allocation2 + $0xb0] sm:$0xff] %vm521_vm5, %v19338_v57  ;;  %547 = vst.msk [vmem:[#allocation2 + $0xc0] sm:$0xff] %vm521_vm5, %v19338_v57  ;;  %v4047_v62 = vsel %vm555_vm2, %v4045_v60, %v4046_v61  ;;  %v4847_v11 = vrot.slane %v429_v6, 2  ;;  %v20183_v60 = vld [vmem:[%s19449_s14 + $0xb0] sm:$0xff] }
  0x1c   : > { %17641 = vmatprep.mubr.msk.f32.mxu0 %vm559_vm1, %v416_v5  ;;  %17644 = vmatprep.subr.msk.mxu0 %vm564_vm0, %v19481_v17  ;;  %549 = vst.msk [vmem:[#allocation2 + $0xd0] sm:$0xff] %vm521_vm5, %v19338_v57  ;;  %551 = vst.msk [vmem:[#allocation2 + $0xe0] sm:$0xff] %vm521_vm5, %v19338_v57  ;;  %v4131_v4 = vsel %vm725_vm3, %v4129_v63, %v4130_v3  ;;  %v428_v5 = vld [vmem:[%s19449_s14 + $0x70] sm:$0xff]  ;;  %v19974_v25 = vrot.slane %v19953_v18, 2  ;;  %v20032_v35 = vrot.slane %v20007_v29, 2 }
  0x1d   : > { %17679 = vmatprep.subr.msk.mxu1 %vm564_vm0, %v19426_v1  ;;  %v4762_v7 = vrot.slane %v428_v5, 1 }
  0x1f   : > { %v4764_v9 = vsel %vm555_vm2, %v4762_v7, %v4763_v8 }
  0x21   : > { %17677 = vmatmul.mubr.msk.f32.vlgmr.msra.gmra.mrb[2].mxu1 %vm559_vm1, %v417_v10 }
  0x22   : > { %17642 = vmatmul.mubr.msk.f32.vlgmr.msra.gmra.mrb[0].mxu0 %vm559_vm1, %v417_v10  ;;  %17680 = vmatpush3.msk.msra.mxu1 %vm564_vm0, %v19426_v1  ;;  %v4846_v10 = vrot.slane %v428_v5, 2 }
  0x23   : > { %17645 = vmatpush3.msk.msra.mxu0 %vm564_vm0, %v19481_v17  ;;  %17681 = vmatprep.mubr.msk.f32.mxu1 %vm559_vm1, %v988_v20 }
  0x24   : > { %17646 = vmatprep.mubr.msk.f32.mxu0 %vm559_vm1, %v901_v16  ;;  %17649 = vmatprep.subr.msk.mxu0 %vm564_vm0, %v19499_v21  ;;  %v430_v16 = vld [vmem:[%s19449_s14 + $0x80] sm:$0xff] }
  0x25   : > { %17684 = vmatprep.subr.msk.mxu1 %vm564_vm0, %v19460_v13 }
  0x29   : > { %17682 = vmatmul.mubr.msk.f32.vlgmr.msra.gmra.mrb[2].mxu1 %vm559_vm1, %v987_v19 }
  0x2a   : > { %17647 = vmatmul.mubr.msk.f32.vlgmr.msra.gmra.mrb[0].mxu0 %vm559_vm1, %v900_v12  ;;  %17685 = vmatpush3.msk.msra.mxu1 %vm564_vm0, %v19460_v13  ;;  %v4848_v12 = vsel %vm725_vm3, %v4846_v10, %v4847_v11 }
  0x2b   : > { %17650 = vmatpush3.msk.msra.mxu0 %vm564_vm0, %v19499_v21  ;;  %17686 = vmatprep.mubr.msk.f32.mxu1 %vm559_vm1, %v418_v22 }
  0x2c   : > { %17651 = vmatprep.mubr.msk.f32.mxu0 %vm559_vm1, %v988_v20  ;;  %17654 = vmatprep.subr.msk.mxu0 %vm564_vm0, %v19517_v23  ;;  %v5480_v20 = vrot.slane %v19953_v18, 1 }
  0x2d   : > { %17689 = vmatprep.subr.msk.mxu1 %vm564_vm0, %v19481_v17 }
  0x31   : > { %17687 = vmatmul.mubr.msk.f32.vlgmr.msra.gmra.mrb[2].mxu1 %vm559_vm1, %v419_v24 }
  0x32   : > { %17652 = vmatmul.mubr.msk.f32.vlgmr.msra.gmra.mrb[0].mxu0 %vm559_vm1, %v987_v19  ;;  %17690 = vmatpush3.msk.msra.mxu1 %vm564_vm0, %v19481_v17  ;;  %v5479_v19 = vrot.slane %v430_v16, 1 }
  0x33   : > { %17655 = vmatpush3.msk.msra.mxu0 %vm564_vm0, %v19517_v23  ;;  %17691 = vmatprep.mubr.msk.f32.mxu1 %vm559_vm1, %v1161_v27 }
  0x34   : > { %17656 = vmatprep.mubr.msk.f32.mxu0 %vm559_vm1, %v418_v22  ;;  %17659 = vmatprep.subr.msk.mxu0 %vm564_vm0, %v19536_v28 }
  0x35   : > { %17694 = vmatprep.subr.msk.mxu1 %vm564_vm0, %v19499_v21 }
  0x39   : > { %17692 = vmatmul.mubr.msk.f32.vlgmr.msra.gmra.mrb[2].mxu1 %vm559_vm1, %v1160_v26 }
  0x3a   : > { %17657 = vmatmul.mubr.msk.f32.vlgmr.msra.gmra.mrb[0].mxu0 %vm559_vm1, %v419_v24  ;;  %17695 = vmatpush3.msk.msra.mxu1 %vm564_vm0, %v19499_v21 }
  0x3b   : > { %17660 = vmatpush3.msk.msra.mxu0 %vm564_vm0, %v19536_v28  ;;  %17696 = vmatprep.mubr.msk.f32.mxu1 %vm559_vm1, %v1248_v31 }
  0x3c   : > { %17661 = vmatprep.mubr.msk.f32.mxu0 %vm559_vm1, %v1161_v27  ;;  %17664 = vmatprep.subr.msk.mxu0 %vm564_vm0, %v19554_v32 }
  0x3d   : > { %17699 = vmatprep.subr.msk.mxu1 %vm564_vm0, %v19517_v23 }
  0x41   : > { %17697 = vmatmul.mubr.msk.f32.vlgmr.msra.gmra.mrb[2].mxu1 %vm559_vm1, %v1247_v30 }
  0x42   : > { %17662 = vmatmul.mubr.msk.f32.vlgmr.msra.gmra.mrb[0].mxu0 %vm559_vm1, %v1160_v26  ;;  %17700 = vmatpush3.msk.msra.mxu1 %vm564_vm0, %v19517_v23 }
  0x43   : > { %17665 = vmatpush3.msk.msra.mxu0 %vm564_vm0, %v19554_v32  ;;  %17701 = vmatprep.mubr.msk.f32.mxu1 %vm559_vm1, %v420_v33 }
  0x44   : > { %17666 = vmatprep.mubr.msk.f32.mxu0 %vm559_vm1, %v1248_v31  ;;  %17704 = vmatprep.subr.msk.mxu1 %vm564_vm0, %v19536_v28 }
  0x45   : > { %17714 = vmatprep.subr.msk.mxu0 %vm564_vm0, %v19431_v2 }
  0x49   : > { %17702 = vmatmul.mubr.msk.f32.vlgmr.msra.gmra.mrb[2].mxu1 %vm559_vm1, %v421_v34 }
  0x4a   : > { %17667 = vmatmul.mubr.msk.f32.vlgmr.msra.gmra.mrb[0].mxu0 %vm559_vm1, %v1247_v30  ;;  %17705 = vmatpush3.msk.msra.mxu1 %vm564_vm0, %v19536_v28 }
  0x4b   : > { %17715 = vmatpush3.msk.msra.mxu0 %vm564_vm0, %v19431_v2  ;;  %17716 = vmatprep.mubr.msk.f32.mxu0 %vm559_vm1, %v1161_v27  ;;  %v19994_v27 = vld [vmem:[%s19449_s14 + $0x90] sm:$0xff] }
  0x4c   : > { %17719 = vmatprep.subr.msk.mxu0 %vm564_vm0, %v19419_v0  ;;  %17706 = vmatprep.mubr.msk.f32.mxu1 %vm559_vm1, %v1896_v37 }
  0x4d   : > { %17709 = vmatprep.subr.msk.mxu1 %vm564_vm0, %v19554_v32 }
  0x4e   : > { %17717 = vmatmul.mubr.msk.f32.vlgmr.msra.gmra.mrb[2].mxu0 %vm559_vm1, %v1160_v26 }
  0x4f   : > { %17720 = vmatpush3.msk.msra.mxu0 %vm564_vm0, %v19419_v0  ;;  %17721 = vmatprep.mubr.msk.f32.mxu0 %vm559_vm1, %v418_v22  ;;  %v5481_v22 = vsel %vm555_vm2, %v5479_v19, %v5480_v20 }
  0x50   : > { %17724 = vmatprep.subr.msk.mxu0 %vm564_vm0, %v19426_v1 }
  0x51   : > { %17707 = vmatmul.mubr.msk.f32.vlgmr.msra.gmra.mrb[2].mxu1 %vm559_vm1, %v1895_v36 }
  0x52   : > { %17710 = vmatpush3.msk.msra.mxu1 %vm564_vm0, %v19554_v32  ;;  %17711 = vmatprep.mubr.msk.f32.mxu1 %vm559_vm1, %v1980_v40 }
  0x53   : > { %17759 = vmatprep.subr.msk.mxu1 %vm564_vm0, %v19431_v2 }
  0x56   : > { %17722 = vmatmul.mubr.msk.f32.vlgmr.msra.gmra.mrb[2].mxu0 %vm559_vm1, %v419_v24  ;;  %v5563_v24 = vrot.slane %v430_v16, 2 }
  0x57   : > { %17725 = vmatpush3.msk.msra.mxu0 %vm564_vm0, %v19426_v1  ;;  %17726 = vmatprep.mubr.msk.f32.mxu0 %vm559_vm1, %v1248_v31  ;;  %v20015_v31 = vrot.slane %v20007_v29, 1 }
  0x58   : > { %17729 = vmatprep.subr.msk.mxu0 %vm564_vm0, %v19460_v13  ;;  %v5565_v26 = vsel %vm725_vm3, %v5563_v24, %v19974_v25 }
  0x59   : > { %17712 = vmatmul.mubr.msk.f32.vlgmr.msra.gmra.mrb[2].mxu1 %vm559_vm1, %v1979_v39 }
  0x5a   : > { %17760 = vmatpush3.msk.msra.mxu1 %vm564_vm0, %v19431_v2  ;;  %17761 = vmatprep.mubr.msk.f32.mxu1 %vm559_vm1, %v1896_v37 }
  0x5b   : > { %17764 = vmatprep.subr.msk.mxu1 %vm564_vm0, %v19419_v0 }
  0x5d   : > { %17762 = vmatmul.mubr.msk.f32.vlgmr.msra.gmra.mrb[4].mxu1 %vm559_vm1, %v1895_v36 }
  0x5e   : > { %17727 = vmatmul.mubr.msk.f32.vlgmr.msra.gmra.mrb[2].mxu0 %vm559_vm1, %v1247_v30  ;;  %17765 = vmatpush3.msk.msra.mxu1 %vm564_vm0, %v19419_v0  ;;  %v6196_v30 = vrot.slane %v19994_v27, 1 }
  0x5f   : > { %17730 = vmatpush3.msk.msra.mxu0 %vm564_vm0, %v19460_v13  ;;  %17766 = vmatprep.mubr.msk.f32.mxu1 %vm559_vm1, %v420_v33 }
  0x60   : > { %17731 = vmatprep.mubr.msk.f32.mxu0 %vm559_vm1, %v420_v33  ;;  %17734 = vmatprep.subr.msk.mxu0 %vm564_vm0, %v19481_v17  ;;  %v20021_v33 = vsel %vm555_vm2, %v6196_v30, %v20015_v31 }
  0x61   : > { %17769 = vmatprep.subr.msk.mxu1 %vm564_vm0, %v19426_v1 }
  0x65   : > { %17767 = vmatmul.mubr.msk.f32.vlgmr.msra.gmra.mrb[4].mxu1 %vm559_vm1, %v421_v34 }
  0x66   : > { %17732 = vmatmul.mubr.msk.f32.vlgmr.msra.gmra.mrb[2].mxu0 %vm559_vm1, %v421_v34  ;;  %17770 = vmatpush3.msk.msra.mxu1 %vm564_vm0, %v19426_v1  ;;  %v6280_v34 = vrot.slane %v19994_v27, 2 }
  0x67   : > { %17735 = vmatpush3.msk.msra.mxu0 %vm564_vm0, %v19481_v17  ;;  %17771 = vmatprep.mubr.msk.f32.mxu1 %vm559_vm1, %v1980_v40 }
  0x68   : > { %17736 = vmatprep.mubr.msk.f32.mxu0 %vm559_vm1, %v1896_v37  ;;  %17739 = vmatprep.subr.msk.mxu0 %vm564_vm0, %v19499_v21  ;;  %v20053_v37 = vld [vmem:[%s21475_s2] ss:$0 sm:$0xff] }
  0x69   : > { %17774 = vmatprep.subr.msk.mxu1 %vm564_vm0, %v19460_v13 }
  0x6d   : > { %17772 = vmatmul.mubr.msk.f32.vlgmr.msra.gmra.mrb[4].mxu1 %vm559_vm1, %v1979_v39 }
  0x6e   : > { %17737 = vmatmul.mubr.msk.f32.vlgmr.msra.gmra.mrb[2].mxu0 %vm559_vm1, %v1895_v36  ;;  %17775 = vmatpush3.msk.msra.mxu1 %vm564_vm0, %v19460_v13  ;;  %v20046_v36 = vsel %vm725_vm3, %v6280_v34, %v20032_v35 }
  0x6f   : > { %17740 = vmatpush3.msk.msra.mxu0 %vm564_vm0, %v19499_v21  ;;  %17776 = vmatprep.mubr.msk.f32.mxu1 %vm559_vm1, %v422_v41 }
  0x70   : > { %17741 = vmatprep.mubr.msk.f32.mxu0 %vm559_vm1, %v1980_v40  ;;  %17744 = vmatprep.subr.msk.mxu0 %vm564_vm0, %v19517_v23 }
  0x71   : > { %17779 = vmatprep.subr.msk.mxu1 %vm564_vm0, %v19481_v17 }
  0x75   : > { %17777 = vmatmul.mubr.msk.f32.vlgmr.msra.gmra.mrb[4].mxu1 %vm559_vm1, %v423_v42 }
  0x76   : > { %17742 = vmatmul.mubr.msk.f32.vlgmr.msra.gmra.mrb[2].mxu0 %vm559_vm1, %v1979_v39  ;;  %17780 = vmatpush3.msk.msra.mxu1 %vm564_vm0, %v19481_v17 }
  0x77   : > { %17745 = vmatpush3.msk.msra.mxu0 %vm564_vm0, %v19517_v23  ;;  %17781 = vmatprep.mubr.msk.f32.mxu1 %vm559_vm1, %v2613_v45 }
  0x78   : > { %17746 = vmatprep.mubr.msk.f32.mxu0 %vm559_vm1, %v422_v41  ;;  %17749 = vmatprep.subr.msk.mxu0 %vm564_vm0, %v19536_v28 }
  0x79   : > { %17784 = vmatprep.subr.msk.mxu1 %vm564_vm0, %v19499_v21 }
  0x7d   : > { %17782 = vmatmul.mubr.msk.f32.vlgmr.msra.gmra.mrb[4].mxu1 %vm559_vm1, %v2612_v44 }
  0x7e   : > { %17747 = vmatmul.mubr.msk.f32.vlgmr.msra.gmra.mrb[2].mxu0 %vm559_vm1, %v423_v42  ;;  %17785 = vmatpush3.msk.msra.mxu1 %vm564_vm0, %v19499_v21 }
  0x7f   : > { %17750 = vmatpush3.msk.msra.mxu0 %vm564_vm0, %v19536_v28  ;;  %17786 = vmatprep.mubr.msk.f32.mxu1 %vm559_vm1, %v2697_v48 }
  0x80   : > { %17751 = vmatprep.mubr.msk.f32.mxu0 %vm559_vm1, %v2613_v45  ;;  %17754 = vmatprep.subr.msk.mxu0 %vm564_vm0, %v19554_v32 }
  0x81   : > { %17789 = vmatprep.subr.msk.mxu1 %vm564_vm0, %v19517_v23 }
  0x85   : > { %17787 = vmatmul.mubr.msk.f32.vlgmr.msra.gmra.mrb[4].mxu1 %vm559_vm1, %v19668_v47 }
  0x86   : > { %17752 = vmatmul.mubr.msk.f32.vlgmr.msra.gmra.mrb[2].mxu0 %vm559_vm1, %v2612_v44  ;;  %17790 = vmatpush3.msk.msra.mxu1 %vm564_vm0, %v19517_v23 }
  0x87   : > { %17755 = vmatpush3.msk.msra.mxu0 %vm564_vm0, %v19554_v32  ;;  %17791 = vmatprep.mubr.msk.f32.mxu1 %vm559_vm1, %v424_v49 }
  0x88   : > { %17756 = vmatprep.mubr.msk.f32.mxu0 %vm559_vm1, %v2697_v48  ;;  %17794 = vmatprep.subr.msk.mxu1 %vm564_vm0, %v19536_v28 }
  0x89   : > { %17804 = vmatprep.subr.msk.mxu0 %vm564_vm0, %v19431_v2 }
  0x8d   : > { %17792 = vmatmul.mubr.msk.f32.vlgmr.msra.gmra.mrb[4].mxu1 %vm559_vm1, %v19697_v50 }
  0x8e   : > { %17757 = vmatmul.mubr.msk.f32.vlgmr.msra.gmra.mrb[2].mxu0 %vm559_vm1, %v19668_v47  ;;  %17795 = vmatpush3.msk.msra.mxu1 %vm564_vm0, %v19536_v28 }
  0x8f   : > { %17805 = vmatpush3.msk.msra.mxu0 %vm564_vm0, %v19431_v2  ;;  %17806 = vmatprep.mubr.msk.f32.mxu0 %vm559_vm1, %v2613_v45 }
  0x90   : > { %17809 = vmatprep.subr.msk.mxu0 %vm564_vm0, %v19419_v0  ;;  %17796 = vmatprep.mubr.msk.f32.mxu1 %vm559_vm1, %v19710_v53 }
  0x91   : > { %17799 = vmatprep.subr.msk.mxu1 %vm564_vm0, %v19554_v32 }
  0x92   : > { %17807 = vmatmul.mubr.msk.f32.vlgmr.msra.gmra.mrb[4].mxu0 %vm559_vm1, %v2612_v44 }
  0x93   : > { %17810 = vmatpush3.msk.msra.mxu0 %vm564_vm0, %v19419_v0  ;;  %17811 = vmatprep.mubr.msk.f32.mxu0 %vm559_vm1, %v422_v41  ;;  %v20065_v41 = vld [vmem:[%s21476_s3] ss:$0 sm:$0xff] }
  0x94   : > { %17814 = vmatprep.subr.msk.mxu0 %vm564_vm0, %v19426_v1 }
  0x95   : > { %17797 = vmatmul.mubr.msk.f32.vlgmr.msra.gmra.mrb[4].mxu1 %vm559_vm1, %v19704_v52 }
  0x96   : > { %17800 = vmatpush3.msk.msra.mxu1 %vm564_vm0, %v19554_v32  ;;  %17801 = vmatprep.mubr.msk.f32.mxu1 %vm559_vm1, %v19734_v56 }
  0x97   : > { %17849 = vmatprep.subr.msk.mxu1 %vm564_vm0, %v19431_v2 }
  0x9a   : > { %17812 = vmatmul.mubr.msk.f32.vlgmr.msra.gmra.mrb[4].mxu0 %vm559_vm1, %v423_v42 }
  0x9b   : > { %17815 = vmatpush3.msk.msra.mxu0 %vm564_vm0, %v19426_v1  ;;  %17816 = vmatprep.mubr.msk.f32.mxu0 %vm559_vm1, %v2697_v48 }
  0x9c   : > { %17819 = vmatprep.subr.msk.mxu0 %vm564_vm0, %v19460_v13 }
  0x9d   : > { %17802 = vmatmul.mubr.msk.f32.vlgmr.msra.gmra.mrb[4].mxu1 %vm559_vm1, %v19720_v55 }
  0x9e   : > { %17850 = vmatpush3.msk.msra.mxu1 %vm564_vm0, %v19431_v2  ;;  %17851 = vmatprep.mubr.msk.f32.mxu1 %vm559_vm1, %v19710_v53 }
  0x9f   : > { %17854 = vmatprep.subr.msk.mxu1 %vm564_vm0, %v19419_v0 }
  0xa1   : > { %17852 = vmatmul.mubr.msk.f32.vlgmr.msra.gmra.mrb[6].mxu1 %vm559_vm1, %v19704_v52 }
  0xa2   : > { %17817 = vmatmul.mubr.msk.f32.vlgmr.msra.gmra.mrb[4].mxu0 %vm559_vm1, %v19668_v47  ;;  %17855 = vmatpush3.msk.msra.mxu1 %vm564_vm0, %v19419_v0 }
  0xa3   : > { %17820 = vmatpush3.msk.msra.mxu0 %vm564_vm0, %v19460_v13  ;;  %17856 = vmatprep.mubr.msk.f32.mxu1 %vm559_vm1, %v424_v49 }
  0xa4   : > { %17821 = vmatprep.mubr.msk.f32.mxu0 %vm559_vm1, %v424_v49  ;;  %17824 = vmatprep.subr.msk.mxu0 %vm564_vm0, %v19481_v17 }
  0xa5   : > { %17859 = vmatprep.subr.msk.mxu1 %vm564_vm0, %v19426_v1 }
  0xa9   : > { %17857 = vmatmul.mubr.msk.f32.vlgmr.msra.gmra.mrb[6].mxu1 %vm559_vm1, %v19697_v50 }
  0xaa   : > { %17822 = vmatmul.mubr.msk.f32.vlgmr.msra.gmra.mrb[4].mxu0 %vm559_vm1, %v19697_v50  ;;  %17860 = vmatpush3.msk.msra.mxu1 %vm564_vm0, %v19426_v1 }
  0xab   : > { %17825 = vmatpush3.msk.msra.mxu0 %vm564_vm0, %v19481_v17  ;;  %17861 = vmatprep.mubr.msk.f32.mxu1 %vm559_vm1, %v19734_v56 }
  0xac   : > { %17826 = vmatprep.mubr.msk.f32.mxu0 %vm559_vm1, %v19710_v53  ;;  %17829 = vmatprep.subr.msk.mxu0 %vm564_vm0, %v19499_v21 }
  0xad   : > { %17864 = vmatprep.subr.msk.mxu1 %vm564_vm0, %v19460_v13 }
  0xb1   : > { %17862 = vmatmul.mubr.msk.f32.vlgmr.msra.gmra.mrb[6].mxu1 %vm559_vm1, %v19720_v55 }
  0xb2   : > { %17827 = vmatmul.mubr.msk.f32.vlgmr.msra.gmra.mrb[4].mxu0 %vm559_vm1, %v19704_v52  ;;  %17865 = vmatpush3.msk.msra.mxu1 %vm564_vm0, %v19460_v13 }
  0xb3   : > { %17830 = vmatpush3.msk.msra.mxu0 %vm564_vm0, %v19499_v21  ;;  %17866 = vmatprep.mubr.msk.f32.mxu1 %vm559_vm1, %v426_v58 }
  0xb4   : > { %17831 = vmatprep.mubr.msk.f32.mxu0 %vm559_vm1, %v19734_v56  ;;  %17834 = vmatprep.subr.msk.mxu0 %vm564_vm0, %v19517_v23 }
  0xb5   : > { %17869 = vmatprep.subr.msk.mxu1 %vm564_vm0, %v19481_v17 }
  0xb9   : > { %17867 = vmatmul.mubr.msk.f32.vlgmr.msra.gmra.mrb[6].mxu1 %vm559_vm1, %v427_v59 }
  0xba   : > { %17832 = vmatmul.mubr.msk.f32.vlgmr.msra.gmra.mrb[4].mxu0 %vm559_vm1, %v19720_v55  ;;  %17870 = vmatpush3.msk.msra.mxu1 %vm564_vm0, %v19481_v17  ;;  %v434_v55 = vld [vmem:[%s19449_s14 + $0xa0] sm:$0xff] }
  0xbb   : > { %17835 = vmatpush3.msk.msra.mxu0 %vm564_vm0, %v19517_v23  ;;  %17871 = vmatprep.mubr.msk.f32.mxu1 %vm559_vm1, %v4047_v62  ;;  %v6913_v56 = vrot.slane %v434_v55, 1 }
  0xbc   : > { %17836 = vmatprep.mubr.msk.f32.mxu0 %vm559_vm1, %v426_v58  ;;  %17839 = vmatprep.subr.msk.mxu0 %vm564_vm0, %v19536_v28 }
  0xbd   : > { %17874 = vmatprep.subr.msk.mxu1 %vm564_vm0, %v19499_v21 }
  0xc1   : > { %17872 = vmatmul.mubr.msk.f32.vlgmr.msra.gmra.mrb[6].mxu1 %vm559_vm1, %v4046_v61 }
  0xc2   : > { %17837 = vmatmul.mubr.msk.f32.vlgmr.msra.gmra.mrb[4].mxu0 %vm559_vm1, %v427_v59  ;;  %17875 = vmatpush3.msk.msra.mxu1 %vm564_vm0, %v19499_v21 }
  0xc3   : > { %17840 = vmatpush3.msk.msra.mxu0 %vm564_vm0, %v19536_v28  ;;  %17876 = vmatprep.mubr.msk.f32.mxu1 %vm559_vm1, %v4131_v4 }
  0xc4   : > { %17841 = vmatprep.mubr.msk.f32.mxu0 %vm559_vm1, %v4047_v62  ;;  %17844 = vmatprep.subr.msk.mxu0 %vm564_vm0, %v19554_v32 }
  0xc5   : > { %17879 = vmatprep.subr.msk.mxu1 %vm564_vm0, %v19517_v23 }
  0xc9   : > { %17877 = vmatmul.mubr.msk.f32.vlgmr.msra.gmra.mrb[6].mxu1 %vm559_vm1, %v4130_v3 }
  0xca   : > { %17842 = vmatmul.mubr.msk.f32.vlgmr.msra.gmra.mrb[4].mxu0 %vm559_vm1, %v4046_v61  ;;  %17880 = vmatpush3.msk.msra.mxu1 %vm564_vm0, %v19517_v23 }
  0xcb   : > { %17845 = vmatpush3.msk.msra.mxu0 %vm564_vm0, %v19554_v32  ;;  %17881 = vmatprep.mubr.msk.f32.mxu1 %vm559_vm1, %v428_v5 }
  0xcc   : > { %17846 = vmatprep.mubr.msk.f32.mxu0 %vm559_vm1, %v4131_v4  ;;  %17884 = vmatprep.subr.msk.mxu1 %vm564_vm0, %v19536_v28 }
  0xcd   : > { %17894 = vmatprep.subr.msk.mxu0 %vm564_vm0, %v19431_v2 }
  0xd1   : > { %17882 = vmatmul.mubr.msk.f32.vlgmr.msra.gmra.mrb[6].mxu1 %vm559_vm1, %v429_v6 }
  0xd2   : > { %17847 = vmatmul.mubr.msk.f32.vlgmr.msra.gmra.mrb[4].mxu0 %vm559_vm1, %v4130_v3  ;;  %17885 = vmatpush3.msk.msra.mxu1 %vm564_vm0, %v19536_v28 }
  0xd3   : > { %17895 = vmatpush3.msk.msra.mxu0 %vm564_vm0, %v19431_v2  ;;  %17896 = vmatprep.mubr.msk.f32.mxu0 %vm559_vm1, %v4047_v62 }
  0xd4   : > { %17899 = vmatprep.subr.msk.mxu0 %vm564_vm0, %v19419_v0  ;;  %17886 = vmatprep.mubr.msk.f32.mxu1 %vm559_vm1, %v4764_v9 }
  0xd5   : > { %17889 = vmatprep.subr.msk.mxu1 %vm564_vm0, %v19554_v32 }
  0xd6   : > { %17897 = vmatmul.mubr.msk.f32.vlgmr.msra.gmra.mrb[6].mxu0 %vm559_vm1, %v4046_v61  ;;  %v20203_v61 = vld [vmem:[%s21474_s1 + $0x4] sm:$0x7] }
  0xd7   : > { %17900 = vmatpush3.msk.msra.mxu0 %vm564_vm0, %v19419_v0  ;;  %17901 = vmatprep.mubr.msk.f32.mxu0 %vm559_vm1, %v426_v58  ;;  %v6997_v58 = vrot.slane %v434_v55, 2 }
  0xd8   : > { %17904 = vmatprep.subr.msk.mxu0 %vm564_vm0, %v19426_v1 }
  0xd9   : > { %17887 = vmatmul.mubr.msk.f32.vlgmr.msra.gmra.mrb[6].mxu1 %vm559_vm1, %v4763_v8 }
  0xda   : > { %17890 = vmatpush3.msk.msra.mxu1 %vm564_vm0, %v19554_v32  ;;  %17891 = vmatprep.mubr.msk.f32.mxu1 %vm559_vm1, %v4848_v12 }
  0xdb   : > { %17939 = vmatprep.subr.msk.mxu1 %vm564_vm0, %v19431_v2 }
  0xde   : > { %17902 = vmatmul.mubr.msk.f32.vlgmr.msra.gmra.mrb[6].mxu0 %vm559_vm1, %v427_v59 }
  0xdf   : > { %17905 = vmatpush3.msk.msra.mxu0 %vm564_vm0, %v19426_v1  ;;  %17906 = vmatprep.mubr.msk.f32.mxu0 %vm559_vm1, %v4131_v4 }
  0xe0   : > { %17909 = vmatprep.subr.msk.mxu0 %vm564_vm0, %v19460_v13 }
  0xe1   : > { %17892 = vmatmul.mubr.msk.f32.vlgmr.msra.gmra.mrb[6].mxu1 %vm559_vm1, %v4847_v11 }
  0xe2   : > { %17940 = vmatpush3.msk.msra.mxu1 %vm564_vm0, %v19431_v2  ;;  %17941 = vmatprep.mubr.msk.f32.mxu1 %vm559_vm1, %v4764_v9 }
  0xe3   : > { %17944 = vmatprep.subr.msk.mxu1 %vm564_vm0, %v19419_v0 }
  0xe5   : > { %17942 = vmatmul.mubr.msk.f32.vlgmr.msra.gmra.mrb[8].mxu1 %vm559_vm1, %v4763_v8 }
  0xe6   : > { %17907 = vmatmul.mubr.msk.f32.vlgmr.msra.gmra.mrb[6].mxu0 %vm559_vm1, %v4130_v3  ;;  %17945 = vmatpush3.msk.msra.mxu1 %vm564_vm0, %v19419_v0  ;;  %v7714_v3 = vrot.slane %v20183_v60, 2 }
  0xe7   : > { %17910 = vmatpush3.msk.msra.mxu0 %vm564_vm0, %v19460_v13  ;;  %17946 = vmatprep.mubr.msk.f32.mxu1 %vm559_vm1, %v428_v5 }
  0xe8   : > { %v19923_v14 = vpop.f32.mrb[0].mxu1  ;;  %17911 = vmatprep.mubr.msk.f32.mxu0 %vm559_vm1, %v428_v5  ;;  %17914 = vmatprep.subr.msk.mxu0 %vm564_vm0, %v19481_v17  ;;  %v20231_v5 = vld [vmem:[%s21474_s1] sm:$0x7] }
  0xe9   : > { %v19928_v15 = vpop.f32.mrb[1].mxu1  ;;  %17949 = vmatprep.subr.msk.mxu1 %vm564_vm0, %v19426_v1 }
  0xed   : > { %17947 = vmatmul.mubr.msk.f32.vlgmr.msra.gmra.mrb[8].mxu1 %vm559_vm1, %v429_v6 }
  0xee   : > { %17912 = vmatmul.mubr.msk.f32.vlgmr.msra.gmra.mrb[6].mxu0 %vm559_vm1, %v429_v6  ;;  %17950 = vmatpush3.msk.msra.mxu1 %vm564_vm0, %v19426_v1  ;;  %v20250_v6 = vld [vmem:[%s21474_s1 + $0x8] sm:$0x7] }
  0xef   : > { %17915 = vmatpush3.msk.msra.mxu0 %vm564_vm0, %v19481_v17  ;;  %17951 = vmatprep.mubr.msk.f32.mxu1 %vm559_vm1, %v4848_v12 }
  0xf0   : > { %17916 = vmatprep.mubr.msk.f32.mxu0 %vm559_vm1, %v4764_v9  ;;  %17919 = vmatprep.subr.msk.mxu0 %vm564_vm0, %v19499_v21 }
  0xf1   : > { %17954 = vmatprep.subr.msk.mxu1 %vm564_vm0, %v19460_v13 }
  0xf5   : > { %17952 = vmatmul.mubr.msk.f32.vlgmr.msra.gmra.mrb[8].mxu1 %vm559_vm1, %v4847_v11 }
  0xf6   : > { %17917 = vmatmul.mubr.msk.f32.vlgmr.msra.gmra.mrb[6].mxu0 %vm559_vm1, %v4763_v8  ;;  %17955 = vmatpush3.msk.msra.mxu1 %vm564_vm0, %v19460_v13 }
  0xf7   : > { %17920 = vmatpush3.msk.msra.mxu0 %vm564_vm0, %v19499_v21  ;;  %17956 = vmatprep.mubr.msk.f32.mxu1 %vm559_vm1, %v430_v16 }
  0xf8   : > { %17921 = vmatprep.mubr.msk.f32.mxu0 %vm559_vm1, %v4848_v12  ;;  %17924 = vmatprep.subr.msk.mxu0 %vm564_vm0, %v19517_v23 }
  0xf9   : > { %17959 = vmatprep.subr.msk.mxu1 %vm564_vm0, %v19481_v17 }
  0xfd   : > { %17957 = vmatmul.mubr.msk.f32.vlgmr.msra.gmra.mrb[8].mxu1 %vm559_vm1, %v19953_v18 }
  0xfe   : > { %17922 = vmatmul.mubr.msk.f32.vlgmr.msra.gmra.mrb[6].mxu0 %vm559_vm1, %v4847_v11  ;;  %17960 = vmatpush3.msk.msra.mxu1 %vm564_vm0, %v19481_v17 }
  0xff   : > { %17925 = vmatpush3.msk.msra.mxu0 %vm564_vm0, %v19517_v23  ;;  %17961 = vmatprep.mubr.msk.f32.mxu1 %vm559_vm1, %v5481_v22 }
 0x100   : > { %17926 = vmatprep.mubr.msk.f32.mxu0 %vm559_vm1, %v430_v16  ;;  %17929 = vmatprep.subr.msk.mxu0 %vm564_vm0, %v19536_v28 }
 0x101   : > { %17964 = vmatprep.subr.msk.mxu1 %vm564_vm0, %v19499_v21 }
 0x105   : > { %17962 = vmatmul.mubr.msk.f32.vlgmr.msra.gmra.mrb[8].mxu1 %vm559_vm1, %v5480_v20 }
 0x106   : > { %17927 = vmatmul.mubr.msk.f32.vlgmr.msra.gmra.mrb[6].mxu0 %vm559_vm1, %v19953_v18  ;;  %17965 = vmatpush3.msk.msra.mxu1 %vm564_vm0, %v19499_v21 }
 0x107   : > { %17930 = vmatpush3.msk.msra.mxu0 %vm564_vm0, %v19536_v28  ;;  %17966 = vmatprep.mubr.msk.f32.mxu1 %vm559_vm1, %v5565_v26 }
 0x108   : > { %17931 = vmatprep.mubr.msk.f32.mxu0 %vm559_vm1, %v5481_v22  ;;  %17934 = vmatprep.subr.msk.mxu0 %vm564_vm0, %v19554_v32 }
 0x109   : > { %17969 = vmatprep.subr.msk.mxu1 %vm564_vm0, %v19517_v23 }
 0x10d   : > { %17967 = vmatmul.mubr.msk.f32.vlgmr.msra.gmra.mrb[8].mxu1 %vm559_vm1, %v19974_v25 }
 0x10e   : > { %17932 = vmatmul.mubr.msk.f32.vlgmr.msra.gmra.mrb[6].mxu0 %vm559_vm1, %v5480_v20  ;;  %17970 = vmatpush3.msk.msra.mxu1 %vm564_vm0, %v19517_v23 }
 0x10f   : > { %17935 = vmatpush3.msk.msra.mxu0 %vm564_vm0, %v19554_v32  ;;  %17971 = vmatprep.mubr.msk.f32.mxu1 %vm559_vm1, %v19994_v27 }
 0x110   : > { %17936 = vmatprep.mubr.msk.f32.mxu0 %vm559_vm1, %v5565_v26  ;;  %17974 = vmatprep.subr.msk.mxu1 %vm564_vm0, %v19536_v28 }
 0x111   : > { %17984 = vmatprep.subr.msk.mxu0 %vm564_vm0, %v19431_v2 }
 0x115   : > { %17972 = vmatmul.mubr.msk.f32.vlgmr.msra.gmra.mrb[8].mxu1 %vm559_vm1, %v20007_v29 }
 0x116   : > { %17937 = vmatmul.mubr.msk.f32.vlgmr.msra.gmra.mrb[6].mxu0 %vm559_vm1, %v19974_v25  ;;  %17975 = vmatpush3.msk.msra.mxu1 %vm564_vm0, %v19536_v28 }
 0x117   : > { %17985 = vmatpush3.msk.msra.mxu0 %vm564_vm0, %v19431_v2  ;;  %17986 = vmatprep.mubr.msk.f32.mxu0 %vm559_vm1, %v5481_v22 }
 0x118   : > { %17989 = vmatprep.subr.msk.mxu0 %vm564_vm0, %v19419_v0  ;;  %17976 = vmatprep.mubr.msk.f32.mxu1 %vm559_vm1, %v20021_v33 }
 0x119   : > { %17979 = vmatprep.subr.msk.mxu1 %vm564_vm0, %v19554_v32 }
 0x11a   : > { %17987 = vmatmul.mubr.msk.f32.vlgmr.msra.gmra.mrb[8].mxu0 %vm559_vm1, %v5480_v20 }
 0x11b   : > { %17990 = vmatpush3.msk.msra.mxu0 %vm564_vm0, %v19419_v0  ;;  %17991 = vmatprep.mubr.msk.f32.mxu0 %vm559_vm1, %v430_v16 }
 0x11c   : > { %17994 = vmatprep.subr.msk.mxu0 %vm564_vm0, %v19426_v1 }
 0x11d   : > { %v17668_v38 = vpop.f32.mrb[0].mxu0  ;;  %17977 = vmatmul.mubr.msk.f32.vlgmr.msra.gmra.mrb[8].mxu1 %vm559_vm1, %v20015_v31 }
 0x11e   : > { %v19070_v39 = vadd.f32 %v17668_v38, %v19923_v14  ;;  %v1322_v40 = vpop.f32.mrb[1].mxu0  ;;  %17980 = vmatpush3.msk.msra.mxu1 %vm564_vm0, %v19554_v32  ;;  %17981 = vmatprep.mubr.msk.f32.mxu1 %vm559_vm1, %v20046_v36 }
 0x11f   : > { %v19071_v42 = vadd.f32 %v1322_v40, %v19928_v15  ;;  %18029 = vmatprep.subr.msk.mxu1 %vm564_vm0, %v19431_v2  ;;  %v20276_v15 = vld [vmem:[%s21474_s1 + $0xc] sm:$0x7] }
 0x120   : > { %v1340_v43 = vadd.f32 %v19070_v39, %v20053_v37 }
 0x121   : > { %v1339_v44 = vadd.f32 %v19071_v42, %v20053_v37  ;;  %v20335_v42 = vld [vmem:[%s21474_s1 + $0x14] sm:$0x7] }
 0x122   : > { %vm1342_vm6 = vcmp.ge.f32.partialorder %v1340_v43, 0.0  ;;  %v1350_v45 = vmul.f32 %v20065_v41, %v1340_v43  ;;  %17992 = vmatmul.mubr.msk.f32.vlgmr.msra.gmra.mrb[8].mxu0 %vm559_vm1, %v19953_v18 }
 0x123   : > { %vm1341_vm8 = vcmp.ge.f32.partialorder %v1339_v44, 0.0  ;;  %v1349_v46 = vmul.f32 %v20065_v41, %v1339_v44  ;;  %17995 = vmatpush3.msk.msra.mxu0 %vm564_vm0, %v19426_v1  ;;  %17996 = vmatprep.mubr.msk.f32.mxu0 %vm559_vm1, %v5565_v26 }
 0x124   : > { %v1352_v47 = vsel %vm1342_vm6, %v1340_v43, %v1350_v45  ;;  %17999 = vmatprep.subr.msk.mxu0 %vm564_vm0, %v19460_v13  ;;  %v438_v43 = vld [vmem:[%s19449_s14 + $0xc0] sm:$0xff]  ;;  %v20359_v45 = vld [vmem:[%s21474_s1 + $0x18] sm:$0x7] }
 0x125   : > { %10676 = vst.msk [vmem:[#allocation2 + $0x8] sm:$0x3f] %vm10675_vm7, %v1352_v47  ;;  %v1351_v48 = vsel %vm1341_vm8, %v1339_v44, %v1349_v46  ;;  %17982 = vmatmul.mubr.msk.f32.vlgmr.msra.gmra.mrb[8].mxu1 %vm559_vm1, %v20032_v35  ;;  %v20352_v44 = vld [vmem:[%s19449_s14 + $0xc8] sm:$0xff]  ;;  %v8347_v46 = vrot.slane %v438_v43, 1 }
 0x126   : > { %10674 = vst.msk [vmem:[#allocation2] sm:$0xff] %vm521_vm5, %v1351_v48  ;;  %18030 = vmatpush3.msk.msra.mxu1 %vm564_vm0, %v19431_v2  ;;  %18031 = vmatprep.mubr.msk.f32.mxu1 %vm559_vm1, %v20021_v33  ;;  %v8348_v47 = vrot.slane %v20352_v44, 1 }
 0x127   : > { %18034 = vmatprep.subr.msk.mxu1 %vm564_vm0, %v19419_v0 }
 0x128   : > { %v8349_v48 = vsel %vm555_vm2, %v8347_v46, %v8348_v47 }
 0x129   : > { %18032 = vmatmul.mubr.msk.f32.vlgmr.msra.gmra.mrb[10].mxu1 %vm559_vm1, %v20015_v31 }
 0x12a   : > { %17997 = vmatmul.mubr.msk.f32.vlgmr.msra.gmra.mrb[8].mxu0 %vm559_vm1, %v19974_v25  ;;  %18035 = vmatpush3.msk.msra.mxu1 %vm564_vm0, %v19419_v0 }
 0x12b   : > { %18000 = vmatpush3.msk.msra.mxu0 %vm564_vm0, %v19460_v13  ;;  %18036 = vmatprep.mubr.msk.f32.mxu1 %vm559_vm1, %v19994_v27 }
 0x12c   : > { %v17713_v2 = vpop.f32.mrb[2].mxu1  ;;  %18001 = vmatprep.mubr.msk.f32.mxu0 %vm559_vm1, %v19994_v27  ;;  %18004 = vmatprep.subr.msk.mxu0 %vm564_vm0, %v19481_v17  ;;  %v10717_v19 = vld [vmem:[#allocation2 + $0x8] sm:$0x7f] }
 0x12d   : > { %v2063_v49 = vadd.f32 %v17713_v2, %v20053_v37  ;;  %v2051_v50 = vpop.f32.mrb[3].mxu1  ;;  %18039 = vmatprep.subr.msk.mxu1 %vm564_vm0, %v19426_v1  ;;  %v10716_v22 = vld [vmem:[#allocation2] sm:$0xff]  ;;  %v20380_v2 = vld [vmem:[%s21474_s1 + $0x1c] sm:$0x7] }
 0x12e   : > { %v2062_v0 = vadd.f32 %v20053_v37, %v2051_v50  ;;  %v20385_v50 = vrot.slane %v20352_v44, 2 }
 0x12f   : > { %vm2065_vm9 = vcmp.ge.f32.partialorder %v2063_v49, 0.0  ;;  %v2067_v51 = vmul.f32 %v20065_v41, %v2063_v49 }
 0x130   : > { %vm2064_vm10 = vcmp.ge.f32.partialorder %v2062_v0, 0.0  ;;  %v2066_v52 = vmul.f32 %v20065_v41, %v2062_v0 }
 0x131   : > { %v2069_v53 = vsel %vm2065_vm9, %v2063_v49, %v2067_v51  ;;  %18037 = vmatmul.mubr.msk.f32.vlgmr.msra.gmra.mrb[10].mxu1 %vm559_vm1, %v20007_v29  ;;  %v8431_v49 = vrot.slane %v438_v43, 2  ;;  %v20403_v51 = vld [vmem:[%s21474_s1 + $0x20] sm:$0x7] }
 0x132   : > { %10679 = vst.msk [vmem:[#allocation2 + $0x18] sm:$0x3f] %vm10675_vm7, %v2069_v53  ;;  %v2068_v54 = vsel %vm2064_vm10, %v2062_v0, %v2066_v52  ;;  %18002 = vmatmul.mubr.msk.f32.vlgmr.msra.gmra.mrb[8].mxu0 %vm559_vm1, %v20007_v29  ;;  %18040 = vmatpush3.msk.msra.mxu1 %vm564_vm0, %v19426_v1  ;;  %v20140_v1 = vld [vmem:[%s19449_s14 + $0xa8] sm:$0xff]  ;;  %v20410_v52 = vld [vmem:[%s19449_s14 + $0xd0] sm:$0xff]  ;;  %v20423_v53 = vld [vmem:[%s19449_s14 + $0xd8] sm:$0xff]  ;;  %vm10859_vm10 = vcmask 1041408  }
 0x133   : > { %10678 = vst.msk [vmem:[#allocation2 + $0x10] sm:$0xff] %vm521_vm5, %v2068_v54  ;;  %18005 = vmatpush3.msk.msra.mxu0 %vm564_vm0, %v19481_v17  ;;  %18041 = vmatprep.mubr.msk.f32.mxu1 %vm559_vm1, %v20046_v36  ;;  %v6914_v57 = vrot.slane %v20140_v1, 1  ;;  %v20163_v59 = vrot.slane %v20140_v1, 2  ;;  %v8433_v0 = vsel %vm725_vm3, %v8431_v49, %v20385_v50  ;;  %v9064_v54 = vrot.slane %v20410_v52, 1 }
 0x134   : > { %18006 = vmatprep.mubr.msk.f32.mxu0 %vm559_vm1, %v20021_v33  ;;  %18009 = vmatprep.subr.msk.mxu0 %vm564_vm0, %v19499_v21 }
 0x135   : > { %18044 = vmatprep.subr.msk.mxu1 %vm564_vm0, %v19460_v13 }
 0x139   : > { %18042 = vmatmul.mubr.msk.f32.vlgmr.msra.gmra.mrb[10].mxu1 %vm559_vm1, %v20032_v35  ;;  %v10731_v16 = vld [vmem:[#allocation2 + $0x18] sm:$0x7f] }
 0x13a   : > { %18007 = vmatmul.mubr.msk.f32.vlgmr.msra.gmra.mrb[8].mxu0 %vm559_vm1, %v20015_v31  ;;  %18045 = vmatpush3.msk.msra.mxu1 %vm564_vm0, %v19460_v13  ;;  %v6915_v13 = vsel %vm555_vm2, %v6913_v56, %v6914_v57  ;;  %v10730_v18 = vld [vmem:[#allocation2 + $0x10] sm:$0xff]  ;;  %v10745_v20 = vmax.f32 %v10717_v19, %v10731_v16  ;;  %v9148_v56 = vrot.slane %v20410_v52, 2 }
 0x13b   : > { %18010 = vmatpush3.msk.msra.mxu0 %vm564_vm0, %v19499_v21  ;;  %18046 = vmatprep.mubr.msk.f32.mxu1 %vm559_vm1, %v434_v55  ;;  %v10744_v24 = vmax.f32 %v10716_v22, %v10730_v18  ;;  %v20306_v31 = vld [vmem:[%s21474_s1 + $0x10] sm:$0x7]  ;;  %v442_v22 = vld [vmem:[%s19449_s14 + $0xe0] sm:$0xff] }
 0x13c   : > { %18011 = vmatprep.mubr.msk.f32.mxu0 %vm559_vm1, %v20046_v36  ;;  %18014 = vmatprep.subr.msk.mxu0 %vm564_vm0, %v19517_v23 }
 0x13d   : > { %18049 = vmatprep.subr.msk.mxu1 %vm564_vm0, %v19481_v17 }
 0x141   : > { %18047 = vmatmul.mubr.msk.f32.vlgmr.msra.gmra.mrb[10].mxu1 %vm559_vm1, %v20140_v1 }
 0x142   : > { %18012 = vmatmul.mubr.msk.f32.vlgmr.msra.gmra.mrb[8].mxu0 %vm559_vm1, %v20032_v35  ;;  %18050 = vmatpush3.msk.msra.mxu1 %vm564_vm0, %v19481_v17  ;;  %v6999_v17 = vsel %vm725_vm3, %v6997_v58, %v20163_v59 }
 0x143   : > { %18015 = vmatpush3.msk.msra.mxu0 %vm564_vm0, %v19517_v23  ;;  %18051 = vmatprep.mubr.msk.f32.mxu1 %vm559_vm1, %v6915_v13 }
 0x144   : > { %18016 = vmatprep.mubr.msk.f32.mxu0 %vm559_vm1, %v434_v55  ;;  %18019 = vmatprep.subr.msk.mxu0 %vm564_vm0, %v19536_v28 }
 0x145   : > { %18054 = vmatprep.subr.msk.mxu1 %vm564_vm0, %v19499_v21 }
 0x149   : > { %18052 = vmatmul.mubr.msk.f32.vlgmr.msra.gmra.mrb[10].mxu1 %vm559_vm1, %v6914_v57 }
 0x14a   : > { %18017 = vmatmul.mubr.msk.f32.vlgmr.msra.gmra.mrb[8].mxu0 %vm559_vm1, %v20140_v1  ;;  %18055 = vmatpush3.msk.msra.mxu1 %vm564_vm0, %v19499_v21  ;;  %v20196_v21 = vld [vmem:[%s19449_s14 + $0xb8] sm:$0xff] }
 0x14b   : > { %18020 = vmatpush3.msk.msra.mxu0 %vm564_vm0, %v19536_v28  ;;  %18056 = vmatprep.mubr.msk.f32.mxu1 %vm559_vm1, %v6999_v17  ;;  %v20209_v62 = vrot.slane %v20196_v21, 1  ;;  %v20226_v4 = vrot.slane %v20196_v21, 2 }
 0x14c   : > { %18021 = vmatprep.mubr.msk.f32.mxu0 %vm559_vm1, %v6915_v13  ;;  %18024 = vmatprep.subr.msk.mxu0 %vm564_vm0, %v19554_v32 }
 0x14d   : > { %18059 = vmatprep.subr.msk.mxu1 %vm564_vm0, %v19517_v23 }
 0x151   : > { %18057 = vmatmul.mubr.msk.f32.vlgmr.msra.gmra.mrb[10].mxu1 %vm559_vm1, %v20163_v59 }
 0x152   : > { %18022 = vmatmul.mubr.msk.f32.vlgmr.msra.gmra.mrb[8].mxu0 %vm559_vm1, %v6914_v57  ;;  %18060 = vmatpush3.msk.msra.mxu1 %vm564_vm0, %v19517_v23  ;;  %v7630_v23 = vrot.slane %v20183_v60, 1 }
 0x153   : > { %18025 = vmatpush3.msk.msra.mxu0 %vm564_vm0, %v19554_v32  ;;  %18061 = vmatprep.mubr.msk.f32.mxu1 %vm559_vm1, %v20183_v60 }
 0x154   : > { %18026 = vmatprep.mubr.msk.f32.mxu0 %vm559_vm1, %v6999_v17  ;;  %18064 = vmatprep.subr.msk.mxu1 %vm564_vm0, %v19536_v28  ;;  %v20215_v63 = vsel %vm555_vm2, %v7630_v23, %v20209_v62 }
 0x155   : > { %18074 = vmatprep.subr.msk.mxu0 %vm564_vm0, %v20203_v61 }
 0x159   : > { %18062 = vmatmul.mubr.msk.f32.vlgmr.msra.gmra.mrb[10].mxu1 %vm559_vm1, %v20196_v21 }
 0x15a   : > { %18027 = vmatmul.mubr.msk.f32.vlgmr.msra.gmra.mrb[8].mxu0 %vm559_vm1, %v20163_v59  ;;  %18065 = vmatpush3.msk.msra.mxu1 %vm564_vm0, %v19536_v28  ;;  %v20245_v28 = vsel %vm725_vm3, %v7714_v3, %v20226_v4 }
 0x15b   : > { %18075 = vmatpush3.msk.msra.mxu0 %vm564_vm0, %v20203_v61  ;;  %18076 = vmatprep.mubr.msk.f32.mxu0 %vm559_vm1, %v6915_v13 }
 0x15c   : > { %18079 = vmatprep.subr.msk.mxu0 %vm564_vm0, %v20231_v5  ;;  %18066 = vmatprep.mubr.msk.f32.mxu1 %vm559_vm1, %v20215_v63 }
 0x15d   : > { %18069 = vmatprep.subr.msk.mxu1 %vm564_vm0, %v19554_v32 }
 0x15e   : > { %18077 = vmatmul.mubr.msk.f32.vlgmr.msra.gmra.mrb[10].mxu0 %vm559_vm1, %v6914_v57  ;;  %v20448_v57 = vrot.slane %v20423_v53, 2 }
 0x15f   : > { %18080 = vmatpush3.msk.msra.mxu0 %vm564_vm0, %v20231_v5  ;;  %18081 = vmatprep.mubr.msk.f32.mxu0 %vm559_vm1, %v434_v55  ;;  %v20431_v55 = vrot.slane %v20423_v53, 1 }
 0x160   : > { %18084 = vmatprep.subr.msk.mxu0 %vm564_vm0, %v20250_v6  ;;  %v20462_v13 = vsel %vm725_vm3, %v9148_v56, %v20448_v57 }
 0x161   : > { %v17758_v7 = vpop.f32.mrb[2].mxu0  ;;  %18067 = vmatmul.mubr.msk.f32.vlgmr.msra.gmra.mrb[10].mxu1 %vm559_vm1, %v20209_v62 }
 0x162   : > { %v2780_v8 = vadd.f32 %v17758_v7, %v20053_v37  ;;  %v2768_v9 = vpop.f32.mrb[3].mxu0  ;;  %18070 = vmatpush3.msk.msra.mxu1 %vm564_vm0, %v19554_v32  ;;  %18071 = vmatprep.mubr.msk.f32.mxu1 %vm559_vm1, %v20245_v28 }
 0x163   : > { %v2779_v10 = vadd.f32 %v20053_v37, %v2768_v9  ;;  %18119 = vmatprep.subr.msk.mxu1 %vm564_vm0, %v20203_v61 }
 0x164   : > { %vm2782_vm11 = vcmp.ge.f32.partialorder %v2780_v8, 0.0  ;;  %v2784_v11 = vmul.f32 %v20065_v41, %v2780_v8 }
 0x165   : > { %vm2781_vm12 = vcmp.ge.f32.partialorder %v2779_v10, 0.0  ;;  %v2783_v12 = vmul.f32 %v20065_v41, %v2779_v10 }
 0x166   : > { %v2786_v14 = vsel %vm2782_vm11, %v2780_v8, %v2784_v11  ;;  %18082 = vmatmul.mubr.msk.f32.vlgmr.msra.gmra.mrb[10].mxu0 %vm559_vm1, %v20140_v1  ;;  %v20437_v1 = vsel %vm555_vm2, %v9064_v54, %v20431_v55  ;;  %vm19340_vm11 = vmmov 1  }
 0x167   : > { %10682 = vst.msk [vmem:[#allocation2 + $0x28] sm:$0x3f] %vm10675_vm7, %v2786_v14  ;;  %v2785_v32 = vsel %vm2781_vm12, %v2779_v10, %v2783_v12  ;;  %18085 = vmatpush3.msk.msra.mxu0 %vm564_vm0, %v20250_v6  ;;  %18086 = vmatprep.mubr.msk.f32.mxu0 %vm559_vm1, %v6999_v17  ;;  %vm20607_vm12 = vmpackc.low %vm10859_vm10, %vm19340_vm11 }
 0x168   : > { %10681 = vst.msk [vmem:[#allocation2 + $0x20] sm:$0xff] %vm521_vm5, %v2785_v32  ;;  %18089 = vmatprep.subr.msk.mxu0 %vm564_vm0, %v20276_v15 }
 0x169   : > { %18072 = vmatmul.mubr.msk.f32.vlgmr.msra.gmra.mrb[10].mxu1 %vm559_vm1, %v20226_v4 }
 0x16a   : > { %18120 = vmatpush3.msk.msra.mxu1 %vm564_vm0, %v20203_v61  ;;  %18121 = vmatprep.mubr.msk.f32.mxu1 %vm559_vm1, %v20215_v63 }
 0x16b   : > { %18124 = vmatprep.subr.msk.mxu1 %vm564_vm0, %v20231_v5 }
 0x16d   : > { %18122 = vmatmul.mubr.msk.f32.vlgmr.msra.gmra.mrb[12].mxu1 %vm559_vm1, %v20209_v62 }
 0x16e   : > { %v10759_v25 = vld [vmem:[#allocation2 + $0x28] sm:$0x7f]  ;;  %18087 = vmatmul.mubr.msk.f32.vlgmr.msra.gmra.mrb[10].mxu0 %vm559_vm1, %v20163_v59  ;;  %18125 = vmatpush3.msk.msra.mxu1 %vm564_vm0, %v20231_v5 }
 0x16f   : > { %v10773_v26 = vmax.f32 %v10745_v20, %v10759_v25  ;;  %v20294_v27 = vld [vmem:[#allocation2 + $0x20] sm:$0xff]  ;;  %18090 = vmatpush3.msk.msra.mxu0 %vm564_vm0, %v20276_v15  ;;  %18126 = vmatprep.mubr.msk.f32.mxu1 %vm559_vm1, %v20183_v60 }
 0x170   : > { %v10772_v29 = vmax.f32 %v10744_v24, %v20294_v27  ;;  %v17803_v30 = vpop.f32.mrb[4].mxu1  ;;  %18091 = vmatprep.mubr.msk.f32.mxu0 %vm559_vm1, %v20183_v60  ;;  %18094 = vmatprep.subr.msk.mxu0 %vm564_vm0, %v20306_v31  ;;  %v9781_v24 = vrot.slane %v442_v22, 1 }
 0x171   : > { %10787 = vst.msk [vmem:[#allocation3 + $0x8] sm:$0x7f] %vm523_vm4, %v10773_v26  ;;  %v3497_v33 = vadd.f32 %v17803_v30, %v20053_v37  ;;  %v3485_v34 = vpop.f32.mrb[5].mxu1  ;;  %18129 = vmatprep.subr.msk.mxu1 %vm564_vm0, %v20250_v6  ;;  %v444_v30 = vld [vmem:[%s19449_s14 + $0xf0] sm:$0xff] }
 0x172   : > { %10786 = vst.msk [vmem:[#allocation3] sm:$0xff] %vm521_vm5, %v10772_v29  ;;  %v3496_v35 = vadd.f32 %v20053_v37, %v3485_v34  ;;  %v20593_v34 = vld [vmem:[%s19449_s14 + $0xf8] sm:$0xff]  ;;  %v10582_v56 = vrot.slane %v444_v30, 2 }
 0x173   : > { %vm3499_vm13 = vcmp.ge.f32.partialorder %v3497_v33, 0.0  ;;  %v3501_v36 = vmul.f32 %v20065_v41, %v3497_v33 }
 0x174   : > { %vm3498_vm14 = vcmp.ge.f32.partialorder %v3496_v35, 0.0  ;;  %v3500_v38 = vmul.f32 %v20065_v41, %v3496_v35 }
 0x175   : > { %v3503_v39 = vsel %vm3499_vm13, %v3497_v33, %v3501_v36  ;;  %18127 = vmatmul.mubr.msk.f32.vlgmr.msra.gmra.mrb[12].mxu1 %vm559_vm1, %v20196_v21  ;;  %v16475_v36 = vld [vmem:[%s21477_s4 + $0x18] sm:$0x3]  ;;  %vm19341_vm13 = vmmov 0  }
 0x176   : > { %10685 = vst.msk [vmem:[#allocation2 + $0x38] sm:$0x3f] %vm10675_vm7, %v3503_v39  ;;  %v3502_v40 = vsel %vm3498_vm14, %v3496_v35, %v3500_v38  ;;  %18092 = vmatmul.mubr.msk.f32.vlgmr.msra.gmra.mrb[10].mxu0 %vm559_vm1, %v20196_v21  ;;  %18130 = vmatpush3.msk.msra.mxu1 %vm564_vm0, %v20250_v6  ;;  %v16474_v35 = vld [vmem:[%s21477_s4 + $0x10] sm:$0xff]  ;;  %v10498_v39 = vrot.slane %v444_v30, 1 }
 0x177   : > { %10684 = vst.msk [vmem:[#allocation2 + $0x30] sm:$0xff] %vm521_vm5, %v3502_v40  ;;  %18095 = vmatpush3.msk.msra.mxu0 %vm564_vm0, %v20306_v31  ;;  %18131 = vmatprep.mubr.msk.f32.mxu1 %vm559_vm1, %v20245_v28  ;;  %v19339_v40 = vmov 0.0|0.0  }
 0x178   : > { %18096 = vmatprep.mubr.msk.f32.mxu0 %vm559_vm1, %v20215_v63  ;;  %18099 = vmatprep.subr.msk.mxu0 %vm564_vm0, %v20335_v42 }
 0x179   : > { %18134 = vmatprep.subr.msk.mxu1 %vm564_vm0, %v20276_v15  ;;  %v10814_v33 = vld [vmem:[#allocation3 + $0x1] ss:$2 sm:$0x7f] }
 0x17d   : > { %18132 = vmatmul.mubr.msk.f32.vlgmr.msra.gmra.mrb[12].mxu1 %vm559_vm1, %v20226_v4  ;;  %v10733_v3 = vld [vmem:[#allocation2 + $0x38] sm:$0x7f] }
 0x17e   : > { %18097 = vmatmul.mubr.msk.f32.vlgmr.msra.gmra.mrb[10].mxu0 %vm559_vm1, %v20209_v62  ;;  %18135 = vmatpush3.msk.msra.mxu1 %vm564_vm0, %v20276_v15 }
 0x17f   : > { %18100 = vmatpush3.msk.msra.mxu0 %vm564_vm0, %v20335_v42  ;;  %18136 = vmatprep.mubr.msk.f32.mxu1 %vm559_vm1, %v438_v43 }
 0x180   : > { %18101 = vmatprep.mubr.msk.f32.mxu0 %vm559_vm1, %v20245_v28  ;;  %18104 = vmatprep.subr.msk.mxu0 %vm564_vm0, %v20359_v45  ;;  %v10719_v28 = vld [vmem:[#allocation2 + $0x28] sm:$0x7f] }
 0x181   : > { %18139 = vmatprep.subr.msk.mxu1 %vm564_vm0, %v20306_v31  ;;  %v10747_v7 = vmax.f32 %v10719_v28, %v10733_v3  ;;  %v469_v28 = vld [vmem:[%s21477_s4] sm:$0xff] }
 0x185   : > { %18137 = vmatmul.mubr.msk.f32.vlgmr.msra.gmra.mrb[12].mxu1 %vm559_vm1, %v20352_v44 }
 0x186   : > { %18102 = vmatmul.mubr.msk.f32.vlgmr.msra.gmra.mrb[10].mxu0 %vm559_vm1, %v20226_v4  ;;  %18140 = vmatpush3.msk.msra.mxu1 %vm564_vm0, %v20306_v31  ;;  %v10732_v4 = vld [vmem:[#allocation2 + $0x30] sm:$0xff] }
 0x187   : > { %18105 = vmatpush3.msk.msra.mxu0 %vm564_vm0, %v20359_v45  ;;  %18141 = vmatprep.mubr.msk.f32.mxu1 %vm559_vm1, %v8349_v48  ;;  %v10746_v8 = vmax.f32 %v20294_v27, %v10732_v4 }
 0x188   : > { %18106 = vmatprep.mubr.msk.f32.mxu0 %vm559_vm1, %v438_v43  ;;  %18109 = vmatprep.subr.msk.mxu0 %vm564_vm0, %v20380_v2 }
 0x189   : > { %18144 = vmatprep.subr.msk.mxu1 %vm564_vm0, %v20335_v42 }
 0x18d   : > { %18142 = vmatmul.mubr.msk.f32.vlgmr.msra.gmra.mrb[12].mxu1 %vm559_vm1, %v8348_v47 }
 0x18e   : > { %18107 = vmatmul.mubr.msk.f32.vlgmr.msra.gmra.mrb[10].mxu0 %vm559_vm1, %v20352_v44  ;;  %18145 = vmatpush3.msk.msra.mxu1 %vm564_vm0, %v20335_v42 }
 0x18f   : > { %18110 = vmatpush3.msk.msra.mxu0 %vm564_vm0, %v20380_v2  ;;  %18146 = vmatprep.mubr.msk.f32.mxu1 %vm559_vm1, %v8433_v0 }
 0x190   : > { %18111 = vmatprep.mubr.msk.f32.mxu0 %vm559_vm1, %v8349_v48  ;;  %18114 = vmatprep.subr.msk.mxu0 %vm564_vm0, %v20403_v51 }
 0x191   : > { %18149 = vmatprep.subr.msk.mxu1 %vm564_vm0, %v20359_v45 }
 0x195   : > { %18147 = vmatmul.mubr.msk.f32.vlgmr.msra.gmra.mrb[12].mxu1 %vm559_vm1, %v20385_v50 }
 0x196   : > { %18112 = vmatmul.mubr.msk.f32.vlgmr.msra.gmra.mrb[10].mxu0 %vm559_vm1, %v8348_v47  ;;  %18150 = vmatpush3.msk.msra.mxu1 %vm564_vm0, %v20359_v45 }
 0x197   : > { %18115 = vmatpush3.msk.msra.mxu0 %vm564_vm0, %v20403_v51  ;;  %18151 = vmatprep.mubr.msk.f32.mxu1 %vm559_vm1, %v20410_v52 }
 0x198   : > { %18116 = vmatprep.mubr.msk.f32.mxu0 %vm559_vm1, %v8433_v0  ;;  %18154 = vmatprep.subr.msk.mxu1 %vm564_vm0, %v20380_v2 }
 0x199   : > { %18164 = vmatprep.subr.msk.mxu0 %vm564_vm0, %v20203_v61 }
 0x19d   : > { %18152 = vmatmul.mubr.msk.f32.vlgmr.msra.gmra.mrb[12].mxu1 %vm559_vm1, %v20423_v53 }
 0x19e   : > { %18117 = vmatmul.mubr.msk.f32.vlgmr.msra.gmra.mrb[10].mxu0 %vm559_vm1, %v20385_v50  ;;  %18155 = vmatpush3.msk.msra.mxu1 %vm564_vm0, %v20380_v2 }
 0x19f   : > { %18165 = vmatpush3.msk.msra.mxu0 %vm564_vm0, %v20203_v61  ;;  %18166 = vmatprep.mubr.msk.f32.mxu0 %vm559_vm1, %v8349_v48  ;;  %v16477_v48 = vld [vmem:[%s21477_s4 + $0x28] sm:$0x3] }
 0x1a0   : > { %18169 = vmatprep.subr.msk.mxu0 %vm564_vm0, %v20231_v5  ;;  %18156 = vmatprep.mubr.msk.f32.mxu1 %vm559_vm1, %v20437_v1 }
 0x1a1   : > { %18159 = vmatprep.subr.msk.mxu1 %vm564_vm0, %v20403_v51 }
 0x1a2   : > { %18167 = vmatmul.mubr.msk.f32.vlgmr.msra.gmra.mrb[12].mxu0 %vm559_vm1, %v8348_v47  ;;  %v16476_v47 = vld [vmem:[%s21477_s4 + $0x20] sm:$0xff] }
 0x1a3   : > { %18170 = vmatpush3.msk.msra.mxu0 %vm564_vm0, %v20231_v5  ;;  %18171 = vmatprep.mubr.msk.f32.mxu0 %vm559_vm1, %v438_v43  ;;  %v20605_v43 = vpack.c.bf16 %v16475_v36, %v16474_v35 }
 0x1a4   : > { %18174 = vmatprep.subr.msk.mxu0 %vm564_vm0, %v20250_v6 }
 0x1a5   : > { %v17848_v58 = vpop.f32.mrb[4].mxu0  ;;  %18157 = vmatmul.mubr.msk.f32.vlgmr.msra.gmra.mrb[12].mxu1 %vm559_vm1, %v20431_v55 }
 0x1a6   : > { %v4214_v59 = vadd.f32 %v17848_v58, %v20053_v37  ;;  %v4202_v17 = vpop.f32.mrb[5].mxu0  ;;  %18160 = vmatpush3.msk.msra.mxu1 %vm564_vm0, %v20403_v51  ;;  %18161 = vmatprep.mubr.msk.f32.mxu1 %vm559_vm1, %v20462_v13 }
 0x1a7   : > { %v4213_v60 = vadd.f32 %v20053_v37, %v4202_v17  ;;  %18209 = vmatprep.subr.msk.mxu1 %vm564_vm0, %v20203_v61 }
 0x1a8   : > { %vm4216_vm15 = vcmp.ge.f32.partialorder %v4214_v59, 0.0  ;;  %v4218_v21 = vmul.f32 %v20065_v41, %v4214_v59 }
 0x1a9   : > { %vm4215_vm6 = vcmp.ge.f32.partialorder %v4213_v60, 0.0  ;;  %v4217_v23 = vmul.f32 %v20065_v41, %v4213_v60 }
 0x1aa   : > { %v4220_v62 = vsel %vm4216_vm15, %v4214_v59, %v4218_v21  ;;  %18172 = vmatmul.mubr.msk.f32.vlgmr.msra.gmra.mrb[12].mxu0 %vm559_vm1, %v20352_v44  ;;  %v10835_v44 = vld [vmem:[#allocation3 + $0x2] ss:$2 sm:$0x7f]  ;;  %v16485_v21 = vld [vmem:[%s21477_s4 + $0x68] sm:$0x3] }
 0x1ab   : > { %10688 = vst.msk [vmem:[#allocation2 + $0x48] sm:$0x3f] %vm10675_vm7, %v4220_v62  ;;  %v4219_v63 = vsel %vm4215_vm6, %v4213_v60, %v4217_v23  ;;  %18175 = vmatpush3.msk.msra.mxu0 %vm564_vm0, %v20250_v6  ;;  %18176 = vmatprep.mubr.msk.f32.mxu0 %vm559_vm1, %v8433_v0  ;;  %v16484_v60 = vld [vmem:[%s21477_s4 + $0x60] sm:$0xff] }
 0x1ac   : > { %10687 = vst.msk [vmem:[#allocation2 + $0x40] sm:$0xff] %vm521_vm5, %v4219_v63  ;;  %18179 = vmatprep.subr.msk.mxu0 %vm564_vm0, %v20276_v15 }
 0x1ad   : > { %18162 = vmatmul.mubr.msk.f32.vlgmr.msra.gmra.mrb[12].mxu1 %vm559_vm1, %v20448_v57 }
 0x1ae   : > { %18210 = vmatpush3.msk.msra.mxu1 %vm564_vm0, %v20203_v61  ;;  %18211 = vmatprep.mubr.msk.f32.mxu1 %vm559_vm1, %v20437_v1 }
 0x1af   : > { %18214 = vmatprep.subr.msk.mxu1 %vm564_vm0, %v20231_v5 }
 0x1b1   : > { %18212 = vmatmul.mubr.msk.f32.vlgmr.msra.gmra.mrb[14].mxu1 %vm559_vm1, %v20431_v55 }
 0x1b2   : > { %v10761_v9 = vld [vmem:[#allocation2 + $0x48] sm:$0x7f]  ;;  %18177 = vmatmul.mubr.msk.f32.vlgmr.msra.gmra.mrb[12].mxu0 %vm559_vm1, %v20385_v50  ;;  %18215 = vmatpush3.msk.msra.mxu1 %vm564_vm0, %v20231_v5 }
 0x1b3   : > { %v10775_v61 = vmax.f32 %v10747_v7, %v10761_v9  ;;  %v20502_v10 = vld [vmem:[#allocation2 + $0x40] sm:$0xff]  ;;  %18180 = vmatpush3.msk.msra.mxu0 %vm564_vm0, %v20276_v15  ;;  %18216 = vmatprep.mubr.msk.f32.mxu1 %vm559_vm1, %v20410_v52  ;;  %v470_v7 = vld [vmem:[%s21477_s4 + $0x8] sm:$0x3] }
 0x1b4   : > { %v10774_v11 = vmax.f32 %v10746_v8, %v20502_v10  ;;  %v17893_v12 = vpop.f32.mrb[6].mxu1  ;;  %18181 = vmatprep.mubr.msk.f32.mxu0 %vm559_vm1, %v20410_v52  ;;  %18184 = vmatprep.subr.msk.mxu0 %vm564_vm0, %v20306_v31  ;;  %v19342_v52 = vmov 0.0  }
 0x1b5   : > { %10789 = vst.msk [vmem:[#allocation3 + $0x18] sm:$0x7f] %vm523_vm4, %v10775_v61  ;;  %v4931_v5 = vadd.f32 %v17893_v12, %v20053_v37  ;;  %v4919_v14 = vpop.f32.mrb[7].mxu1  ;;  %18219 = vmatprep.subr.msk.mxu1 %vm564_vm0, %v20250_v6  ;;  %v20691_v12 = vpack.c.bf16 %v470_v7, %v469_v28 }
 0x1b6   : > { %10788 = vst.msk [vmem:[#allocation3 + $0x10] sm:$0xff] %vm521_vm5, %v10774_v11  ;;  %v4930_v32 = vadd.f32 %v20053_v37, %v4919_v14  ;;  %v16478_v14 = vld [vmem:[%s21477_s4 + $0x30] sm:$0xff] }
 0x1b7   : > { %vm4933_vm8 = vcmp.ge.f32.partialorder %v4931_v5, 0.0  ;;  %v4935_v16 = vmul.f32 %v20065_v41, %v4931_v5 }
 0x1b8   : > { %vm4932_vm9 = vcmp.ge.f32.partialorder %v4930_v32, 0.0  ;;  %v4934_v18 = vmul.f32 %v20065_v41, %v4930_v32 }
 0x1b9   : > { %v4937_v19 = vsel %vm4933_vm8, %v4931_v5, %v4935_v16  ;;  %18217 = vmatmul.mubr.msk.f32.vlgmr.msra.gmra.mrb[14].mxu1 %vm559_vm1, %v20423_v53 }
 0x1ba   : > { %10691 = vst.msk [vmem:[#allocation2 + $0x58] sm:$0x3f] %vm10675_vm7, %v4937_v19  ;;  %v4936_v20 = vsel %vm4932_vm9, %v4930_v32, %v4934_v18  ;;  %18182 = vmatmul.mubr.msk.f32.vlgmr.msra.gmra.mrb[12].mxu0 %vm559_vm1, %v20423_v53  ;;  %18220 = vmatpush3.msk.msra.mxu1 %vm564_vm0, %v20250_v6  ;;  %v443_v6 = vld [vmem:[%s19449_s14 + $0xe8] sm:$0xff]  ;;  %v20630_v53 = vpack.c.bf16 %v16477_v48, %v16476_v47  ;;  %v16479_v32 = vld [vmem:[%s21477_s4 + $0x38] sm:$0x3] }
 0x1bb   : > { %10690 = vst.msk [vmem:[#allocation2 + $0x50] sm:$0xff] %vm521_vm5, %v4936_v20  ;;  %18185 = vmatpush3.msk.msra.mxu0 %vm564_vm0, %v20306_v31  ;;  %18221 = vmatprep.mubr.msk.f32.mxu1 %vm559_vm1, %v20462_v13  ;;  %v9782_v25 = vrot.slane %v443_v6, 1  ;;  %v9866_v27 = vrot.slane %v443_v6, 2  ;;  %v20713_v18 = vpack.c.bf16 %v16479_v32, %v16478_v14  ;;  %v16482_v20 = vld [vmem:[%s21477_s4 + $0x50] sm:$0xff]  ;;  %v16489_v47 = vld [vmem:[%s21477_s4 + $0x88] sm:$0x3] }
 0x1bc   : > { %18186 = vmatprep.mubr.msk.f32.mxu0 %vm559_vm1, %v20437_v1  ;;  %18189 = vmatprep.subr.msk.mxu0 %vm564_vm0, %v20335_v42 }
 0x1bd   : > { %18224 = vmatprep.subr.msk.mxu1 %vm564_vm0, %v20276_v15  ;;  %v9783_v26 = vsel %vm555_vm2, %v9781_v24, %v9782_v25  ;;  %v10802_v50 = vld [vmem:[#allocation3 + $0x10] ss:$2 sm:$0x7f]  ;;  %v10816_v0 = vld [vmem:[#allocation3 + $0x11] ss:$2 sm:$0x7f] }
 0x1be   : > { %v10828_v1 = vmax.f32 %v10802_v50, %v10816_v0  ;;  %v10837_v58 = vld [vmem:[#allocation3 + $0x12] ss:$2 sm:$0x7f] }
 0x1c0   : > { %v20654_v17 = vmax.f32 %v10828_v1, %v10837_v58 }
 0x1c1   : > { %18222 = vmatmul.mubr.msk.f32.vlgmr.msra.gmra.mrb[14].mxu1 %vm559_vm1, %v20448_v57  ;;  %v10735_v16 = vld [vmem:[#allocation2 + $0x58] sm:$0x7f] }
 0x1c2   : > { %18187 = vmatmul.mubr.msk.f32.vlgmr.msra.gmra.mrb[12].mxu0 %vm559_vm1, %v20431_v55  ;;  %18225 = vmatpush3.msk.msra.mxu1 %vm564_vm0, %v20276_v15  ;;  %v9865_v15 = vrot.slane %v442_v22, 2  ;;  %v16481_v55 = vld [vmem:[%s21477_s4 + $0x48] sm:$0x3]  ;;  %v11162_v9 = vrot.slane %v20654_v17, 1  ;;  %v10734_v19 = vld [vmem:[#allocation2 + $0x50] sm:$0xff] }
 0x1c3   : > { %18190 = vmatpush3.msk.msra.mxu0 %vm564_vm0, %v20335_v42  ;;  %18226 = vmatprep.mubr.msk.f32.mxu1 %vm559_vm1, %v442_v22 }
 0x1c4   : > { %18191 = vmatprep.mubr.msk.f32.mxu0 %vm559_vm1, %v20462_v13  ;;  %18194 = vmatprep.subr.msk.mxu0 %vm564_vm0, %v20359_v45  ;;  %v9867_v29 = vsel %vm725_vm3, %v9865_v15, %v9866_v27 }
 0x1c5   : > { %18229 = vmatprep.subr.msk.mxu1 %vm564_vm0, %v20306_v31 }
 0x1c9   : > { %18227 = vmatmul.mubr.msk.f32.vlgmr.msra.gmra.mrb[14].mxu1 %vm559_vm1, %v443_v6 }
 0x1ca   : > { %18192 = vmatmul.mubr.msk.f32.vlgmr.msra.gmra.mrb[12].mxu0 %vm559_vm1, %v20448_v57  ;;  %18230 = vmatpush3.msk.msra.mxu1 %vm564_vm0, %v20306_v31  ;;  %v10800_v31 = vld [vmem:[#allocation3] ss:$2 sm:$0x7f]  ;;  %v10583_v57 = vrot.slane %v20593_v34, 2 }
 0x1cb   : > { %18195 = vmatpush3.msk.msra.mxu0 %vm564_vm0, %v20359_v45  ;;  %18231 = vmatprep.mubr.msk.f32.mxu1 %vm559_vm1, %v9783_v26  ;;  %v10827_v38 = vmax.f32 %v10800_v31, %v10814_v33 }
 0x1cc   : > { %18196 = vmatprep.mubr.msk.f32.mxu0 %vm559_vm1, %v442_v22  ;;  %18199 = vmatprep.subr.msk.mxu0 %vm564_vm0, %v20380_v2  ;;  %v10584_v62 = vsel %vm725_vm3, %v10582_v56, %v10583_v57  ;;  %v16483_v22 = vld [vmem:[%s21477_s4 + $0x58] sm:$0x3] }
 0x1cd   : > { %18234 = vmatprep.subr.msk.mxu1 %vm564_vm0, %v20335_v42  ;;  %v20611_v46 = vmax.f32 %v10827_v38, %v10835_v44  ;;  %v20730_v15 = vpack.c.bf16 %v16483_v22, %v16482_v20 }
 0x1cf   : > { %v10856_v54 = vrot.slane %v20611_v46, 1  ;;  %v11008_v59 = vrot.slane %v20611_v46, 2 }
 0x1d1   : > { %18232 = vmatmul.mubr.msk.f32.vlgmr.msra.gmra.mrb[14].mxu1 %vm559_vm1, %v9782_v25 }
 0x1d2   : > { %18197 = vmatmul.mubr.msk.f32.vlgmr.msra.gmra.mrb[12].mxu0 %vm559_vm1, %v443_v6  ;;  %18235 = vmatpush3.msk.msra.mxu1 %vm564_vm0, %v20335_v42  ;;  %v10499_v42 = vrot.slane %v20593_v34, 1  ;;  %v10721_v6 = vld [vmem:[#allocation2 + $0x48] sm:$0x7f] }
 0x1d3   : > { %18200 = vmatpush3.msk.msra.mxu0 %vm564_vm0, %v20380_v2  ;;  %18236 = vmatprep.mubr.msk.f32.mxu1 %vm559_vm1, %v9867_v29  ;;  %v10749_v24 = vmax.f32 %v10721_v6, %v10735_v16 }
 0x1d4   : > { %18201 = vmatprep.mubr.msk.f32.mxu0 %vm559_vm1, %v9783_v26  ;;  %18204 = vmatprep.subr.msk.mxu0 %vm564_vm0, %v20403_v51  ;;  %v10500_v49 = vsel %vm555_vm2, %v10498_v39, %v10499_v42 }
 0x1d5   : > { %18239 = vmatprep.subr.msk.mxu1 %vm564_vm0, %v20359_v45 }
 0x1d9   : > { %18237 = vmatmul.mubr.msk.f32.vlgmr.msra.gmra.mrb[14].mxu1 %vm559_vm1, %v9866_v27 }
 0x1da   : > { %18202 = vmatmul.mubr.msk.f32.vlgmr.msra.gmra.mrb[12].mxu0 %vm559_vm1, %v9782_v25  ;;  %18240 = vmatpush3.msk.msra.mxu1 %vm564_vm0, %v20359_v45  ;;  %v10748_v25 = vmax.f32 %v20502_v10, %v10734_v19  ;;  %v16487_v10 = vld [vmem:[%s21477_s4 + $0x78] sm:$0x3] }
 0x1db   : > { %18205 = vmatpush3.msk.msra.mxu0 %vm564_vm0, %v20403_v51  ;;  %18241 = vmatprep.mubr.msk.f32.mxu1 %vm559_vm1, %v444_v30  ;;  %v16486_v30 = vld [vmem:[%s21477_s4 + $0x70] sm:$0xff]  ;;  %v16495_v45 = vld [vmem:[%s21480_s7 + $0x38] sm:$0xff] }
 0x1dc   : > { %18206 = vmatprep.mubr.msk.f32.mxu0 %vm559_vm1, %v9867_v29  ;;  %18244 = vmatprep.subr.msk.mxu1 %vm564_vm0, %v20380_v2  ;;  %v20753_v38 = vpack.c.bf16 %v16487_v10, %v16486_v30 }
 0x1dd   : > { %18791 = vmatprep.subr.bf16.mxu0 %v19339_v40 }
 0x1e1   : > { %18242 = vmatmul.mubr.msk.f32.vlgmr.msra.gmra.mrb[14].mxu1 %vm559_vm1, %v20593_v34 }
 0x1e2   : > { %18207 = vmatmul.mubr.msk.f32.vlgmr.msra.gmra.mrb[12].mxu0 %vm559_vm1, %v9866_v27  ;;  %18245 = vmatpush3.msk.msra.mxu1 %vm564_vm0, %v20380_v2  ;;  %v16480_v2 = vld [vmem:[%s21477_s4 + $0x40] sm:$0xff] }
 0x1e3   : > { %18794 = vmatpush3.bf16.msk.msra.mxu0 %vm20607_vm12, %v20605_v43  ;;  %18258 = vmatprep.mubr.msk.f32.mxu0 %vm19341_vm13, %v19342_v52  ;;  %v20650_v13 = vpack.c.bf16 %v16481_v55, %v16480_v2 }
 0x1e4   : > { %18799 = vmatprep.subr.bf16.mxu0 %v19339_v40  ;;  %18246 = vmatprep.mubr.msk.f32.mxu1 %vm559_vm1, %v10500_v49 }
 0x1e5   : > { %18249 = vmatprep.subr.msk.mxu1 %vm564_vm0, %v20403_v51 }
 0x1e6   : > { %18259 = vmatmul.mubr.msk.f32.vlgmr.msra.gmra.mrb[14].mxu0 %vm521_vm5, %v10856_v54 }
 0x1e7   : > { %18802 = vmatpush3.bf16.msk.msra.mxu0 %vm20607_vm12, %v20630_v53  ;;  %18272 = vmatprep.mubr.msk.f32.mxu0 %vm19341_vm13, %v19342_v52 }
 0x1e8   : > { %18807 = vmatprep.subr.bf16.mxu0 %v19339_v40 }
 0x1e9   : > { %v17938_v23 = vpop.f32.mrb[6].mxu0  ;;  %18247 = vmatmul.mubr.msk.f32.vlgmr.msra.gmra.mrb[14].mxu1 %vm559_vm1, %v10499_v42  ;;  %v11239_v42 = vrot.slane %v20654_v17, 2 }
 0x1ea   : > { %v5648_v63 = vadd.f32 %v17938_v23, %v20053_v37  ;;  %v5636_v3 = vpop.f32.mrb[7].mxu0  ;;  %18250 = vmatpush3.msk.msra.mxu1 %vm564_vm0, %v20403_v51  ;;  %18273 = vmatmul.mubr.msk.f32.vlgmr.msra.gmra.mrb[16].mxu0 %vm521_vm5, %v11008_v59  ;;  %v20680_v51 = vpack.c.bf16 %v16485_v21, %v16484_v60  ;;  %v20866_v60 = vld [vmem:[%s21476_s3] ss:$0 sm:$0xff] }
 0x1eb   : > { %v5647_v4 = vadd.f32 %v20053_v37, %v5636_v3  ;;  %18810 = vmatpush3.bf16.msk.msra.mxu0 %vm20607_vm12, %v20650_v13  ;;  %18286 = vmatprep.mubr.msk.f32.mxu0 %vm19341_vm13, %v19342_v52 }
 0x1ec   : > { %vm5650_vm0 = vcmp.ge.f32.partialorder %v5648_v63, 0.0  ;;  %v5652_v8 = vmul.f32 %v20065_v41, %v5648_v63  ;;  %18251 = vmatprep.mubr.msk.f32.mxu1 %vm559_vm1, %v10584_v62  ;;  %18795 = vmatprep.subr.bf16.mxu1 %v19339_v40 }
 0x1ed   : > { %vm5649_vm2 = vcmp.ge.f32.partialorder %v5647_v4, 0.0  ;;  %v5651_v61 = vmul.f32 %v20065_v41, %v5647_v4  ;;  %18815 = vmatprep.subr.bf16.mxu0 %v19339_v40 }
 0x1ee   : > { %v5654_v11 = vsel %vm5650_vm0, %v5648_v63, %v5652_v8  ;;  %18287 = vmatmul.mubr.msk.f32.vlgmr.msra.gmra.mrb[18].mxu0 %vm521_vm5, %v11162_v9 }
 0x1ef   : > { %10694 = vst.msk [vmem:[#allocation2 + $0x68] sm:$0x3f] %vm10675_vm7, %v5654_v11  ;;  %v5653_v5 = vsel %vm5649_vm2, %v5647_v4, %v5651_v61  ;;  %18818 = vmatpush3.bf16.msk.msra.mxu0 %vm20607_vm12, %v20680_v51  ;;  %18300 = vmatprep.mubr.msk.f32.mxu0 %vm19341_vm13, %v19342_v52 }
 0x1f0   : > { %10693 = vst.msk [vmem:[#allocation2 + $0x60] sm:$0xff] %vm521_vm5, %v5653_v5  ;;  %18823 = vmatprep.subr.bf16.mxu0 %v19339_v40 }
 0x1f1   : > { %18252 = vmatmul.mubr.msk.f32.vlgmr.msra.gmra.mrb[14].mxu1 %vm559_vm1, %v10583_v57  ;;  %v20859_v57 = vld [vmem:[%s21475_s2] ss:$0 sm:$0xff] }
 0x1f2   : > { %18798 = vmatpush3.bf16.msk.msra.mxu1 %vm20607_vm12, %v20691_v12  ;;  %18265 = vmatprep.mubr.msk.f32.mxu1 %vm19341_vm13, %v19342_v52 }
 0x1f3   : > { %18803 = vmatprep.subr.bf16.mxu1 %v19339_v40 }
 0x1f5   : > { %18266 = vmatmul.mubr.msk.f32.vlgmr.msra.gmra.mrb[16].mxu1 %vm521_vm5, %v20611_v46 }
 0x1f6   : > { %v10763_v26 = vld [vmem:[#allocation2 + $0x68] sm:$0x7f]  ;;  %18806 = vmatpush3.bf16.msk.msra.mxu1 %vm20607_vm12, %v20713_v18  ;;  %18279 = vmatprep.mubr.msk.f32.mxu1 %vm19341_vm13, %v19342_v52 }
 0x1f7   : > { %v10777_v27 = vmax.f32 %v10749_v24, %v10763_v26  ;;  %v20732_v29 = vld [vmem:[#allocation2 + $0x60] sm:$0xff]  ;;  %18811 = vmatprep.subr.bf16.mxu1 %v19339_v40  ;;  %v10723_v28 = vld [vmem:[#allocation2 + $0x68] sm:$0x7f] }
 0x1f8   : > { %v10776_v31 = vmax.f32 %v10748_v25, %v20732_v29  ;;  %v17983_v33 = vpop.f32.mrb[8].mxu1 }
 0x1f9   : > { %10791 = vst.msk [vmem:[#allocation3 + $0x28] sm:$0x7f] %vm523_vm4, %v10777_v27  ;;  %v6365_v34 = vadd.f32 %v17983_v33, %v20053_v37  ;;  %v6353_v35 = vpop.f32.mrb[9].mxu1  ;;  %18280 = vmatmul.mubr.msk.f32.vlgmr.msra.gmra.mrb[18].mxu1 %vm521_vm5, %v20654_v17 }
 0x1fa   : > { %10790 = vst.msk [vmem:[#allocation3 + $0x20] sm:$0xff] %vm521_vm5, %v10776_v31  ;;  %v6364_v36 = vadd.f32 %v20053_v37, %v6353_v35  ;;  %18814 = vmatpush3.bf16.msk.msra.mxu1 %vm20607_vm12, %v20730_v15  ;;  %18293 = vmatprep.mubr.msk.f32.mxu1 %vm19341_vm13, %v19342_v52 }
 0x1fb   : > { %vm6367_vm1 = vcmp.ge.f32.partialorder %v6365_v34, 0.0  ;;  %v6369_v39 = vmul.f32 %v20065_v41, %v6365_v34  ;;  %18819 = vmatprep.subr.bf16.mxu1 %v19339_v40 }
 0x1fc   : > { %vm6366_vm3 = vcmp.ge.f32.partialorder %v6364_v36, 0.0  ;;  %v6368_v44 = vmul.f32 %v20065_v41, %v6364_v36  ;;  %v16488_v41 = vld [vmem:[%s21477_s4 + $0x80] sm:$0xff] }
 0x1fd   : > { %v6371_v37 = vsel %vm6367_vm1, %v6365_v34, %v6369_v39  ;;  %18294 = vmatmul.mubr.msk.f32.vlgmr.msra.gmra.mrb[20].mxu1 %vm521_vm5, %v11239_v42  ;;  %v20774_v54 = vpack.c.bf16 %v16489_v47, %v16488_v41 }
 0x1fe   : > { %10697 = vst.msk [vmem:[#allocation2 + $0x78] sm:$0x3f] %vm10675_vm7, %v6371_v37  ;;  %v6370_v46 = vsel %vm6366_vm3, %v6364_v36, %v6368_v44  ;;  %18822 = vmatpush3.bf16.msk.msra.mxu1 %vm20607_vm12, %v20753_v38  ;;  %18307 = vmatprep.mubr.msk.f32.mxu1 %vm19341_vm13, %v19342_v52 }
 0x1ff   : > { %10696 = vst.msk [vmem:[#allocation2 + $0x70] sm:$0xff] %vm521_vm5, %v6370_v46  ;;  %18827 = vmatprep.subr.bf16.mxu1 %v19339_v40 }
 0x201   : > { %v10804_v48 = vld [vmem:[#allocation3 + $0x20] ss:$2 sm:$0x7f]  ;;  %v10818_v49 = vld [vmem:[#allocation3 + $0x21] ss:$2 sm:$0x7f] }
 0x202   : > { %v10829_v50 = vmax.f32 %v10804_v48, %v10818_v49  ;;  %v10839_v0 = vld [vmem:[#allocation3 + $0x22] ss:$2 sm:$0x7f] }
 0x204   : > { %v20776_v2 = vmax.f32 %v10829_v50, %v10839_v0 }
 0x205   : > { %v10737_v3 = vld [vmem:[#allocation2 + $0x78] sm:$0x7f] }
 0x206   : > { %18301 = vmatmul.mubr.msk.f32.vlgmr.msra.gmra.mrb[20].mxu0 %vm521_vm5, %v20776_v2  ;;  %v20781_v55 = vrot.slane %v20776_v2, 1  ;;  %v20791_v1 = vrot.slane %v20776_v2, 2  ;;  %v10736_v4 = vld [vmem:[#allocation2 + $0x70] sm:$0xff]  ;;  %v10751_v7 = vmax.f32 %v10723_v28, %v10737_v3 }
 0x207   : > { %18826 = vmatpush3.bf16.msk.msra.mxu0 %vm20607_vm12, %v20774_v54  ;;  %18314 = vmatprep.mubr.msk.f32.mxu0 %vm19341_vm13, %v19342_v52  ;;  %v10750_v8 = vmax.f32 %v20732_v29, %v10736_v4 }
 0x208   : > { %18308 = vmatmul.mubr.msk.f32.vlgmr.msra.gmra.mrb[22].mxu1 %vm521_vm5, %v20781_v55  ;;  %18831 = vmatprep.subr.bf16.mxu0 %v19339_v40 }
 0x209   : > { %18830 = vmatpush3.bf16.msk.msra.mxu1 %vm20607_vm12, %v20605_v43  ;;  %18321 = vmatprep.mubr.msk.f32.mxu1 %vm19341_vm13, %v19342_v52 }
 0x20a   : > { %18315 = vmatmul.mubr.msk.f32.vlgmr.msra.gmra.mrb[22].mxu0 %vm521_vm5, %v20791_v1  ;;  %18835 = vmatprep.subr.bf16.mxu1 %v19339_v40 }
 0x20b   : > { %18834 = vmatpush3.bf16.msk.msra.mxu0 %vm20607_vm12, %v20691_v12  ;;  %18328 = vmatprep.mubr.msk.f32.mxu0 %vm19341_vm13, %v19342_v52 }
 0x20c   : > { %18322 = vmatmul.mubr.msk.f32.vlgmr.msra.gmra.mrb[24].mxu1 %vm521_vm5, %v11162_v9  ;;  %18839 = vmatprep.subr.bf16.mxu0 %v19339_v40 }
 0x20d   : > { %18838 = vmatpush3.bf16.msk.msra.mxu1 %vm20607_vm12, %v20630_v53  ;;  %18335 = vmatprep.mubr.msk.f32.mxu1 %vm19341_vm13, %v19342_v52 }
 0x20e   : > { %18329 = vmatmul.mubr.msk.f32.vlgmr.msra.gmra.mrb[24].mxu0 %vm521_vm5, %v20654_v17  ;;  %18843 = vmatprep.subr.bf16.mxu1 %v19339_v40 }
 0x20f   : > { %18842 = vmatpush3.bf16.msk.msra.mxu0 %vm20607_vm12, %v20713_v18  ;;  %18342 = vmatprep.mubr.msk.f32.mxu0 %vm19341_vm13, %v19342_v52 }
 0x210   : > { %18336 = vmatmul.mubr.msk.f32.vlgmr.msra.gmra.mrb[26].mxu1 %vm521_vm5, %v11239_v42  ;;  %18847 = vmatprep.subr.bf16.mxu0 %v19339_v40 }
 0x211   : > { %18846 = vmatpush3.bf16.msk.msra.mxu1 %vm20607_vm12, %v20650_v13  ;;  %18349 = vmatprep.mubr.msk.f32.mxu1 %vm19341_vm13, %v19342_v52 }
 0x212   : > { %18343 = vmatmul.mubr.msk.f32.vlgmr.msra.gmra.mrb[26].mxu0 %vm521_vm5, %v20776_v2  ;;  %18851 = vmatprep.subr.bf16.mxu1 %v19339_v40 }
 0x213   : > { %18850 = vmatpush3.bf16.msk.msra.mxu0 %vm20607_vm12, %v20730_v15  ;;  %18356 = vmatprep.mubr.msk.f32.mxu0 %vm19341_vm13, %v19342_v52 }
 0x214   : > { %18350 = vmatmul.mubr.msk.f32.vlgmr.msra.gmra.mrb[28].mxu1 %vm521_vm5, %v20781_v55  ;;  %18855 = vmatprep.subr.bf16.mxu0 %v19339_v40 }
 0x215   : > { %18854 = vmatpush3.bf16.msk.msra.mxu1 %vm20607_vm12, %v20680_v51  ;;  %18363 = vmatprep.mubr.msk.f32.mxu1 %vm19341_vm13, %v19342_v52 }
 0x216   : > { %18357 = vmatmul.mubr.msk.f32.vlgmr.msra.gmra.mrb[28].mxu0 %vm521_vm5, %v20791_v1  ;;  %18859 = vmatprep.subr.bf16.mxu1 %v19339_v40 }
 0x217   : > { %18858 = vmatpush3.bf16.msk.msra.mxu0 %vm20607_vm12, %v20753_v38  ;;  %18370 = vmatprep.mubr.msk.f32.mxu0 %vm19341_vm13, %v19342_v52 }
 0x218   : > { %18863 = vmatprep.subr.bf16.mxu0 %v19339_v40 }
 0x22d   : > { %v18028_v56 = vpop.f32.mrb[8].mxu0 }
 0x22e   : > { %v7082_v58 = vadd.f32 %v20859_v57, %v18028_v56  ;;  %v7070_v59 = vpop.f32.mrb[9].mxu0 }
 0x22f   : > { %v7081_v17 = vadd.f32 %v20859_v57, %v7070_v59 }
 0x230   : > { %vm7084_vm14 = vcmp.ge.f32.partialorder %v7082_v58, 0.0  ;;  %v7086_v21 = vmul.f32 %v20866_v60, %v7082_v58 }
 0x231   : > { %vm7083_vm15 = vcmp.ge.f32.partialorder %v7081_v17, 0.0  ;;  %v7085_v23 = vmul.f32 %v20866_v60, %v7081_v17 }
 0x232   : > { %v7088_v62 = vsel %vm7084_vm14, %v7082_v58, %v7086_v21 }
 0x233   : > { %10700 = vst.msk [vmem:[#allocation2 + $0x88] sm:$0x3f] %vm10675_vm7, %v7088_v62  ;;  %v7087_v63 = vsel %vm7083_vm15, %v7081_v17, %v7085_v23 }
 0x234   : > { %10699 = vst.msk [vmem:[#allocation2 + $0x80] sm:$0xff] %vm521_vm5, %v7087_v63 }
 0x23a   : > { %v10765_v9 = vld [vmem:[#allocation2 + $0x88] sm:$0x7f] }
 0x23b   : > { %v10779_v61 = vmax.f32 %v10751_v7, %v10765_v9  ;;  %v20873_v11 = vld [vmem:[#allocation2 + $0x80] sm:$0xff]  ;;  %v10725_v47 = vld [vmem:[#allocation2 + $0x88] sm:$0x7f] }
 0x23c   : > { %v10778_v5 = vmax.f32 %v10750_v8, %v20873_v11  ;;  %v18073_v14 = vpop.f32.mrb[10].mxu1 }
 0x23d   : > { %10793 = vst.msk [vmem:[#allocation3 + $0x38] sm:$0x7f] %vm523_vm4, %v10779_v61  ;;  %v7799_v32 = vadd.f32 %v20859_v57, %v18073_v14  ;;  %v7787_v16 = vpop.f32.mrb[11].mxu1 }
 0x23e   : > { %10792 = vst.msk [vmem:[#allocation3 + $0x30] sm:$0xff] %vm521_vm5, %v10778_v5  ;;  %v7798_v19 = vadd.f32 %v20859_v57, %v7787_v16 }
 0x23f   : > { %vm7801_vm6 = vcmp.ge.f32.partialorder %v7799_v32, 0.0  ;;  %v7803_v20 = vmul.f32 %v20866_v60, %v7799_v32 }
 0x240   : > { %vm7800_vm8 = vcmp.ge.f32.partialorder %v7798_v19, 0.0  ;;  %v7802_v22 = vmul.f32 %v20866_v60, %v7798_v19 }
 0x241   : > { %v7805_v6 = vsel %vm7801_vm6, %v7799_v32, %v7803_v20 }
 0x242   : > { %10703 = vst.msk [vmem:[#allocation2 + $0x98] sm:$0x3f] %vm10675_vm7, %v7805_v6  ;;  %v7804_v24 = vsel %vm7800_vm8, %v7798_v19, %v7802_v22 }
 0x243   : > { %10702 = vst.msk [vmem:[#allocation2 + $0x90] sm:$0xff] %vm521_vm5, %v7804_v24 }
 0x245   : > { %v10806_v25 = vld [vmem:[#allocation3 + $0x30] ss:$2 sm:$0x7f]  ;;  %v10820_v26 = vld [vmem:[#allocation3 + $0x31] ss:$2 sm:$0x7f] }
 0x246   : > { %v10830_v27 = vmax.f32 %v10806_v25, %v10820_v26  ;;  %v10841_v29 = vld [vmem:[#allocation3 + $0x32] ss:$2 sm:$0x7f] }
 0x248   : > { %v20884_v30 = vmax.f32 %v10830_v27, %v10841_v29 }
 0x249   : > { %v10739_v46 = vld [vmem:[#allocation2 + $0x98] sm:$0x7f] }
 0x24a   : > { %18364 = vmatmul.mubr.msk.f32.vlgmr.msra.gmra.mrb[30].mxu1 %vm521_vm5, %v20884_v30  ;;  %v20889_v10 = vrot.slane %v20884_v30, 1  ;;  %v20899_v31 = vrot.slane %v20884_v30, 2  ;;  %v10738_v41 = vld [vmem:[#allocation2 + $0x90] sm:$0xff]  ;;  %v10753_v48 = vmax.f32 %v10725_v47, %v10739_v46 }
 0x24b   : > { %18862 = vmatpush3.bf16.msk.msra.mxu1 %vm20607_vm12, %v20774_v54  ;;  %18377 = vmatprep.mubr.msk.f32.mxu1 %vm19341_vm13, %v19342_v52  ;;  %v10752_v49 = vmax.f32 %v20873_v11, %v10738_v41 }
 0x24c   : > { %18371 = vmatmul.mubr.msk.f32.vlgmr.msra.gmra.mrb[30].mxu0 %vm521_vm5, %v20889_v10  ;;  %18867 = vmatprep.subr.bf16.mxu1 %v19339_v40 }
 0x24d   : > { %18866 = vmatpush3.bf16.msk.msra.mxu0 %vm20607_vm12, %v20605_v43  ;;  %18384 = vmatprep.mubr.msk.f32.mxu0 %vm19341_vm13, %v19342_v52 }
 0x24e   : > { %18378 = vmatmul.mubr.msk.f32.vlgmr.msra.gmra.mrb[32].mxu1 %vm521_vm5, %v20899_v31  ;;  %18871 = vmatprep.subr.bf16.mxu0 %v19339_v40 }
 0x24f   : > { %18870 = vmatpush3.bf16.msk.msra.mxu1 %vm20607_vm12, %v20691_v12  ;;  %18391 = vmatprep.mubr.msk.f32.mxu1 %vm19341_vm13, %v19342_v52 }
 0x250   : > { %18385 = vmatmul.mubr.msk.f32.vlgmr.msra.gmra.mrb[32].mxu0 %vm521_vm5, %v20781_v55  ;;  %18875 = vmatprep.subr.bf16.mxu1 %v19339_v40 }
 0x251   : > { %18874 = vmatpush3.bf16.msk.msra.mxu0 %vm20607_vm12, %v20630_v53  ;;  %18398 = vmatprep.mubr.msk.f32.mxu0 %vm19341_vm13, %v19342_v52 }
 0x252   : > { %18392 = vmatmul.mubr.msk.f32.vlgmr.msra.gmra.mrb[34].mxu1 %vm521_vm5, %v20776_v2  ;;  %18879 = vmatprep.subr.bf16.mxu0 %v19339_v40 }
 0x253   : > { %18878 = vmatpush3.bf16.msk.msra.mxu1 %vm20607_vm12, %v20713_v18  ;;  %18405 = vmatprep.mubr.msk.f32.mxu1 %vm19341_vm13, %v19342_v52 }
 0x254   : > { %18399 = vmatmul.mubr.msk.f32.vlgmr.msra.gmra.mrb[34].mxu0 %vm521_vm5, %v20791_v1  ;;  %18883 = vmatprep.subr.bf16.mxu1 %v19339_v40 }
 0x255   : > { %18882 = vmatpush3.bf16.msk.msra.mxu0 %vm20607_vm12, %v20650_v13  ;;  %18412 = vmatprep.mubr.msk.f32.mxu0 %vm19341_vm13, %v19342_v52 }
 0x256   : > { %18406 = vmatmul.mubr.msk.f32.vlgmr.msra.gmra.mrb[36].mxu1 %vm521_vm5, %v20884_v30  ;;  %18887 = vmatprep.subr.bf16.mxu0 %v19339_v40 }
 0x257   : > { %18886 = vmatpush3.bf16.msk.msra.mxu1 %vm20607_vm12, %v20730_v15  ;;  %18419 = vmatprep.mubr.msk.f32.mxu1 %vm19341_vm13, %v19342_v52 }
 0x258   : > { %18413 = vmatmul.mubr.msk.f32.vlgmr.msra.gmra.mrb[36].mxu0 %vm521_vm5, %v20889_v10  ;;  %18891 = vmatprep.subr.bf16.mxu1 %v19339_v40 }
 0x259   : > { %18890 = vmatpush3.bf16.msk.msra.mxu0 %vm20607_vm12, %v20680_v51  ;;  %18426 = vmatprep.mubr.msk.f32.mxu0 %vm19341_vm13, %v19342_v52 }
 0x25a   : > { %18420 = vmatmul.mubr.msk.f32.vlgmr.msra.gmra.mrb[38].mxu1 %vm521_vm5, %v20899_v31  ;;  %18895 = vmatprep.subr.bf16.mxu0 %v19339_v40 }
 0x25b   : > { %18894 = vmatpush3.bf16.msk.msra.mxu1 %vm20607_vm12, %v20753_v38  ;;  %18433 = vmatprep.mubr.msk.f32.mxu1 %vm19341_vm13, %v19342_v52 }
 0x25c   : > { %18899 = vmatprep.subr.bf16.mxu1 %v19339_v40 }
 0x271   : > { %v18118_v33 = vpop.f32.mrb[10].mxu0 }
 0x272   : > { %v8516_v34 = vadd.f32 %v20859_v57, %v18118_v33  ;;  %v8504_v35 = vpop.f32.mrb[11].mxu0 }
 0x273   : > { %v8515_v36 = vadd.f32 %v20859_v57, %v8504_v35 }
 0x274   : > { %vm8518_vm9 = vcmp.ge.f32.partialorder %v8516_v34, 0.0  ;;  %v8520_v39 = vmul.f32 %v20866_v60, %v8516_v34 }
 0x275   : > { %vm8517_vm10 = vcmp.ge.f32.partialorder %v8515_v36, 0.0  ;;  %v8519_v42 = vmul.f32 %v20866_v60, %v8515_v36 }
 0x276   : > { %v8522_v44 = vsel %vm8518_vm9, %v8516_v34, %v8520_v39  ;;  %vm16157_vm9 = vcmask 261120  }
 0x277   : > { %10706 = vst.msk [vmem:[#allocation2 + $0xa8] sm:$0x3f] %vm10675_vm7, %v8522_v44  ;;  %v8521_v37 = vsel %vm8517_vm10, %v8515_v36, %v8519_v42 }
 0x278   : > { %10705 = vst.msk [vmem:[#allocation2 + $0xa0] sm:$0xff] %vm521_vm5, %v8521_v37 }
 0x27e   : > { %v10767_v50 = vld [vmem:[#allocation2 + $0xa8] sm:$0x7f] }
 0x27f   : > { %v10781_v0 = vmax.f32 %v10753_v48, %v10767_v50  ;;  %v20971_v2 = vld [vmem:[#allocation2 + $0xa0] sm:$0xff]  ;;  %v10727_v29 = vld [vmem:[#allocation2 + $0xa8] sm:$0x7f] }
 0x280   : > { %v10780_v55 = vmax.f32 %v10752_v49, %v20971_v2  ;;  %v18163_v1 = vpop.f32.mrb[12].mxu1 }
 0x281   : > { %10795 = vst.msk [vmem:[#allocation3 + $0x48] sm:$0x7f] %vm523_vm4, %v10781_v0  ;;  %v9233_v56 = vadd.f32 %v20859_v57, %v18163_v1  ;;  %v9221_v58 = vpop.f32.mrb[13].mxu1 }
 0x282   : > { %10794 = vst.msk [vmem:[#allocation3 + $0x40] sm:$0xff] %vm521_vm5, %v10780_v55  ;;  %v9232_v59 = vadd.f32 %v20859_v57, %v9221_v58 }
 0x283   : > { %vm9235_vm11 = vcmp.ge.f32.partialorder %v9233_v56, 0.0  ;;  %v9237_v17 = vmul.f32 %v20866_v60, %v9233_v56 }
 0x284   : > { %vm9234_vm0 = vcmp.ge.f32.partialorder %v9232_v59, 0.0  ;;  %v9236_v21 = vmul.f32 %v20866_v60, %v9232_v59 }
 0x285   : > { %v9239_v23 = vsel %vm9235_vm11, %v9233_v56, %v9237_v17 }
 0x286   : > { %10709 = vst.msk [vmem:[#allocation2 + $0xb8] sm:$0x3f] %vm10675_vm7, %v9239_v23  ;;  %v9238_v62 = vsel %vm9234_vm0, %v9232_v59, %v9236_v21  ;;  %v10771_v23 = vld [vmem:[#allocation2 + $0xe8] sm:$0x7f] }
 0x287   : > { %10708 = vst.msk [vmem:[#allocation2 + $0xb0] sm:$0xff] %vm521_vm5, %v9238_v62 }
 0x289   : > { %v10808_v63 = vld [vmem:[#allocation3 + $0x40] ss:$2 sm:$0x7f]  ;;  %v10822_v3 = vld [vmem:[#allocation3 + $0x41] ss:$2 sm:$0x7f] }
 0x28a   : > { %v10831_v4 = vmax.f32 %v10808_v63, %v10822_v3  ;;  %v10843_v28 = vld [vmem:[#allocation3 + $0x42] ss:$2 sm:$0x7f] }
 0x28c   : > { %v20982_v7 = vmax.f32 %v10831_v4, %v10843_v28 }
 0x28d   : > { %v10741_v25 = vld [vmem:[#allocation2 + $0xb8] sm:$0x7f] }
 0x28e   : > { %18427 = vmatmul.mubr.msk.f32.vlgmr.msra.gmra.mrb[38].mxu0 %vm521_vm5, %v20982_v7  ;;  %v20987_v8 = vrot.slane %v20982_v7, 1  ;;  %v20997_v9 = vrot.slane %v20982_v7, 2  ;;  %v10740_v27 = vld [vmem:[#allocation2 + $0xb0] sm:$0xff] }
 0x28f   : > { %18898 = vmatpush3.bf16.msk.msra.mxu0 %vm20607_vm12, %v20774_v54  ;;  %18440 = vmatprep.mubr.msk.f32.mxu0 %vm19341_vm13, %v19342_v52 }
 0x290   : > { %18434 = vmatmul.mubr.msk.f32.vlgmr.msra.gmra.mrb[40].mxu1 %vm521_vm5, %v20987_v8  ;;  %18903 = vmatprep.subr.bf16.mxu0 %v19339_v40 }
 0x291   : > { %18902 = vmatpush3.bf16.msk.msra.mxu1 %vm20607_vm12, %v20605_v43  ;;  %18447 = vmatprep.mubr.msk.f32.mxu1 %vm19341_vm13, %v19342_v52 }
 0x292   : > { %18441 = vmatmul.mubr.msk.f32.vlgmr.msra.gmra.mrb[40].mxu0 %vm521_vm5, %v20997_v9  ;;  %18907 = vmatprep.subr.bf16.mxu1 %v19339_v40 }
 0x293   : > { %18906 = vmatpush3.bf16.msk.msra.mxu0 %vm20607_vm12, %v20691_v12  ;;  %18454 = vmatprep.mubr.msk.f32.mxu0 %vm19341_vm13, %v19342_v52 }
 0x294   : > { %18448 = vmatmul.mubr.msk.f32.vlgmr.msra.gmra.mrb[42].mxu1 %vm521_vm5, %v20889_v10  ;;  %18911 = vmatprep.subr.bf16.mxu0 %v19339_v40 }
 0x295   : > { %18910 = vmatpush3.bf16.msk.msra.mxu1 %vm20607_vm12, %v20630_v53  ;;  %18461 = vmatprep.mubr.msk.f32.mxu1 %vm19341_vm13, %v19342_v52 }
 0x296   : > { %18455 = vmatmul.mubr.msk.f32.vlgmr.msra.gmra.mrb[42].mxu0 %vm521_vm5, %v20884_v30  ;;  %18915 = vmatprep.subr.bf16.mxu1 %v19339_v40  ;;  %v10755_v30 = vmax.f32 %v10727_v29, %v10741_v25 }
 0x297   : > { %18914 = vmatpush3.bf16.msk.msra.mxu0 %vm20607_vm12, %v20713_v18  ;;  %18468 = vmatprep.mubr.msk.f32.mxu0 %vm19341_vm13, %v19342_v52 }
 0x298   : > { %18462 = vmatmul.mubr.msk.f32.vlgmr.msra.gmra.mrb[44].mxu1 %vm521_vm5, %v20899_v31  ;;  %18919 = vmatprep.subr.bf16.mxu0 %v19339_v40  ;;  %v10754_v31 = vmax.f32 %v20971_v2, %v10740_v27 }
 0x299   : > { %18918 = vmatpush3.bf16.msk.msra.mxu1 %vm20607_vm12, %v20650_v13  ;;  %18475 = vmatprep.mubr.msk.f32.mxu1 %vm19341_vm13, %v19342_v52 }
 0x29a   : > { %18469 = vmatmul.mubr.msk.f32.vlgmr.msra.gmra.mrb[44].mxu0 %vm521_vm5, %v20982_v7  ;;  %18923 = vmatprep.subr.bf16.mxu1 %v19339_v40 }
 0x29b   : > { %18922 = vmatpush3.bf16.msk.msra.mxu0 %vm20607_vm12, %v20730_v15  ;;  %18482 = vmatprep.mubr.msk.f32.mxu0 %vm19341_vm13, %v19342_v52 }
 0x29c   : > { %18476 = vmatmul.mubr.msk.f32.vlgmr.msra.gmra.mrb[46].mxu1 %vm521_vm5, %v20987_v8  ;;  %18927 = vmatprep.subr.bf16.mxu0 %v19339_v40 }
 0x29d   : > { %18926 = vmatpush3.bf16.msk.msra.mxu1 %vm20607_vm12, %v20680_v51  ;;  %18489 = vmatprep.mubr.msk.f32.mxu1 %vm19341_vm13, %v19342_v52 }
 0x29e   : > { %18483 = vmatmul.mubr.msk.f32.vlgmr.msra.gmra.mrb[46].mxu0 %vm521_vm5, %v20997_v9  ;;  %18931 = vmatprep.subr.bf16.mxu1 %v19339_v40 }
 0x29f   : > { %18930 = vmatpush3.bf16.msk.msra.mxu0 %vm20607_vm12, %v20753_v38  ;;  %18496 = vmatprep.mubr.msk.f32.mxu0 %vm19341_vm13, %v19342_v52 }
 0x2a0   : > { %18935 = vmatprep.subr.bf16.mxu0 %v19339_v40 }
 0x2b5   : > { %v18208_v61 = vpop.f32.mrb[12].mxu0 }
 0x2b6   : > { %v9950_v11 = vadd.f32 %v20859_v57, %v18208_v61  ;;  %v9938_v5 = vpop.f32.mrb[13].mxu0 }
 0x2b7   : > { %v9949_v14 = vadd.f32 %v20859_v57, %v9938_v5 }
 0x2b8   : > { %vm9952_vm2 = vcmp.ge.f32.partialorder %v9950_v11, 0.0  ;;  %v9954_v32 = vmul.f32 %v20866_v60, %v9950_v11 }
 0x2b9   : > { %vm9951_vm1 = vcmp.ge.f32.partialorder %v9949_v14, 0.0  ;;  %v9953_v16 = vmul.f32 %v20866_v60, %v9949_v14  ;;  %v10929_v19 = vpop.f32.mrb[14].mxu0 }
 0x2ba   : > { %v9956_v20 = vsel %vm9952_vm2, %v9950_v11, %v9954_v32  ;;  %v18260_v22 = vpop.f32.mrb[15].mxu0 }
 0x2bb   : > { %10712 = vst.msk [vmem:[#allocation2 + $0xc8] sm:$0x3f] %vm10675_vm7, %v9956_v20  ;;  %v9955_v6 = vsel %vm9951_vm1, %v9949_v14, %v9953_v16  ;;  %v10770_v14 = vld [vmem:[#allocation2 + $0xe0] sm:$0xff] }
 0x2bc   : > { %10711 = vst.msk [vmem:[#allocation2 + $0xc0] sm:$0xff] %vm521_vm5, %v9955_v6 }
 0x2bd   : > { %v11080_v24 = vpop.f32.mrb[16].mxu0 }
 0x2be   : > { %v18274_v26 = vpop.f32.mrb[17].mxu0 }
 0x2c1   : > { %v11234_v10 = vpop.f32.mrb[18].mxu0 }
 0x2c2   : > { %v10769_v33 = vld [vmem:[#allocation2 + $0xc8] sm:$0x7f]  ;;  %v18288_v34 = vpop.f32.mrb[19].mxu0 }
 0x2c3   : > { %v10783_v35 = vmax.f32 %v10755_v30, %v10769_v33  ;;  %v10728_v36 = vld [vmem:[#allocation2 + $0xc0] sm:$0xff]  ;;  %v10729_v63 = vld [vmem:[#allocation2 + $0xc8] sm:$0x7f] }
 0x2c4   : > { %v10782_v39 = vmax.f32 %v10754_v31, %v10728_v36  ;;  %v18253_v42 = vpop.f32.mrb[14].mxu1 }
 0x2c5   : > { %10797 = vst.msk [vmem:[#allocation3 + $0x58] sm:$0x7f] %vm523_vm4, %v10783_v35  ;;  %v10667_v44 = vadd.f32 %v20859_v57, %v18253_v42  ;;  %v10655_v37 = vpop.f32.mrb[15].mxu1  ;;  %v16490_v35 = vld [vmem:[%s21480_s7 + $0x10] sm:$0xff] }
 0x2c6   : > { %10796 = vst.msk [vmem:[#allocation3 + $0x50] sm:$0xff] %vm521_vm5, %v10782_v39  ;;  %v10666_v46 = vadd.f32 %v20859_v57, %v10655_v37 }
 0x2c7   : > { %vm10669_vm3 = vcmp.ge.f32.partialorder %v10667_v44, 0.0  ;;  %v10671_v41 = vmul.f32 %v20866_v60, %v10667_v44 }
 0x2c8   : > { %vm10668_vm14 = vcmp.ge.f32.partialorder %v10666_v46, 0.0  ;;  %v10670_v47 = vmul.f32 %v20866_v60, %v10666_v46  ;;  %v11004_v48 = vpop.f32.mrb[16].mxu1 }
 0x2c9   : > { %v10673_v49 = vsel %vm10669_vm3, %v10667_v44, %v10671_v41  ;;  %v11005_v50 = vadd.f32 %v11004_v48, %v10929_v19  ;;  %v18267_v0 = vpop.f32.mrb[17].mxu1 }
 0x2ca   : > { %10715 = vst.msk [vmem:[#allocation2 + $0xd8] sm:$0x3f] %vm10675_vm7, %v10673_v49  ;;  %v10672_v2 = vsel %vm10668_vm14, %v10666_v46, %v10670_v47  ;;  %v495_v46 = vld [vmem:[%s21480_s7] sm:$0xff]  ;;  %vm14165_vm7 = vcmask 130048  }
 0x2cb   : > { %10714 = vst.msk [vmem:[#allocation2 + $0xd0] sm:$0xff] %vm521_vm5, %v10672_v2  ;;  %v11084_v55 = vadd.f32 %v11080_v24, %v11005_v50  ;;  %v16492_v0 = vld [vmem:[%s21480_s7 + $0x20] sm:$0xff] }
 0x2cc   : > { %v11157_v1 = vpop.f32.mrb[18].mxu1 }
 0x2cd   : > { %v11161_v56 = vadd.f32 %v11157_v1, %v11084_v55  ;;  %v18281_v58 = vpop.f32.mrb[19].mxu1  ;;  %v10810_v57 = vld [vmem:[#allocation3 + $0x50] ss:$2 sm:$0x7f] }
 0x2ce   : > { %v10824_v59 = vld [vmem:[#allocation3 + $0x51] ss:$2 sm:$0x7f]  ;;  %v10845_v60 = vld [vmem:[#allocation3 + $0x52] ss:$2 sm:$0x7f] }
 0x2cf   : > { %v11238_v17 = vadd.f32 %v11234_v10, %v11161_v56  ;;  %v10832_v21 = vmax.f32 %v10810_v57, %v10824_v59  ;;  %v16494_v59 = vld [vmem:[%s21480_s7 + $0x30] sm:$0xff] }
 0x2d0   : > { %v11311_v62 = vpop.f32.mrb[20].mxu1 }
 0x2d1   : > { %v10743_v3 = vld [vmem:[#allocation2 + $0xd8] sm:$0x7f]  ;;  %v11315_v4 = vadd.f32 %v11311_v62, %v11238_v17  ;;  %v18295_v28 = vpop.f32.mrb[21].mxu1  ;;  %v21077_v61 = vmax.f32 %v10832_v21, %v10845_v60  ;;  %v16496_v60 = vld [vmem:[%s21480_s7 + $0x40] sm:$0xff] }
 0x2d2   : > { %v10757_v11 = vmax.f32 %v10729_v63, %v10743_v3  ;;  %v10742_v5 = vld [vmem:[#allocation2 + $0xd0] sm:$0xff]  ;;  %v16497_v63 = vld [vmem:[%s21480_s7 + $0x48] sm:$0xff]  ;;  %v21216_v28 = vpack.c.bf16 %v16495_v45, %v16494_v59 }
 0x2d3   : > { %v10756_v32 = vmax.f32 %v10728_v36, %v10742_v5  ;;  %18490 = vmatmul.mubr.msk.f32.vlgmr.msra.gmra.mrb[48].mxu1 %vm521_vm5, %v21077_v61  ;;  %v13361_v16 = vrot.slane %v21077_v61, 1  ;;  %v13435_v22 = vrot.slane %v21077_v61, 2  ;;  %v16491_v36 = vld [vmem:[%s21480_s7 + $0x18] sm:$0xff] }
 0x2d4   : > { %v10785_v19 = vmax.f32 %v10757_v11, %v10771_v23  ;;  %18934 = vmatpush3.bf16.msk.msra.mxu1 %vm20607_vm12, %v20774_v54  ;;  %18503 = vmatprep.mubr.msk.f32.mxu1 %vm19341_vm13, %v19342_v52  ;;  %v21174_v49 = vpack.c.bf16 %v16491_v36, %v16490_v35 }
 0x2d5   : > { %v10784_v20 = vmax.f32 %v10756_v32, %v10770_v14  ;;  %18497 = vmatmul.mubr.msk.f32.vlgmr.msra.gmra.mrb[48].mxu0 %vm521_vm5, %v13361_v16  ;;  %18939 = vmatprep.subr.bf16.mxu1 %v19339_v40 }
 0x2d6   : > { %10799 = vst.msk [vmem:[#allocation3 + $0x68] sm:$0x7f] %vm523_vm4, %v10785_v19  ;;  %18938 = vmatpush3.bf16.msk.msra.mxu0 %vm20607_vm12, %v20605_v43  ;;  %18510 = vmatprep.mubr.msk.f32.mxu0 %vm19341_vm13, %v19342_v52 }
 0x2d7   : > { %10798 = vst.msk [vmem:[#allocation3 + $0x60] sm:$0xff] %vm521_vm5, %v10784_v20  ;;  %18504 = vmatmul.mubr.msk.f32.vlgmr.msra.gmra.mrb[50].mxu1 %vm521_vm5, %v13435_v22  ;;  %18943 = vmatprep.subr.bf16.mxu0 %v19339_v40 }
 0x2d8   : > { %18942 = vmatpush3.bf16.msk.msra.mxu1 %vm20607_vm12, %v20691_v12  ;;  %18517 = vmatprep.mubr.msk.f32.mxu1 %vm19341_vm13, %v19342_v52 }
 0x2d9   : > { %18511 = vmatmul.mubr.msk.f32.vlgmr.msra.gmra.mrb[50].mxu0 %vm521_vm5, %v20987_v8  ;;  %v11388_v43 = vpop.f32.mrb[20].mxu0  ;;  %18947 = vmatprep.subr.bf16.mxu1 %v19339_v40 }
 0x2da   : > { %18946 = vmatpush3.bf16.msk.msra.mxu0 %vm20607_vm12, %v20630_v53  ;;  %v11392_v6 = vadd.f32 %v11388_v43, %v11315_v4  ;;  %v18302_v24 = vpop.f32.mrb[21].mxu0  ;;  %18524 = vmatprep.mubr.msk.f32.mxu0 %vm19341_vm13, %v19342_v52  ;;  %v21125_v53 = vld [vmem:[%s21478_s5] ss:$0 sm:$0xff] }
 0x2db   : > { %18518 = vmatmul.mubr.msk.f32.vlgmr.msra.gmra.mrb[52].mxu1 %vm521_vm5, %v20982_v7  ;;  %v11465_v12 = vpop.f32.mrb[22].mxu1  ;;  %18951 = vmatprep.subr.bf16.mxu0 %v19339_v40 }
 0x2dc   : > { %18950 = vmatpush3.bf16.msk.msra.mxu1 %vm20607_vm12, %v20713_v18  ;;  %v11469_v8 = vadd.f32 %v11465_v12, %v11392_v6  ;;  %v18309_v25 = vpop.f32.mrb[23].mxu1  ;;  %18531 = vmatprep.mubr.msk.f32.mxu1 %vm19341_vm13, %v19342_v52  ;;  %v16498_v12 = vld [vmem:[%s21480_s7 + $0x50] sm:$0xff] }
 0x2dd   : > { %18525 = vmatmul.mubr.msk.f32.vlgmr.msra.gmra.mrb[52].mxu0 %vm521_vm5, %v20997_v9  ;;  %v11542_v7 = vpop.f32.mrb[22].mxu0  ;;  %18955 = vmatprep.subr.bf16.mxu1 %v19339_v40  ;;  %v21136_v9 = vld [vmem:[%s21479_s6] ss:$0 sm:$0xff] }
 0x2de   : > { %18954 = vmatpush3.bf16.msk.msra.mxu0 %vm20607_vm12, %v20650_v13  ;;  %v11546_v18 = vadd.f32 %v11542_v7, %v11469_v8  ;;  %v18316_v26 = vpop.f32.mrb[23].mxu0  ;;  %18538 = vmatprep.mubr.msk.f32.mxu0 %vm19341_vm13, %v19342_v52  ;;  %v10812_v27 = vld [vmem:[#allocation3 + $0x60] ss:$2 sm:$0x7f] }
 0x2df   : > { %18532 = vmatmul.mubr.msk.f32.vlgmr.msra.gmra.mrb[54].mxu1 %vm521_vm5, %v21077_v61  ;;  %v11629_v29 = vpop.f32.mrb[24].mxu1  ;;  %18959 = vmatprep.subr.bf16.mxu0 %v19339_v40  ;;  %v10826_v30 = vld [vmem:[#allocation3 + $0x61] ss:$2 sm:$0x7f]  ;;  %v21223_v61 = vpack.c.bf16 %v16497_v63, %v16496_v60  ;;  %v16500_v26 = vld [vmem:[%s21480_s7 + $0x60] sm:$0xff]  ;;  %v16505_v63 = vld [vmem:[%s21480_s7 + $0x88] sm:$0xff] }
 0x2e0   : > { %v11553_v13 = vadd.f32 %v21125_v53, %v11546_v18  ;;  %18958 = vmatpush3.bf16.msk.msra.mxu1 %vm20607_vm12, %v20730_v15  ;;  %v18323_v10 = vpop.f32.mrb[25].mxu1  ;;  %18545 = vmatprep.mubr.msk.f32.mxu1 %vm19341_vm13, %v19342_v52  ;;  %v10833_v31 = vmax.f32 %v10812_v27, %v10826_v30  ;;  %v10847_v34 = vld [vmem:[#allocation3 + $0x62] ss:$2 sm:$0x7f]  ;;  %v16501_v27 = vld [vmem:[%s21480_s7 + $0x68] sm:$0xff]  ;;  %v16504_v60 = vld [vmem:[%s21480_s7 + $0x80] sm:$0xff] }
 0x2e1   : > { %18539 = vmatmul.mubr.msk.f32.vlgmr.msra.gmra.mrb[54].mxu0 %vm521_vm5, %v13361_v16  ;;  %v11699_v33 = vpop.f32.mrb[24].mxu0  ;;  %18963 = vmatprep.subr.bf16.mxu1 %v19339_v40  ;;  %v16499_v8 = vld [vmem:[%s21480_s7 + $0x58] sm:$0xff] }
 0x2e2   : > { %v11561_v15 = vmul.f32 %v21136_v9, %v11553_v13  ;;  %18962 = vmatpush3.bf16.msk.msra.mxu0 %vm20607_vm12, %v20680_v51  ;;  %v11700_v39 = vadd.f32 %v11699_v33, %v11629_v29  ;;  %v18330_v42 = vpop.f32.mrb[25].mxu0  ;;  %18552 = vmatprep.mubr.msk.f32.mxu0 %vm19341_vm13, %v19342_v52  ;;  %v10854_v44 = vmax.f32 %v10833_v31, %v10847_v34  ;;  %vm11554_vm4 = vcmp.ge.f32.partialorder %v11553_v13, 0.0  ;;  %v496_v51 = vld [vmem:[%s21480_s7 + $0x8] sm:$0xff]  ;;  %v16502_v33 = vld [vmem:[%s21480_s7 + $0x70] sm:$0xff]  ;;  %v16503_v34 = vld [vmem:[%s21480_s7 + $0x78] sm:$0xff] }
 0x2e3   : > { %18546 = vmatmul.mubr.msk.f32.vlgmr.msra.gmra.mrb[56].mxu1 %vm521_vm5, %v13435_v22  ;;  %v11769_v37 = vpop.f32.mrb[26].mxu1  ;;  %18967 = vmatprep.subr.bf16.mxu0 %v19339_v40  ;;  %v21190_v56 = vpack.c.bf16 %v496_v51, %v495_v46  ;;  %v21250_v10 = vpack.c.bf16 %v16499_v8, %v16498_v12  ;;  %v21268_v51 = vpack.c.bf16 %v16503_v34, %v16502_v33 }
 0x2e4   : > { %18966 = vmatpush3.bf16.msk.msra.mxu1 %vm20607_vm12, %v20753_v38  ;;  %v11773_v41 = vadd.f32 %v11769_v37, %v11700_v39  ;;  %v18337_v47 = vpop.f32.mrb[27].mxu1  ;;  %18559 = vmatprep.mubr.msk.f32.mxu1 %vm19341_vm13, %v19342_v52  ;;  %v14011_v48 = vrot.slane %v10854_v44, 1  ;;  %v16493_v38 = vld [vmem:[%s21480_s7 + $0x28] sm:$0xff]  ;;  %v11562_v2 = vsel %vm11554_vm4, %v11553_v13, %v11561_v15  ;;  %v14085_v57 = vrot.slane %v10854_v44, 2 }
 0x2e5   : > { %18553 = vmatmul.mubr.msk.f32.vlgmr.msra.gmra.mrb[56].mxu0 %vm521_vm5, %v10854_v44  ;;  %v11840_v50 = vpop.f32.mrb[26].mxu0  ;;  %18971 = vmatprep.subr.bf16.mxu1 %v19339_v40  ;;  %v21203_v21 = vpack.c.bf16 %v16493_v38, %v16492_v0  ;;  %v14164_v23 = vrot.slane %v11562_v2, 1  ;;  %v14310_v11 = vrot.slane %v11562_v2, 2  ;;  %v21260_v39 = vpack.c.bf16 %v16501_v27, %v16500_v26 }
 0x2e6   : > { %18970 = vmatpush3.bf16.msk.msra.mxu0 %vm20607_vm12, %v20774_v54  ;;  %v11844_v55 = vadd.f32 %v11840_v50, %v11773_v41  ;;  %v18344_v1 = vpop.f32.mrb[27].mxu0  ;;  %18566 = vmatprep.mubr.msk.f32.mxu0 %vm19341_vm13, %v19342_v52 }
 0x2e7   : > { %18560 = vmatmul.mubr.msk.f32.vlgmr.msra.gmra.mrb[58].mxu1 %vm521_vm5, %v14011_v48  ;;  %v11911_v58 = vpop.f32.mrb[28].mxu1  ;;  %18974 = vmatprep.subr.bf16.mxu0 %v19339_v40 }
 0x2e8   : > { %v11915_v54 = vadd.f32 %v11911_v58, %v11844_v55  ;;  %18973 = vmatpush3.bf16.msra.mxu1 %v21174_v49  ;;  %v18351_v17 = vpop.f32.mrb[29].mxu1  ;;  %18573 = vmatprep.mubr.msk.f32.mxu1 %vm19341_vm13, %v19342_v52 }
 0x2e9   : > { %18567 = vmatmul.mubr.msk.f32.vlgmr.msra.gmra.mrb[58].mxu0 %vm521_vm5, %v14085_v57  ;;  %v11982_v62 = vpop.f32.mrb[28].mxu0  ;;  %18977 = vmatprep.subr.bf16.mxu1 %v19339_v40 }
 0x2ea   : > { %v11986_v3 = vadd.f32 %v11982_v62, %v11915_v54  ;;  %18976 = vmatpush3.bf16.msra.mxu0 %v21190_v56  ;;  %v18358_v4 = vpop.f32.mrb[29].mxu0  ;;  %18580 = vmatprep.mubr.msk.f32.mxu0 %vm19341_vm13, %v19342_v52 }
 0x2eb   : > { %18574 = vmatmul.mubr.msk.f32.vlgmr.msra.gmra.mrb[60].mxu1 %vm14165_vm7, %v14164_v23  ;;  %18980 = vmatprep.subr.bf16.mxu0 %v19339_v40 }
 0x2ec   : > { %18979 = vmatpush3.bf16.msra.mxu1 %v21203_v21  ;;  %18587 = vmatprep.mubr.msk.f32.mxu1 %vm19341_vm13, %v19342_v52 }
 0x2ed   : > { %18581 = vmatmul.mubr.msk.f32.vlgmr.msra.gmra.mrb[60].mxu0 %vm14165_vm7, %v11562_v2  ;;  %18983 = vmatprep.subr.bf16.mxu1 %v19339_v40 }
 0x2ee   : > { %18982 = vmatpush3.bf16.msra.mxu0 %v21216_v28  ;;  %18594 = vmatprep.mubr.msk.f32.mxu0 %vm19341_vm13, %v19342_v52 }
 0x2ef   : > { %18588 = vmatmul.mubr.msk.f32.vlgmr.msra.gmra.mrb[62].mxu1 %vm14165_vm7, %v14310_v11  ;;  %18986 = vmatprep.subr.bf16.mxu0 %v19339_v40 }
 0x2f0   : > { %18985 = vmatpush3.bf16.msra.mxu1 %v21223_v61  ;;  %18601 = vmatprep.mubr.msk.f32.mxu1 %vm19341_vm13, %v19342_v52 }
 0x2f1   : > { %18989 = vmatprep.subr.bf16.mxu1 %v19339_v40 }
 0x31d   : > { %v12056_v5 = vpop.f32.mrb[30].mxu1 }
 0x31e   : > { %v12060_v14 = vadd.f32 %v12056_v5, %v11986_v3  ;;  %v18365_v32 = vpop.f32.mrb[31].mxu1 }
 0x31f   : > { %v12130_v16 = vpop.f32.mrb[30].mxu0 }
 0x320   : > { %v12134_v19 = vadd.f32 %v12130_v16, %v12060_v14  ;;  %v18372_v20 = vpop.f32.mrb[31].mxu0  ;;  %v21294_v16 = vpack.c.bf16 %v16505_v63, %v16504_v60 }
 0x321   : > { %v12204_v22 = vpop.f32.mrb[32].mxu1 }
 0x322   : > { %v12208_v43 = vadd.f32 %v12204_v22, %v12134_v19  ;;  %v18379_v6 = vpop.f32.mrb[33].mxu1 }
 0x323   : > { %v12279_v24 = vpop.f32.mrb[32].mxu0 }
 0x324   : > { %v12209_v25 = vadd.f32 %v21125_v53, %v12208_v43  ;;  %v18386_v7 = vpop.f32.mrb[33].mxu0 }
 0x325   : > { %v12349_v18 = vpop.f32.mrb[34].mxu1 }
 0x326   : > { %vm12210_vm5 = vcmp.ge.f32.partialorder %v12209_v25, 0.0  ;;  %v12211_v29 = vmul.f32 %v21136_v9, %v12209_v25  ;;  %v12350_v30 = vadd.f32 %v12349_v18, %v12279_v24  ;;  %v18393_v13 = vpop.f32.mrb[35].mxu1 }
 0x327   : > { %v12419_v31 = vpop.f32.mrb[34].mxu0 }
 0x328   : > { %v12423_v35 = vadd.f32 %v12419_v31, %v12350_v30  ;;  %v18400_v36 = vpop.f32.mrb[35].mxu0  ;;  %v21258_v15 = vsel %vm12210_vm5, %v12209_v25, %v12211_v29 }
 0x329   : > { %v12490_v42 = vpop.f32.mrb[36].mxu1  ;;  %18595 = vmatmul.mubr.msk.f32.vlgmr.msra.gmra.mrb[62].mxu0 %vm14165_vm7, %v21258_v15  ;;  %v14458_v44 = vrot.slane %v21258_v15, 1  ;;  %v14532_v41 = vrot.slane %v21258_v15, 2 }
 0x32a   : > { %v12494_v37 = vadd.f32 %v12490_v42, %v12423_v35  ;;  %v18407_v46 = vpop.f32.mrb[37].mxu1  ;;  %18988 = vmatpush3.bf16.msra.mxu0 %v21250_v10  ;;  %18608 = vmatprep.mubr.msk.f32.mxu0 %vm19341_vm13, %v19342_v52 }
 0x32b   : > { %v12561_v47 = vpop.f32.mrb[36].mxu0  ;;  %18602 = vmatmul.mubr.msk.f32.vlgmr.msra.gmra.mrb[64].mxu1 %vm14165_vm7, %v14458_v44  ;;  %18992 = vmatprep.subr.bf16.mxu0 %v19339_v40 }
 0x32c   : > { %v12565_v48 = vadd.f32 %v12561_v47, %v12494_v37  ;;  %v18414_v50 = vpop.f32.mrb[37].mxu0  ;;  %18991 = vmatpush3.bf16.msra.mxu1 %v21260_v39  ;;  %18615 = vmatprep.mubr.msk.f32.mxu1 %vm19341_vm13, %v19342_v52 }
 0x32d   : > { %v12632_v0 = vpop.f32.mrb[38].mxu1  ;;  %18609 = vmatmul.mubr.msk.f32.vlgmr.msra.gmra.mrb[64].mxu0 %vm14165_vm7, %v14532_v41  ;;  %18995 = vmatprep.subr.bf16.mxu1 %v19339_v40 }
 0x32e   : > { %v12636_v38 = vadd.f32 %v12632_v0, %v12565_v48  ;;  %v18421_v2 = vpop.f32.mrb[39].mxu1  ;;  %18994 = vmatpush3.bf16.msra.mxu0 %v21268_v51  ;;  %18622 = vmatprep.mubr.msk.f32.mxu0 %vm19341_vm13, %v19342_v52 }
 0x32f   : > { %18998 = vmatprep.subr.bf16.mxu0 %v19339_v40 }
 0x361   : > { %v12706_v55 = vpop.f32.mrb[38].mxu0 }
 0x362   : > { %v12710_v1 = vadd.f32 %v12706_v55, %v12636_v38  ;;  %v18428_v58 = vpop.f32.mrb[39].mxu0 }
 0x363   : > { %v12780_v57 = vpop.f32.mrb[40].mxu1 }
 0x364   : > { %v12784_v59 = vadd.f32 %v12780_v57, %v12710_v1  ;;  %v18435_v45 = vpop.f32.mrb[41].mxu1 }
 0x365   : > { %v12854_v54 = vpop.f32.mrb[40].mxu0 }
 0x366   : > { %v12858_v17 = vadd.f32 %v12854_v54, %v12784_v59  ;;  %v18442_v23 = vpop.f32.mrb[41].mxu0 }
 0x367   : > { %v12929_v62 = vpop.f32.mrb[42].mxu1 }
 0x368   : > { %v12859_v3 = vadd.f32 %v21125_v53, %v12858_v17  ;;  %v18449_v4 = vpop.f32.mrb[43].mxu1 }
 0x369   : > { %v12999_v11 = vpop.f32.mrb[42].mxu0 }
 0x36a   : > { %vm12860_vm12 = vcmp.ge.f32.partialorder %v12859_v3, 0.0  ;;  %v12861_v5 = vmul.f32 %v21136_v9, %v12859_v3  ;;  %v13000_v14 = vadd.f32 %v12999_v11, %v12929_v62  ;;  %v18456_v32 = vpop.f32.mrb[43].mxu0 }
 0x36b   : > { %v13069_v19 = vpop.f32.mrb[44].mxu1 }
 0x36c   : > { %v13073_v20 = vadd.f32 %v13069_v19, %v13000_v14  ;;  %v18463_v22 = vpop.f32.mrb[45].mxu1  ;;  %v21296_v43 = vsel %vm12860_vm12, %v12859_v3, %v12861_v5 }
 0x36d   : > { %v13140_v6 = vpop.f32.mrb[44].mxu0  ;;  %18616 = vmatmul.mubr.msk.f32.vlgmr.msra.gmra.mrb[66].mxu1 %vm14165_vm7, %v21296_v43  ;;  %v21301_v24 = vrot.slane %v21296_v43, 1  ;;  %v21309_v7 = vrot.slane %v21296_v43, 2 }
 0x36e   : > { %v13144_v12 = vadd.f32 %v13140_v6, %v13073_v20  ;;  %v18470_v8 = vpop.f32.mrb[45].mxu0  ;;  %18997 = vmatpush3.bf16.msra.mxu1 %v21294_v16  ;;  %18629 = vmatprep.mubr.msk.f32.mxu1 %vm19341_vm13, %v19342_v52 }
 0x36f   : > { %v13211_v25 = vpop.f32.mrb[46].mxu1  ;;  %18623 = vmatmul.mubr.msk.f32.vlgmr.msra.gmra.mrb[66].mxu0 %vm14165_vm7, %v21301_v24  ;;  %19001 = vmatprep.subr.bf16.mxu1 %v19339_v40 }
 0x370   : > { %v13215_v18 = vadd.f32 %v13211_v25, %v13144_v12  ;;  %v18477_v26 = vpop.f32.mrb[47].mxu1  ;;  %19000 = vmatpush3.bf16.msra.mxu0 %v21174_v49  ;;  %18636 = vmatprep.mubr.msk.f32.mxu0 %vm19341_vm13, %v19342_v52  ;;  %v16145_v25 = vld [vmem:[%s21483_s10 + $0x8] sm:$0xff] }
 0x371   : > { %v13282_v27 = vpop.f32.mrb[46].mxu0  ;;  %18630 = vmatmul.mubr.msk.f32.vlgmr.msra.gmra.mrb[68].mxu1 %vm14165_vm7, %v21309_v7  ;;  %19004 = vmatprep.subr.bf16.mxu0 %v19339_v40 }
 0x372   : > { %v13286_v29 = vadd.f32 %v13282_v27, %v13215_v18  ;;  %v18484_v30 = vpop.f32.mrb[47].mxu0  ;;  %19003 = vmatpush3.bf16.msra.mxu1 %v21190_v56  ;;  %18643 = vmatprep.mubr.msk.f32.mxu1 %vm19341_vm13, %v19342_v52  ;;  %v16147_v18 = vld [vmem:[%s21483_s10 + $0x18] sm:$0xff] }
 0x373   : > { %18637 = vmatmul.mubr.msk.f32.vlgmr.msra.gmra.mrb[68].mxu0 %vm14165_vm7, %v14458_v44  ;;  %19007 = vmatprep.subr.bf16.mxu1 %v19339_v40 }
 0x374   : > { %19006 = vmatpush3.bf16.msra.mxu0 %v21203_v21  ;;  %18650 = vmatprep.mubr.msk.f32.mxu0 %vm19341_vm13, %v19342_v52 }
 0x375   : > { %18644 = vmatmul.mubr.msk.f32.vlgmr.msra.gmra.mrb[70].mxu1 %vm14165_vm7, %v21258_v15  ;;  %19010 = vmatprep.subr.bf16.mxu0 %v19339_v40 }
 0x376   : > { %19009 = vmatpush3.bf16.msra.mxu1 %v21216_v28  ;;  %18657 = vmatprep.mubr.msk.f32.mxu1 %vm19341_vm13, %v19342_v52 }
 0x377   : > { %18651 = vmatmul.mubr.msk.f32.vlgmr.msra.gmra.mrb[70].mxu0 %vm14165_vm7, %v14532_v41  ;;  %19013 = vmatprep.subr.bf16.mxu1 %v19339_v40 }
 0x378   : > { %19012 = vmatpush3.bf16.msra.mxu0 %v21223_v61  ;;  %18664 = vmatprep.mubr.msk.f32.mxu0 %vm19341_vm13, %v19342_v52 }
 0x379   : > { %18658 = vmatmul.mubr.msk.f32.vlgmr.msra.gmra.mrb[72].mxu1 %vm14165_vm7, %v21296_v43  ;;  %19016 = vmatprep.subr.bf16.mxu0 %v19339_v40 }
 0x37a   : > { %19015 = vmatpush3.bf16.msra.mxu1 %v21250_v10  ;;  %18671 = vmatprep.mubr.msk.f32.mxu1 %vm19341_vm13, %v19342_v52 }
 0x37b   : > { %18665 = vmatmul.mubr.msk.f32.vlgmr.msra.gmra.mrb[72].mxu0 %vm14165_vm7, %v21301_v24  ;;  %19019 = vmatprep.subr.bf16.mxu1 %v19339_v40 }
 0x37c   : > { %19018 = vmatpush3.bf16.msra.mxu0 %v21260_v39  ;;  %18678 = vmatprep.mubr.msk.f32.mxu0 %vm19341_vm13, %v19342_v52 }
 0x37d   : > { %18672 = vmatmul.mubr.msk.f32.vlgmr.msra.gmra.mrb[74].mxu1 %vm14165_vm7, %v21309_v7  ;;  %19022 = vmatprep.subr.bf16.mxu0 %v19339_v40 }
 0x37e   : > { %19021 = vmatpush3.bf16.msra.mxu1 %v21268_v51  ;;  %18685 = vmatprep.mubr.msk.f32.mxu1 %vm19341_vm13, %v19342_v52 }
 0x37f   : > { %19025 = vmatprep.subr.bf16.mxu1 %v19339_v40 }
 0x3a6   : > { %v13356_v13 = vpop.f32.mrb[48].mxu1 }
 0x3a7   : > { %v13360_v31 = vadd.f32 %v13356_v13, %v13286_v29  ;;  %v18491_v33 = vpop.f32.mrb[49].mxu1 }
 0x3a8   : > { %v13430_v34 = vpop.f32.mrb[48].mxu0 }
 0x3a9   : > { %v13434_v35 = vadd.f32 %v13430_v34, %v13360_v31  ;;  %v18498_v36 = vpop.f32.mrb[49].mxu0 }
 0x3aa   : > { %v13504_v15 = vpop.f32.mrb[50].mxu1 }
 0x3ab   : > { %v13508_v42 = vadd.f32 %v13504_v15, %v13434_v35  ;;  %v18505_v44 = vpop.f32.mrb[51].mxu1 }
 0x3ac   : > { %v13579_v37 = vpop.f32.mrb[50].mxu0 }
 0x3ad   : > { %v13509_v46 = vadd.f32 %v21125_v53, %v13508_v42  ;;  %v18512_v41 = vpop.f32.mrb[51].mxu0 }
 0x3ae   : > { %v13649_v47 = vpop.f32.mrb[52].mxu1 }
 0x3af   : > { %vm13510_vm15 = vcmp.ge.f32.partialorder %v13509_v46, 0.0  ;;  %v13511_v48 = vmul.f32 %v21136_v9, %v13509_v46  ;;  %v13650_v50 = vadd.f32 %v13649_v47, %v13579_v37  ;;  %v18519_v0 = vpop.f32.mrb[53].mxu1  ;;  %v21441_v47 = vld [vmem:[%s21481_s8] ss:$0 sm:$0xff] }
 0x3b0   : > { %v13719_v38 = vpop.f32.mrb[52].mxu0 }
 0x3b1   : > { %v13723_v2 = vadd.f32 %v13719_v38, %v13650_v50  ;;  %v18526_v55 = vpop.f32.mrb[53].mxu0  ;;  %v13512_v1 = vsel %vm13510_vm15, %v13509_v46, %v13511_v48  ;;  %v21446_v38 = vld [vmem:[%s21482_s9] ss:$0 sm:$0xff] }
 0x3b2   : > { %v13790_v58 = vpop.f32.mrb[54].mxu1  ;;  %18679 = vmatmul.mubr.msk.f32.vlgmr.msra.gmra.mrb[74].mxu0 %vm14165_vm7, %v13512_v1  ;;  %v15342_v57 = vrot.slane %v13512_v1, 1  ;;  %v15416_v54 = vrot.slane %v13512_v1, 2 }
 0x3b3   : > { %v13794_v59 = vadd.f32 %v13790_v58, %v13723_v2  ;;  %19024 = vmatpush3.bf16.msra.mxu0 %v21294_v16  ;;  %v18533_v45 = vpop.f32.mrb[55].mxu1  ;;  %18692 = vmatprep.mubr.msk.f32.mxu0 %vm19341_vm13, %v19342_v52 }
 0x3b4   : > { %v13861_v17 = vpop.f32.mrb[54].mxu0  ;;  %18686 = vmatmul.mubr.msk.f32.vlgmr.msra.gmra.mrb[76].mxu1 %vm14165_vm7, %v15342_v57  ;;  %19028 = vmatprep.subr.bf16.mxu0 %v19339_v40 }
 0x3b5   : > { %v13865_v23 = vadd.f32 %v13861_v17, %v13794_v59  ;;  %19027 = vmatpush3.bf16.msra.mxu1 %v21174_v49  ;;  %v18540_v62 = vpop.f32.mrb[55].mxu0  ;;  %18699 = vmatprep.mubr.msk.f32.mxu1 %vm19341_vm13, %v19342_v52 }
 0x3b6   : > { %v13932_v60 = vpop.f32.mrb[56].mxu1  ;;  %18693 = vmatmul.mubr.msk.f32.vlgmr.msra.gmra.mrb[76].mxu0 %vm14165_vm7, %v15416_v54  ;;  %19031 = vmatprep.subr.bf16.mxu1 %v19339_v40 }
 0x3b7   : > { %v13936_v63 = vadd.f32 %v13932_v60, %v13865_v23  ;;  %19030 = vmatpush3.bf16.msra.mxu0 %v21190_v56  ;;  %v18547_v3 = vpop.f32.mrb[57].mxu1  ;;  %18706 = vmatprep.mubr.msk.f32.mxu0 %vm19341_vm13, %v19342_v52 }
 0x3b8   : > { %v14006_v4 = vpop.f32.mrb[56].mxu0  ;;  %18700 = vmatmul.mubr.msk.f32.vlgmr.msra.gmra.mrb[78].mxu1 %vm14165_vm7, %v21301_v24  ;;  %19034 = vmatprep.subr.bf16.mxu0 %v19339_v40 }
 0x3b9   : > { %v14010_v49 = vadd.f32 %v14006_v4, %v13936_v63  ;;  %19033 = vmatpush3.bf16.msra.mxu1 %v21203_v21  ;;  %v18554_v11 = vpop.f32.mrb[57].mxu0  ;;  %18713 = vmatprep.mubr.msk.f32.mxu1 %vm19341_vm13, %v19342_v52 }
 0x3ba   : > { %v14080_v5 = vpop.f32.mrb[58].mxu1  ;;  %18707 = vmatmul.mubr.msk.f32.vlgmr.msra.gmra.mrb[78].mxu0 %vm14165_vm7, %v21296_v43  ;;  %19037 = vmatprep.subr.bf16.mxu1 %v19339_v40 }
 0x3bb   : > { %v14084_v56 = vadd.f32 %v14080_v5, %v14010_v49  ;;  %19036 = vmatpush3.bf16.msra.mxu0 %v21216_v28  ;;  %v18561_v14 = vpop.f32.mrb[59].mxu1  ;;  %18720 = vmatprep.mubr.msk.f32.mxu0 %vm19341_vm13, %v19342_v52 }
 0x3bc   : > { %v14154_v32 = vpop.f32.mrb[58].mxu0  ;;  %18714 = vmatmul.mubr.msk.f32.vlgmr.msra.gmra.mrb[80].mxu1 %vm14165_vm7, %v21309_v7  ;;  %19040 = vmatprep.subr.bf16.mxu0 %v19339_v40 }
 0x3bd   : > { %v14158_v21 = vadd.f32 %v14154_v32, %v14084_v56  ;;  %19039 = vmatpush3.bf16.msra.mxu1 %v21223_v61  ;;  %v18568_v19 = vpop.f32.mrb[59].mxu0  ;;  %18727 = vmatprep.mubr.msk.f32.mxu1 %vm19341_vm13, %v19342_v52 }
 0x3be   : > { %v14234_v20 = vpop.f32.mrb[60].mxu1  ;;  %18721 = vmatmul.mubr.msk.f32.vlgmr.msra.gmra.mrb[80].mxu0 %vm14165_vm7, %v13512_v1  ;;  %19043 = vmatprep.subr.bf16.mxu1 %v19339_v40 }
 0x3bf   : > { %v14159_v28 = vadd.f32 %v21125_v53, %v14158_v21  ;;  %19042 = vmatpush3.bf16.msra.mxu0 %v21250_v10  ;;  %v18575_v22 = vpop.f32.mrb[61].mxu1  ;;  %18734 = vmatprep.mubr.msk.f32.mxu0 %vm19341_vm13, %v19342_v52 }
 0x3c0   : > { %v14306_v43 = vpop.f32.mrb[60].mxu0  ;;  %18728 = vmatmul.mubr.msk.f32.vlgmr.msra.gmra.mrb[82].mxu1 %vm14165_vm7, %v15342_v57  ;;  %19046 = vmatprep.subr.bf16.mxu0 %v19339_v40 }
 0x3c1   : > { %vm14160_vm6 = vcmp.ge.f32.partialorder %v14159_v28, 0.0  ;;  %v14161_v61 = vmul.f32 %v21136_v9, %v14159_v28  ;;  %v14307_v6 = vadd.f32 %v14306_v43, %v14234_v20  ;;  %19045 = vmatpush3.bf16.msra.mxu1 %v21260_v39  ;;  %v18582_v24 = vpop.f32.mrb[61].mxu0  ;;  %18741 = vmatprep.mubr.msk.f32.mxu1 %vm19341_vm13, %v19342_v52  ;;  %v16144_v39 = vld [vmem:[%s21483_s10] sm:$0xff] }
 0x3c2   : > { %v14379_v53 = vpop.f32.mrb[62].mxu1  ;;  %18735 = vmatmul.mubr.msk.f32.vlgmr.msra.gmra.mrb[82].mxu0 %vm14165_vm7, %v15416_v54  ;;  %19049 = vmatprep.subr.bf16.mxu1 %v19339_v40 }
 0x3c3   : > { %v14383_v10 = vadd.f32 %v14379_v53, %v14307_v6  ;;  %19048 = vmatpush3.bf16.msra.mxu0 %v21268_v51  ;;  %v18589_v12 = vpop.f32.mrb[63].mxu1  ;;  %v14162_v8 = vsel %vm14160_vm6, %v14159_v28, %v14161_v61  ;;  %18748 = vmatprep.mubr.msk.f32.mxu0 %vm19341_vm13, %v19342_v52  ;;  %v19053_v51 = vpack.c.bf16 %v16145_v25, %v16144_v39 }
 0x3c4   : > { %18742 = vmatmul.mubr.msk.f32.vlgmr.msra.gmra.mrb[84].mxu1 %vm14165_vm7, %v14162_v8  ;;  %v15992_v9 = vrot.slane %v14162_v8, 1  ;;  %19052 = vmatprep.subr.bf16.mxu0 %v19339_v40  ;;  %v16066_v7 = vrot.slane %v14162_v8, 2 }
 0x3c5   : > { %19051 = vmatpush3.bf16.msra.mxu1 %v21294_v16  ;;  %18755 = vmatprep.mubr.msk.f32.mxu1 %vm19341_vm13, %v19342_v52  ;;  %v16146_v16 = vld [vmem:[%s21483_s10 + $0x10] sm:$0xff] }
 0x3c6   : > { %18749 = vmatmul.mubr.msk.f32.vlgmr.msra.gmra.mrb[84].mxu0 %vm14165_vm7, %v15992_v9  ;;  %19058 = vmatprep.subr.bf16.mxu1 %v19339_v40  ;;  %v19056_v26 = vpack.c.bf16 %v16147_v18, %v16146_v16 }
 0x3c7   : > { %19054 = vmatpush3.bf16.msra.mxu0 %v19053_v51  ;;  %18766 = vmatprep.mubr.msk.f32.mxu0 %vm19341_vm13, %v19342_v52 }
 0x3c8   : > { %18756 = vmatmul.mubr.msk.f32.vlgmr.msra.gmra.mrb[86].mxu1 %vm14165_vm7, %v16066_v7  ;;  %19055 = vmatprep.subr.bf16.mxu0 %v19339_v40 }
 0x3c9   : > { %19060 = vmatpush3.bf16.msra.mxu1 %v19053_v51  ;;  %18777 = vmatprep.mubr.msk.f32.mxu1 %vm19341_vm13, %v19342_v52 }
 0x3ca   : > { %19061 = vmatprep.subr.bf16.mxu1 %v19339_v40 }
 0x3cb   : > { %19057 = vmatpush3.bf16.msra.mxu0 %v19056_v26 }
 0x3cc   : > { %19064 = vmatprep.subr.bf16.mxu0 %v19339_v40 }
 0x3cd   : > { %19063 = vmatpush3.bf16.msra.mxu1 %v19056_v26 }
 0x3fc   : > { %v14453_v27 = vpop.f32.mrb[62].mxu0 }
 0x3fd   : > { %v14457_v29 = vadd.f32 %v14453_v27, %v14383_v10  ;;  %v18596_v30 = vpop.f32.mrb[63].mxu0 }
 0x3fe   : > { %v14527_v13 = vpop.f32.mrb[64].mxu1 }
 0x3ff   : > { %v14531_v31 = vadd.f32 %v14527_v13, %v14457_v29  ;;  %v18603_v33 = vpop.f32.mrb[65].mxu1 }
 0x400   : > { %v14601_v34 = vpop.f32.mrb[64].mxu0 }
 0x401   : > { %v14605_v35 = vadd.f32 %v14601_v34, %v14531_v31  ;;  %v18610_v36 = vpop.f32.mrb[65].mxu0 }
 0x440   : > { %v14675_v15 = vpop.f32.mrb[66].mxu1 }
 0x441   : > { %v14679_v42 = vadd.f32 %v14675_v15, %v14605_v35  ;;  %v18617_v44 = vpop.f32.mrb[67].mxu1 }
 0x442   : > { %v14749_v37 = vpop.f32.mrb[66].mxu0 }
 0x443   : > { %v14753_v46 = vadd.f32 %v14749_v37, %v14679_v42  ;;  %v18624_v41 = vpop.f32.mrb[67].mxu0 }
 0x444   : > { %v14823_v48 = vpop.f32.mrb[68].mxu1 }
 0x445   : > { %v14827_v50 = vadd.f32 %v14823_v48, %v14753_v46  ;;  %v18631_v0 = vpop.f32.mrb[69].mxu1 }
 0x446   : > { %v14910_v2 = vpop.f32.mrb[68].mxu0  ;;  %v17007_v0 = vld [vmem:[%s21484_s11] ss:$0 sm:$0xff] }
 0x447   : > { %v14834_v55 = vadd.f32 %v21441_v47, %v14827_v50  ;;  %v18638_v1 = vpop.f32.mrb[69].mxu0 }
 0x448   : > { %v14980_v58 = vpop.f32.mrb[70].mxu1 }
 0x449   : > { %vm14835_vm8 = vcmp.ge.f32.partialorder %v14834_v55, 0.0  ;;  %v14842_v57 = vmul.f32 %v21446_v38, %v14834_v55  ;;  %v14981_v59 = vadd.f32 %v14980_v58, %v14910_v2  ;;  %v18645_v45 = vpop.f32.mrb[71].mxu1 }
 0x44a   : > { %v15050_v54 = vpop.f32.mrb[70].mxu0 }
 0x44b   : > { %v15054_v17 = vadd.f32 %v15050_v54, %v14981_v59  ;;  %v18652_v23 = vpop.f32.mrb[71].mxu0  ;;  %v14843_v62 = vsel %vm14835_vm8, %v14834_v55, %v14842_v57 }
 0x44c   : > { %v15121_v60 = vpop.f32.mrb[72].mxu1  ;;  %18767 = vmatmul.mubr.msk.f32.vlgmr.msra.gmra.mrb[86].mxu0 %vm16157_vm9, %v14843_v62 }
 0x44d   : > { %v15125_v63 = vadd.f32 %v15121_v60, %v15054_v17  ;;  %v18659_v3 = vpop.f32.mrb[73].mxu1  ;;  %19066 = vmatpush3.bf16.msra.mxu0 %v19053_v51  ;;  %18788 = vmatprep.mubr.msk.f32.mxu0 %vm19341_vm13, %v19342_v52 }
 0x44e   : > { %v15192_v4 = vpop.f32.mrb[72].mxu0  ;;  %19067 = vmatprep.subr.bf16.mxu0 %v19339_v40 }
 0x44f   : > { %v15196_v49 = vadd.f32 %v15192_v4, %v15125_v63  ;;  %v18666_v11 = vpop.f32.mrb[73].mxu0 }
 0x450   : > { %v15263_v5 = vpop.f32.mrb[74].mxu1 }
 0x451   : > { %v15267_v56 = vadd.f32 %v15263_v5, %v15196_v49  ;;  %v18673_v14 = vpop.f32.mrb[75].mxu1  ;;  %19069 = vmatpush3.bf16.msra.mxu0 %v19056_v26 }
 0x485   : > { %v15337_v32 = vpop.f32.mrb[74].mxu0 }
 0x486   : > { %v15341_v21 = vadd.f32 %v15337_v32, %v15267_v56  ;;  %v18680_v19 = vpop.f32.mrb[75].mxu0 }
 0x487   : > { %v15411_v20 = vpop.f32.mrb[76].mxu1 }
 0x488   : > { %v15415_v28 = vadd.f32 %v15411_v20, %v15341_v21  ;;  %v18687_v22 = vpop.f32.mrb[77].mxu1 }
 0x489   : > { %v15485_v43 = vpop.f32.mrb[76].mxu0 }
 0x48a   : > { %v15489_v61 = vadd.f32 %v15485_v43, %v15415_v28  ;;  %v18694_v6 = vpop.f32.mrb[77].mxu0 }
 0x48b   : > { %v15560_v24 = vpop.f32.mrb[78].mxu1 }
 0x48c   : > { %v15490_v52 = vadd.f32 %v21441_v47, %v15489_v61  ;;  %v18701_v53 = vpop.f32.mrb[79].mxu1 }
 0x48d   : > { %v15630_v40 = vpop.f32.mrb[78].mxu0 }
 0x48e   : > { %vm15491_vm13 = vcmp.ge.f32.partialorder %v15490_v52, 0.0  ;;  %v15492_v10 = vmul.f32 %v21446_v38, %v15490_v52  ;;  %v15631_v12 = vadd.f32 %v15630_v40, %v15560_v24  ;;  %v18708_v8 = vpop.f32.mrb[79].mxu0 }
 0x48f   : > { %v15700_v9 = vpop.f32.mrb[80].mxu1 }
 0x490   : > { %v15704_v39 = vadd.f32 %v15700_v9, %v15631_v12  ;;  %v18715_v25 = vpop.f32.mrb[81].mxu1  ;;  %v15493_v51 = vsel %vm15491_vm13, %v15490_v52, %v15492_v10 }
 0x491   : > { %v15771_v7 = vpop.f32.mrb[80].mxu0  ;;  %18778 = vmatmul.mubr.msk.f32.vlgmr.msra.gmra.mrb[88].mxu1 %vm16157_vm9, %v15493_v51 }
 0x492   : > { %v15775_v16 = vadd.f32 %v15771_v7, %v15704_v39  ;;  %v18722_v18 = vpop.f32.mrb[81].mxu0 }
 0x493   : > { %v15842_v26 = vpop.f32.mrb[82].mxu1 }
 0x494   : > { %v15846_v27 = vadd.f32 %v15842_v26, %v15775_v16  ;;  %v18729_v29 = vpop.f32.mrb[83].mxu1 }
 0x495   : > { %v15913_v30 = vpop.f32.mrb[82].mxu0 }
 0x496   : > { %v15917_v13 = vadd.f32 %v15913_v30, %v15846_v27  ;;  %v18736_v31 = vpop.f32.mrb[83].mxu0 }
 0x497   : > { %v15987_v33 = vpop.f32.mrb[84].mxu1 }
 0x498   : > { %v15991_v34 = vadd.f32 %v15987_v33, %v15917_v13  ;;  %v18743_v35 = vpop.f32.mrb[85].mxu1 }
 0x499   : > { %v16061_v36 = vpop.f32.mrb[84].mxu0 }
 0x49a   : > { %v16065_v15 = vadd.f32 %v16061_v36, %v15991_v34  ;;  %v18750_v42 = vpop.f32.mrb[85].mxu0 }
 0x49b   : > { %v16135_v44 = vpop.f32.mrb[86].mxu1 }
 0x49c   : > { %v16139_v37 = vadd.f32 %v16135_v44, %v16065_v15  ;;  %v18757_v46 = vpop.f32.mrb[87].mxu1 }
 0x49e   : > { %v16140_v41 = vadd.f32 %v21441_v47, %v16139_v37  ;;  %v16149_v47 = vlaneseq }
 0x4a0   : > { %vm16141_vm10 = vcmp.ge.f32.partialorder %v16140_v41, 0.0  ;;  %v16142_v48 = vmul.f32 %v21446_v38, %v16140_v41  ;;  %v16150_v54 = vand.u32 127, %v16149_v47 }
 0x4a2   : > { %v16143_v50 = vsel %vm16141_vm10, %v16140_v41, %v16142_v48  ;;  %vm16237_vm11 = vcmp.eq.s32.totalorder %v16150_v54, 0 }
 0x4a3   : > { %18789 = vmatmul.mubr.msk.f32.vlgmr.msra.gmra.mrb[88].mxu0 %vm16157_vm9, %v16143_v50 }
 0x51f   : > { %v16227_v2 = vpop.f32.mrb[86].mxu0 }
 0x520   : > { %v16228_v55 = vadd.f32 %v17007_v0, %v16227_v2  ;;  %v18768_v1 = vpop.f32.mrb[87].mxu0 }
 0x522   : > { %v16231_v58 = vsub.f32 0.0, %v16228_v55 }
 0x524   : > { %v16232_v57 = vmul.f32 1.442695, %v16231_v58 }
 0x526   : > { %19307 = vpow2.f32 %v16232_v57 }
 0x530   : > { %v19308_v59 = vpop.eup %19307 }
 0x531   : > { %v16234_v45 = vadd.f32 1.0, %v19308_v59 }
 0x533   : > { %19309 = vrcp.f32 %v16234_v45 }
 0x53d   : > { %v19310_v38 = vpop.eup %19309 }
 0x53e   : > { %v16238_v17 = vsel %vm16237_vm11, %v19310_v38, %v16228_v55 }
 0x53f   : > { %16239 = vst [vmem:[%s413_s20] sm:$0x7] %v16238_v17 }
 0x564   : > { %v16309_v23 = vpop.f32.mrb[88].mxu1 }
 0x565   : > { %v16310_v62 = vadd.f32 %v17007_v0, %v16309_v23  ;;  %v18779_v60 = vpop.f32.mrb[89].mxu1 }
 0x567   : > { %v16313_v63 = vsub.f32 0.0, %v16310_v62 }
 0x569   : > { %v16314_v3 = vmul.f32 1.442695, %v16313_v63 }
 0x56b   : > { %19311 = vpow2.f32 %v16314_v3 }
 0x575   : > { %v19312_v4 = vpop.eup %19311 }
 0x576   : > { %v16316_v49 = vadd.f32 1.0, %v19312_v4  ;;  %v16390_v11 = vpop.f32.mrb[88].mxu0 }
 0x577   : > { %v16391_v5 = vadd.f32 %v17007_v0, %v16390_v11  ;;  %v18790_v56 = vpop.f32.mrb[89].mxu0 }
 0x578   : > { %19313 = vrcp.f32 %v16316_v49 }
 0x579   : > { %v16394_v14 = vsub.f32 0.0, %v16391_v5 }
 0x57b   : > { %v16395_v32 = vmul.f32 1.442695, %v16394_v14 }
 0x57d   : > { %19315 = vpow2.f32 %v16395_v32 }
 0x582   : > { %v19314_v21 = vpop.eup %19313 }
 0x583   : > { %v16319_v19 = vsel %vm16237_vm11, %v19314_v21, %v16310_v62 }
 0x584   : > { %16320 = vst [vmem:[%s413_s20 + $0x3] sm:$0x7] %v16319_v19 }
 0x587   : > { %v19316_v20 = vpop.eup %19315 }
 0x588   : > { %v16397_v28 = vadd.f32 1.0, %v19316_v20 }
 0x58a   : > { %19317 = vrcp.f32 %v16397_v28 }
 0x594   : > { %v19318_v22 = vpop.eup %19317 }
 0x595   : > { %v16400_v43 = vsel %vm16237_vm11, %v19318_v22, %v16391_v5 }
 0x596   : > { %16401 = vst [vmem:[%s413_s20 + $0x6] sm:$0x7] %v16400_v43 }
 0x597 PF: > { %s22_s21 = sadd.s32 1, %s19336_s21  }
 0x598   : > { %p19_p4 = scmp.ge.s32.totalorder %s22_s21, 4  }
 0x59a   :  { %21 = sbr.rel (!%p19_p4) target bundleno = 1 (0x1), region = 155 }

</bundles_post_ra>
